<compile_context>
chip_gen: v7x
topology: tpu7x:2x2x1
jax: 0.10.0
libtpu: 0.0.40
codegen_flags: <defaults>
</compile_context>

<pallas_src>
import numpy as np

import jax
import jax.numpy as jnp
from jax.experimental import pallas as pl
from jax.experimental.pallas import tpu as pltpu


def _cbam_kernel(x_ref, fc1_ref, fc2_ref, convmat_ref, o_ref):
    # x_ref / o_ref : (Nb, C, H*W) f32 in VMEM (lane-dense last dim)
    # fc1_ref       : (C, Cr) f32  (pre-transposed 1x1-conv weight)
    # fc2_ref       : (Cr, C) f32  (pre-transposed 1x1-conv weight)
    # convmat_ref   : (2*HW, HW) f32 = 7x7 spatial conv (avg & max channels)
    #                 with zero-padding boundary masks baked in.
    x = x_ref[...]
    Nb, C, HW = x.shape
    prec = jax.lax.Precision.HIGHEST

    # ---------------- Channel attention ----------------
    avg = jnp.mean(x, axis=-1)   # (Nb, C)  lane reduction
    mx = jnp.max(x, axis=-1)     # (Nb, C)

    # Fused shared MLP: one pass over stacked [avg; max] (2 MXU matmuls).
    pooled = jnp.concatenate([avg, mx], axis=0)                       # (2*Nb, C)
    hid = jnp.maximum(
        jnp.dot(pooled, fc1_ref[...], precision=prec,
                preferred_element_type=jnp.float32), 0.0)             # (2*Nb, Cr)
    mlp_out = jnp.dot(hid, fc2_ref[...], precision=prec,
                      preferred_element_type=jnp.float32)             # (2*Nb, C)
    scale_c = jax.nn.sigmoid(mlp_out[:Nb] + mlp_out[Nb:])             # (Nb, C)

    # x1 = x * ChannelGate(x) = x * (x * scale_c)  -> fused x*x*scale_c
    x1 = x * x * scale_c[:, :, None]                                  # (Nb, C, HW)

    # ---------------- Spatial attention ----------------
    avg_c = jnp.mean(x1, axis=1)   # (Nb, HW)  channel (sublane) reduction
    max_c = jnp.max(x1, axis=1)    # (Nb, HW)

    # 7x7 zero-padded conv over the flattened spatial axis as one MXU matmul:
    #   conv[n, p] = sum_{q} avg_c[n, q] * M[q, p] + max_c[n, q] * M[HW+q, p]
    cat = jnp.concatenate([avg_c, max_c], axis=-1)                    # (Nb, 2*HW)
    conv = jnp.dot(cat, convmat_ref[...], precision=prec,
                   preferred_element_type=jnp.float32)                # (Nb, HW)
    scale_s = jax.nn.sigmoid(conv)

    # out = x1 * SpatialGate(x1) = x1 * (x1 * scale_s)  -> fused x1*x1*scale_s
    o_ref[...] = x1 * x1 * scale_s[:, None, :]


def _build_spatial_conv_matrix(conv_w, H, W):
    """(1, 2, 7, 7) conv weight -> (2*H*W, H*W) matrix with zero-padding baked in.

    Row c*HW + src, column dst holds k[0, c, dy, dx] for the tap that maps the
    (in-bounds) source pixel `src` to output pixel `dst`; out-of-bounds taps
    simply have no entry (== zero padding).
    """
    HW = H * W
    kH = kW = 7
    pad = 3
    k_flat = conv_w.astype(jnp.float32).reshape(2 * kH * kW)  # [avg taps, max taps]

    hh, ww = np.meshgrid(np.arange(H), np.arange(W), indexing="ij")
    dst = (hh * W + ww).reshape(-1)

    rows, cols, taps = [], [], []
    for c in range(2):
        for dy in range(kH):
            for dx in range(kW):
                sh = hh + dy - pad
                sw = ww + dx - pad
                valid = ((sh >= 0) & (sh < H) & (sw >= 0) & (sw < W)).reshape(-1)
                src = (sh * W + sw).reshape(-1)
                rows.append(c * HW + src[valid])
                cols.append(dst[valid])
                taps.append(
                    np.full(int(valid.sum()), c * kH * kW + dy * kW + dx, np.int32))
    rows = np.concatenate(rows)
    cols = np.concatenate(cols)
    taps = np.concatenate(taps)

    mat = jnp.zeros((2 * HW, HW), jnp.float32)
    return mat.at[rows, cols].add(k_flat[taps])


def _tpu_generation_info():
    """Return (single_tensorcore, vmem_capacity_bytes) with conservative fallback."""
    try:
        info = pltpu.get_tpu_info()
        vmem = int(getattr(info, "vmem_capacity_bytes", 0)) or (64 << 20)
    except Exception:
        vmem = 64 << 20  # conservative (v7x-like)
    # v5e/v6e: 128 MiB VMEM, 1 TensorCore/chip.  v7x: 64 MiB per TC, 2 TCs.
    single_tc = vmem >= (96 << 20)
    return single_tc, vmem


def cbam_pallas(x, fc1_w, fc2_w, conv_w):
    """x: (N, C, H, W) f32; fc1_w: (C//r, C); fc2_w: (C, C//r); conv_w: (1, 2, 7, 7)."""
    N, C, H, W = x.shape
    HW = H * W
    Cr = fc1_w.shape[0]

    # Free metadata reshape for contiguous NCHW -> lane-dense (N, C, H*W).
    x_flat = x.astype(jnp.float32).reshape(N, C, HW)
    fc1_t = jnp.transpose(fc1_w.astype(jnp.float32))        # (C, Cr)
    fc2_t = jnp.transpose(fc2_w.astype(jnp.float32))        # (Cr, C)
    conv_mat = _build_spatial_conv_matrix(conv_w, H, W)     # (2*HW, HW)

    per_ex_bytes = C * HW * 4
    conv_mat_bytes = 2 * HW * HW * 4

    single_tc, vmem_phys = _tpu_generation_info()
    if single_tc:
        # v5e / v6e: single TensorCore -> no forced grid split, big blocks.
        target_block = 16 << 20
        min_steps = 1
        vmem_cap = min(100 << 20, int(0.8 * vmem_phys))
    else:
        # v7x-like: keep >= 2 grid steps so the batch shards across both TCs,
        # and stay well under the 64 MiB per-core VMEM.
        target_block = 8 << 20
        min_steps = 2 if N >= 2 else 1
        vmem_cap = min(48 << 20, int(0.8 * vmem_phys))

    max_nb = max(1, N // min_steps)
    nb = 1
    for d in range(1, N + 1):
        if N % d == 0 and d <= max_nb and d * per_ex_bytes <= target_block:
            nb = d
    grid = (N // nb,)

    block_bytes = nb * per_ex_bytes
    vmem_limit = int(min(vmem_cap,
                         max(16 << 20,
                             4 * block_bytes + 2 * conv_mat_bytes + (4 << 20))))

    out_flat = pl.pallas_call(
        _cbam_kernel,
        out_shape=jax.ShapeDtypeStruct((N, C, HW), jnp.float32),
        grid=grid,
        in_specs=[
            pl.BlockSpec((nb, C, HW), lambda n: (n, 0, 0)),
            pl.BlockSpec((C, Cr), lambda n: (0, 0)),
            pl.BlockSpec((Cr, C), lambda n: (0, 0)),
            pl.BlockSpec((2 * HW, HW), lambda n: (0, 0)),
        ],
        out_specs=pl.BlockSpec((nb, C, HW), lambda n: (n, 0, 0)),
        compiler_params=pltpu.CompilerParams(
            dimension_semantics=("parallel",),
            vmem_limit_bytes=vmem_limit,
        ),
    )(x_flat, fc1_t, fc2_t, conv_mat)

    return out_flat.reshape(N, C, H, W)


def cbam_reference(x, fc1_w, fc2_w, conv_w):
    """Pure-JAX reference matching the PyTorch module semantics (NCHW)."""
    prec = jax.lax.Precision.HIGHEST
    avg = jnp.mean(x, axis=(2, 3), keepdims=True)
    mx = jnp.max(x, axis=(2, 3), keepdims=True)

    def mlp(p):
        h = jnp.maximum(jnp.einsum('oc,nchw->nohw', fc1_w, p, precision=prec), 0.0)
        return jnp.einsum('co,nohw->nchw', fc2_w, h, precision=prec)

    scale_c = jax.nn.sigmoid(mlp(avg) + mlp(mx))
    ca_map = x * scale_c
    x1 = x * ca_map

    a = jnp.mean(x1, axis=1, keepdims=True)
    m = jnp.max(x1, axis=1, keepdims=True)
    cat = jnp.concatenate([a, m], axis=1)
    conv = jax.lax.conv_general_dilated(
        cat, conv_w, window_strides=(1, 1), padding=[(3, 3), (3, 3)],
        dimension_numbers=('NCHW', 'OIHW', 'NCHW'), precision=prec)
    scale_s = jax.nn.sigmoid(conv)
    sa_map = x1 * scale_s
    return x1 * sa_map


if __name__ == "__main__":
    # gate_channels=32, reduction_ratio=16  ->  hidden channels = 2
    N, C, H, W = 2, 32, 16, 16
    ratio = 16
    Cr = C // ratio

    key = jax.random.PRNGKey(0)
    kx, k1, k2, k3 = jax.random.split(key, 4)
    x = jax.random.normal(kx, (N, C, H, W), dtype=jnp.float32)
    fc1_w = 0.1 * jax.random.normal(k1, (Cr, C), dtype=jnp.float32)        # Conv2d(C, C//r, 1)
    fc2_w = 0.1 * jax.random.normal(k2, (C, Cr), dtype=jnp.float32)        # Conv2d(C//r, C, 1)
    conv_w = 0.1 * jax.random.normal(k3, (1, 2, 7, 7), dtype=jnp.float32)  # Conv2d(2, 1, 7)

    out = cbam_pallas(x, fc1_w, fc2_w, conv_w)
    out = jax.block_until_ready(out)

    ref = cbam_reference(x, fc1_w, fc2_w, conv_w)
    assert out.shape == (N, C, H, W)
    assert jnp.allclose(out, ref, rtol=1e-4, atol=3e-5), "mismatch vs JAX reference"

    print("KERNEL_OK")
</pallas_src>

<mosaic_0001>
module attributes {stable_mosaic.version = 11 : i64} {
  func.func @_cbam_kernel(%arg0: i32, %arg1: memref<1x32x256xf32, #tpu.memory_space<vmem>>, %arg2: memref<32x2xf32, #tpu.memory_space<vmem>>, %arg3: memref<2x32xf32, #tpu.memory_space<vmem>>, %arg4: memref<512x256xf32, #tpu.memory_space<vmem>>, %arg5: memref<1x32x256xf32, #tpu.memory_space<vmem>>) attributes {dimension_semantics = [#tpu.dimension_semantics<parallel>], iteration_bounds = array<i64: 2>, scalar_prefetch = 0 : i64, scratch_operands = 0 : i64, tpu.core_type = #tpu.core_type<tc>, window_params = [{transform_indices = @transform_0, window_bounds = array<i64: 1, 32, 256>}, {pipeline_mode = #tpu.pipeline_mode<synchronous>, transform_indices = @transform_1, window_bounds = array<i64: 32, 2>}, {pipeline_mode = #tpu.pipeline_mode<synchronous>, transform_indices = @transform_2, window_bounds = array<i64: 2, 32>}, {pipeline_mode = #tpu.pipeline_mode<synchronous>, transform_indices = @transform_3, window_bounds = array<i64: 512, 256>}, {transform_indices = @transform_4, window_bounds = array<i64: 1, 32, 256>}]} {
    %c0 = arith.constant 0 : index
    %c0_0 = arith.constant 0 : index
    %c0_1 = arith.constant 0 : index
    %0 = vector.load %arg1[%c0, %c0_0, %c0_1] : memref<1x32x256xf32, #tpu.memory_space<vmem>>, vector<1x32x256xf32>
    %cst = arith.constant dense<0.000000e+00> : vector<1x32xf32>
    %1 = vector.multi_reduction <add>, %0, %cst [2] : vector<1x32x256xf32> to vector<1x32xf32>
    %cst_2 = arith.constant 2.560000e+02 : f32
    %2 = vector.broadcast %cst_2 : f32 to vector<1x32xf32>
    %3 = arith.divf %1, %2 : vector<1x32xf32>
    %cst_3 = arith.constant dense<0xFF800000> : vector<1x32xf32>
    %4 = vector.multi_reduction <maximumf>, %0, %cst_3 [2] : vector<1x32x256xf32> to vector<1x32xf32>
    %5 = tpu.concatenate %3, %4 in 0 : vector<1x32xf32>, vector<1x32xf32> -> vector<2x32xf32>
    %c0_4 = arith.constant 0 : index
    %c0_5 = arith.constant 0 : index
    %6 = vector.load %arg2[%c0_4, %c0_5] : memref<32x2xf32, #tpu.memory_space<vmem>>, vector<32x2xf32>
    %cst_6 = arith.constant dense<0.000000e+00> : vector<2x2xf32>
    %7 = tpu.matmul %5, %6, %cst_6 {dimension_numbers = #tpu.dot_dimension_numbers<[1], [0], [0], [1], [0, 0, 1, 1], [], []>, precision = #tpu.contract_precision<fp32>} : vector<2x32xf32>, vector<32x2xf32>, vector<2x2xf32> -> vector<2x2xf32>
    %cst_7 = arith.constant 0.000000e+00 : f32
    %8 = vector.broadcast %cst_7 : f32 to vector<2x2xf32>
    %9 = arith.maximumf %7, %8 : vector<2x2xf32>
    %c0_8 = arith.constant 0 : index
    %c0_9 = arith.constant 0 : index
    %10 = vector.load %arg3[%c0_8, %c0_9] : memref<2x32xf32, #tpu.memory_space<vmem>>, vector<2x32xf32>
    %cst_10 = arith.constant dense<0.000000e+00> : vector<2x32xf32>
    %11 = tpu.matmul %9, %10, %cst_10 {dimension_numbers = #tpu.dot_dimension_numbers<[1], [0], [0], [1], [0, 0, 1, 1], [], []>, precision = #tpu.contract_precision<fp32>} : vector<2x2xf32>, vector<2x32xf32>, vector<2x32xf32> -> vector<2x32xf32>
    %12 = vector.extract_strided_slice %11 {offsets = [0, 0], sizes = [1, 32], strides = [1, 1]} : vector<2x32xf32> to vector<1x32xf32>
    %13 = vector.extract_strided_slice %11 {offsets = [1, 0], sizes = [1, 32], strides = [1, 1]} : vector<2x32xf32> to vector<1x32xf32>
    %14 = arith.addf %12, %13 : vector<1x32xf32>
    %15 = arith.negf %14 : vector<1x32xf32>
    %16 = math.exp %15 : vector<1x32xf32>
    %cst_11 = arith.constant 1.000000e+00 : f32
    %17 = vector.broadcast %cst_11 : f32 to vector<1x32xf32>
    %18 = arith.addf %17, %16 : vector<1x32xf32>
    %19 = arith.divf %17, %18 : vector<1x32xf32>
    %20 = arith.mulf %0, %0 : vector<1x32x256xf32>
    %21 = vector.shape_cast %19 : vector<1x32xf32> to vector<1x32x1xf32>
    %22 = vector.broadcast %21 : vector<1x32x1xf32> to vector<1x32x256xf32>
    %23 = arith.mulf %20, %22 : vector<1x32x256xf32>
    %cst_12 = arith.constant dense<0.000000e+00> : vector<1x256xf32>
    %24 = vector.multi_reduction <add>, %23, %cst_12 [1] : vector<1x32x256xf32> to vector<1x256xf32>
    %cst_13 = arith.constant 3.200000e+01 : f32
    %25 = vector.broadcast %cst_13 : f32 to vector<1x256xf32>
    %26 = arith.divf %24, %25 : vector<1x256xf32>
    %cst_14 = arith.constant dense<0xFF800000> : vector<1x256xf32>
    %27 = vector.multi_reduction <maximumf>, %23, %cst_14 [1] : vector<1x32x256xf32> to vector<1x256xf32>
    %28 = tpu.concatenate %26, %27 in 1 : vector<1x256xf32>, vector<1x256xf32> -> vector<1x512xf32>
    %c0_15 = arith.constant 0 : index
    %c0_16 = arith.constant 0 : index
    %29 = vector.load %arg4[%c0_15, %c0_16] : memref<512x256xf32, #tpu.memory_space<vmem>>, vector<512x256xf32>
    %cst_17 = arith.constant dense<0.000000e+00> : vector<1x256xf32>
    %30 = tpu.matmul %28, %29, %cst_17 {dimension_numbers = #tpu.dot_dimension_numbers<[1], [0], [0], [1], [0, 0, 1, 1], [], []>, precision = #tpu.contract_precision<fp32>} : vector<1x512xf32>, vector<512x256xf32>, vector<1x256xf32> -> vector<1x256xf32>
    %31 = arith.negf %30 : vector<1x256xf32>
    %32 = math.exp %31 : vector<1x256xf32>
    %cst_18 = arith.constant 1.000000e+00 : f32
    %33 = vector.broadcast %cst_18 : f32 to vector<1x256xf32>
    %34 = arith.addf %33, %32 : vector<1x256xf32>
    %35 = arith.divf %33, %34 : vector<1x256xf32>
    %36 = arith.mulf %23, %23 : vector<1x32x256xf32>
    %37 = vector.shape_cast %35 : vector<1x256xf32> to vector<1x1x256xf32>
    %38 = vector.broadcast %37 : vector<1x1x256xf32> to vector<1x32x256xf32>
    %39 = arith.mulf %36, %38 : vector<1x32x256xf32>
    %c0_19 = arith.constant 0 : index
    %c0_20 = arith.constant 0 : index
    %c0_21 = arith.constant 0 : index
    %40 = vector.load %arg5[%c0_19, %c0_20, %c0_21] : memref<1x32x256xf32, #tpu.memory_space<vmem>>, vector<1x32x256xf32>
    tpu.vector_store %arg5[%c0_19, %c0_20, %c0_21], %39 {strides = array<i32>} : memref<1x32x256xf32, #tpu.memory_space<vmem>>, vector<1x32x256xf32>,
    return
  }
  func.func @transform_0(%arg0: i32) -> (i32, i32, i32) {
    %c0_i32 = arith.constant 0 : i32
    %c0_i32_0 = arith.constant 0 : i32
    %c0_i32_1 = arith.constant 0 : i32
    return %arg0, %c0_i32, %c0_i32_0 : i32, i32, i32
  }
  func.func @transform_1(%arg0: i32) -> (i32, i32) {
    %c0_i32 = arith.constant 0 : i32
    %c0_i32_0 = arith.constant 0 : i32
    %c0_i32_1 = arith.constant 0 : i32
    return %c0_i32, %c0_i32_0 : i32, i32
  }
  func.func @transform_2(%arg0: i32) -> (i32, i32) {
    %c0_i32 = arith.constant 0 : i32
    %c0_i32_0 = arith.constant 0 : i32
    %c0_i32_1 = arith.constant 0 : i32
    return %c0_i32, %c0_i32_0 : i32, i32
  }
  func.func @transform_3(%arg0: i32) -> (i32, i32) {
    %c0_i32 = arith.constant 0 : i32
    %c0_i32_0 = arith.constant 0 : i32
    %c0_i32_1 = arith.constant 0 : i32
    return %c0_i32, %c0_i32_0 : i32, i32
  }
  func.func @transform_4(%arg0: i32) -> (i32, i32, i32) {
    %c0_i32 = arith.constant 0 : i32
    %c0_i32_0 = arith.constant 0 : i32
    %c0_i32_1 = arith.constant 0 : i32
    return %arg0, %c0_i32, %c0_i32_0 : i32, i32, i32
  }
}

</mosaic_0001>

<bundles_post_ra>
// kernel: tpu_custom_call.1
= control target key start
LH: loop header
LB: loop body
LE: loop exit
PB: predicated region body
PF: predicated region fallthrough
CT: control target
= control target key end

     0   :  { %9 = vsyncpa [#allocation3], 0  ;;  %s7962_s0 = inlined_call_operand.hbm [shape: f32[2,32,256], index: 0, kind: input, shape index: {}]   ;;  %s7963_s1 = inlined_call_operand.vmem [shape: f32[32,2], index: 1, kind: input, shape index: {}]   ;;  %s7964_s2 = inlined_call_operand.vmem [shape: f32[2,32], index: 2, kind: input, shape index: {}]   ;;  %s7965_s3 = inlined_call_operand.hbm [shape: f32[512,256], index: 3, kind: input, shape index: {}]   ;;  %s7966_s4 = inlined_call_operand.hbm [shape: f32[2,32,256], index: 4, kind: output, shape index: {}]  }
   0x1   :  { %11 = vsyncpa [#allocation3 + $0x1], 0 }
   0x2   :  { %12 = vsyncpa [#allocation6], 0 }
   0x3   :  { %13 = vsyncpa [#allocation4], 0 }
   0x4   :  { %15 = vsyncpa [#allocation4 + $0x1], 0  ;;  %s5449_s15 = smov 0   ;;  %s5451_s16 = smov 0  }
   0x5   :  { %s5453_s17 = smov 0   ;;  %s5455_s18 = smov 0  }
   0x6 LB: > { %s5470_s19 = sadd.s32 4294967295, %s5412_s18   ;;  %s4196_s20 = sadd.s32 4294967294, %s5412_s18   ;;  %s5412_s18 = sphi %s5455_s18, %s9439_s18   ;;  %s5408_s17 = sphi %s5453_s17, %s9438_s17   ;;  %s5404_s16 = sphi %s5451_s16, %s9437_s16   ;;  %s5400_s15 = sphi %s5449_s15, %s9436_s15  }
   0x7   : > { %p41_p0 = scmp.ne.s32.totalorder %s5404_s16, %s5400_s15  ;;  %p7967_p1 = scmp.eq.s32.totalorder %s5470_s19, 0 }
   0x8   : > { %p134_p3 = scmp.eq.s32.totalorder %s4196_s20, 1  ;;  %p4197_p5 = scmp.ge.s32.totalorder %s5412_s18, 1 }
   0x9   : > { %p5479_p4 = por %p7967_p1, %p41_p0  ;;  %p141_p7 = scmp.lt.s32.totalorder %s5412_s18, 3 }
   0xa   : > { %p5484_p6 = por %p134_p3, %p41_p0  ;;  %s5414_s24 = smov [#allocation5]  }
   0xb   : > { %s8394_s21 = scalar_select %p5479_p4, 1, 0 }
   0xc   : > { %s8395_s22 = scalar_select %p5484_p6, 1, 0 }
   0xd   : > { %p5489_p8 = pnand %p4197_p5, %p141_p7  ;;  %s159_s25 = sshll.u32 %s5414_s24, 4  ;;  %s5493_s25 = int_to_ptr.vmem [resolvable:$true] %s159_s25 }
   0xe   : > { %s5505_s27 = sadd.s32 1, %s5412_s18   ;;  %s28_s28 = sadd.s32 1, %s5408_s17 }
   0xf   : > { %s8396_s23 = scalar_select %p5489_p8, 1, 0 }
  0x10   : > { %p5208_p9 = pneg %p5489_p8  ;;  %s25_s29 = ssub.s32 %s5412_s18, %s5505_s27 }
  0x11   : > { %s5284_s6 = scalar_lea.hbm %s7965_s3, 16384 }
  0x12   : > { %p5500_p11 = pnand %p5208_p9, %p7967_p1  ;;  %p5285_p12 = scmp.ne.s32.totalorder %s7965_s3, %s5284_s6 }
  0x13   : > { %p5291_p5 = scmp.lt.u32.totalorder %s5284_s6, %s7965_s3 }
  0x14   : > { %p5286_p13 = pneg %p5500_p11 }
  0x16   : > { %p5287_p0 = pnand %p5286_p13, %p5285_p12 }
  0x18   : > { %p5288_p3 = pneg %p5287_p0 }
  0x1a   : > { %p5293_p7 = pnand %p5291_p5, %p5288_p3 }
  0x1c   : > { %5296 = shalt.err (!%p5293_p7)
}
  0x1d   : > { %s5297_s11 = scalar_lea.vmem %s5493_s25, 16384  ;;  %p5305_p2 = scmp.lt.s32.totalorder %s5493_s25, %s5493_s25 }
  0x1e   : > { %p5298_p9 = scmp.ne.s32.totalorder %s5493_s25, %s5297_s11  ;;  %p5306_p6 = scmp.lt.s32.totalorder %s5297_s11, %s5297_s11 }
  0x20   : > { %p5300_p10 = pnand %p5298_p9, %p5286_p13  ;;  %p5307_p4 = por %p5306_p6, %p5305_p2 }
  0x22   : > { %p5301_p1 = pneg %p5300_p10 }
  0x24   : > { %p5308_p8 = pnand %p5307_p4, %p5301_p1 }
  0x26   : > { %5311 = shalt.err (!%p5308_p8)
}
  0x27   : > { %s5415_s12 = smov 256   ;;  %s5416_s13 = smov 16  }
  0x28   : > { %5211 = dma.hbm_to_vmem [thread:$0]  (!%p5500_p11), %s7965_s3, 16384, %s5493_s25, [#allocation6], %s5415_s12, %s5415_s12, %s5416_s13  }
  0x29   : > { %p26_p1 = scmp.eq.s32.totalorder %s25_s29, 0  ;;  %p35_p2 = scmp.ne.s32.totalorder %s5408_s17, %s5404_s16 }
  0x2a   : > { %p36_p4 = scmp.eq.s32.totalorder %s5412_s18, 0  ;;  %p5221_p6 = scmp.lt.s32.totalorder %s5412_s18, 2 }
  0x2b   : > { %s5539_s24 = scalar_select %p26_p1, %s5408_s17, %s28_s28  }
  0x2c   : > { %p37_p8 = por %p36_p4, %p35_p2  ;;  %p8398_p10 = scmp.eq.s32.totalorder %s5470_s19, 1 }
  0x2d   : > { %s173_s26 = sand.u32 1, %s5408_s17   ;;  %s4215_s5 = sshll.u32 %s5412_s18, 10 }
  0x2e   : > { %p5543_p12 = por %p8398_p10, %p35_p2  ;;  %s4200_s6 = sshll.u32 %s173_s26, 6 }
  0x2f   : > { %s5552_s9 = scalar_lea.hbm %s7962_s0, %s4215_s5  ;;  %s177_s25 = scalar_lea.vmem [#allocation2], %s4200_s6 }
  0x30   : > { %s184_s28 = sshll.u32 %s177_s25, 4  ;;  %p5554_p11 = pnand %p5221_p6, %p37_p8  ;;  %s5558_s28 = int_to_ptr.vmem [resolvable:$true] %s184_s28 }
  0x31   : > { %s5560_s10 = scalar_lea.sflag [#allocation3], %s173_s26  ;;  %s5312_s11 = scalar_lea.hbm %s5552_s9, 1024 }
  0x32   : > { %p5313_p13 = scmp.ne.s32.totalorder %s5552_s9, %s5312_s11  ;;  %p5314_p0 = pneg %p5554_p11 }
  0x33   : > { %s5317_s5 = scalar_lea.hbm %s7962_s0, 2048  ;;  %p5318_p7 = scmp.lt.u32.totalorder %s5552_s9, %s7962_s0 }
  0x34   : > { %p5315_p3 = pnand %p5314_p0, %p5313_p13  ;;  %p5319_p9 = scmp.lt.u32.totalorder %s5317_s5, %s5312_s11 }
  0x35   : > { %p5321_p2 = scmp.lt.u32.totalorder %s5312_s11, %s5552_s9 }
  0x36   : > { %p5316_p5 = pneg %p5315_p3  ;;  %p5320_p1 = por %p5319_p9, %p5318_p7 }
  0x38   : > { %p5322_p4 = por %p5321_p2, %p5320_p1 }
  0x3a   : > { %p5323_p6 = pnand %p5322_p4, %p5316_p5 }
  0x3c   : > { %5326 = shalt.err (!%p5323_p6)
}
  0x3d   : > { %s5327_s26 = scalar_lea.vmem %s5558_s28, 1024  ;;  %s5417_s8 = smov [#allocation2]  }
  0x3e   : > { %p5328_p8 = scmp.ne.s32.totalorder %s5558_s28, %s5327_s26  ;;  %s5332_s25 = sshll.u32 %s5417_s8, 4  ;;  %s5333_s25 = int_to_ptr.vmem [resolvable:$false] %s5332_s25 }
  0x3f   : > { %s5334_s14 = scalar_lea.vmem %s5333_s25, 2048  ;;  %p5335_p3 = scmp.lt.s32.totalorder %s5558_s28, %s5333_s25 }
  0x40   : > { %p5330_p10 = pnand %p5328_p8, %p5314_p0  ;;  %p5336_p7 = scmp.lt.s32.totalorder %s5334_s14, %s5327_s26 }
  0x42   : > { %p5331_p13 = pneg %p5330_p10  ;;  %p5337_p9 = por %p5336_p7, %p5335_p3 }
  0x44   : > { %p5338_p1 = pnand %p5337_p9, %p5331_p13 }
  0x46   : > { %5341 = shalt.err (!%p5338_p1)
}
  0x47   : > { %5215 = dma.hbm_to_vmem [thread:$0]  (!%p5554_p11), %s5552_s9, 1024, %s5558_s28, %s5560_s10, %s5415_s12, %s5415_s12, %s5416_s13  }
  0x48   : > { %p8401_p0 = scmp.ne.s32.totalorder %s8396_s23, 0 }
  0x4a   : > { %196 = sbr.rel (%p8401_p0) target bundleno = 1534 (0x5fe), region = 36 }
  0x51   : > { %s5594_s11 = sand.u32 1, %s5404_s16   ;;  %p8402_p5 = scmp.ne.s32.totalorder %s8394_s21, 0 }
  0x52   : > { %s4204_s20 = sshll.u32 %s5594_s11, 6  ;;  %s199_s5 = scalar_lea.sflag [#allocation3], %s5594_s11 }
  0x53   : > { %s5600_s29 = scalar_lea.vmem [#allocation2], %s4204_s20 }
  0x54   : > { %5387 = dma.done.wait (%p8402_p5), %s199_s5, 1024  }
  0x55   : > { %5389 = vsyncadd (%p8402_p5), %s199_s5, 4294966272  ;;  %p8403_p11 = scmp.eq.s32.totalorder %s5470_s19, 0 }
  0x57   : > { %5391 = dma.done.wait (%p8403_p11), [#allocation6], 16384   ;;  %p8404_p2 = pmov %p8403_p11 }
  0x58   : > { %v235_v0 = vld [vmem:[%s5600_s29 + $0x20] sm:$0xff]  ;;  %v236_v1 = vld [vmem:[%s5600_s29 + $0x28] sm:$0xff]  ;;  %v237_v5 = vld [vmem:[%s5600_s29 + $0x30] sm:$0xff]  ;;  %v5418_v36 = vmov 0.0|0.0   ;;  %vm5419_vm0 = vmmov 0   ;;  %v5420_v43 = vmov 0.0   ;;  %v272_v50 = vlaneseq }
  0x59   : > { %5393 = vsyncadd (%p8404_p2), [#allocation6], 4294950912  ;;  %v231_v2 = vld [vmem:[%s5600_s29] sm:$0xff]  ;;  %v245_v3 = vadd.f32 %v236_v1, %v235_v0  ;;  %v232_v4 = vld [vmem:[%s5600_s29 + $0x8] sm:$0xff]  ;;  %v262_v15 = vmax.f32 %v235_v0, %v236_v1  ;;  %4361 = vmatprep.subr.bf16.mxu0 %v5418_v36  ;;  %4355 = vmatprep.subr.bf16.mxu1 %v5418_v36  ;;  %vm283_vm1 = vcmask 130112   ;;  %vm290_vm2 = vcmask 195712  }
  0x5a   : > { %v238_v6 = vld [vmem:[%s5600_s29 + $0x38] sm:$0xff]  ;;  %v239_v7 = vadd.f32 %v232_v4, %v231_v2  ;;  %v233_v8 = vld [vmem:[%s5600_s29 + $0x10] sm:$0xff]  ;;  %v256_v13 = vmax.f32 %v231_v2, %v232_v4  ;;  %v326_v16 = vld [vmem:[%s7963_s1] sm:$0xff]  ;;  %4278 = vmatprep.mubr.msk.f32.mxu0 %vm5419_vm0, %v5420_v43  ;;  %4267 = vmatprep.mubr.msk.f32.mxu1 %vm5419_vm0, %v5420_v43  ;;  %v273_v51 = vand.u32 127, %v272_v50  ;;  %v5670_v54 = vshrl.u32 %v272_v50, 7  ;;  %s4216_s8 = sshll.u32 %s5470_s19, 10 }
  0x5b   : > { %v234_v9 = vld [vmem:[%s5600_s29 + $0x18] sm:$0xff]  ;;  %246 = vadd.xlane.f32.xlu1 %v245_v3  ;;  %v248_v10 = vadd.f32 %v238_v6, %v237_v5  ;;  %v265_v14 = vmax.f32 %v237_v5, %v238_v6  ;;  %v327_v17 = vld [vmem:[%s7963_s1 + $0x8] sm:$0xff]  ;;  %v335_v18 = vand.u32 4294901760, %v326_v16  ;;  %v328_v22 = vld [vmem:[%s7963_s1 + $0x10] sm:$0xff]  ;;  %vm297_vm3 = vcmask 261312   ;;  %s230_s25 = scalar_lea.vmem [#allocation7], %s4204_s20  ;;  %s7916_s5 = scalar_lea.hbm %s7966_s4, %s4216_s8 }
  0x5c   : > { %240 = vadd.xlane.f32.xlu0 %v239_v7  ;;  %v242_v11 = vadd.f32 %v234_v9, %v233_v8  ;;  %v259_v12 = vmax.f32 %v233_v8, %v234_v9  ;;  %v338_v19 = vand.u32 4294901760, %v327_v17  ;;  %v329_v23 = vld [vmem:[%s7963_s1 + $0x18] sm:$0xff]  ;;  %v341_v26 = vand.u32 4294901760, %v328_v22  ;;  %s4113_s14 = sshll.u32 %s230_s25, 4  ;;  %s5421_s23 = smov [#allocation7]   ;;  %s7918_s14 = int_to_ptr.vmem [resolvable:$true] %s4113_s14 }
  0x5d   : > { %v5624_v20 = vsub.f32 %v326_v16, %v335_v18  ;;  %v344_v27 = vand.u32 4294901760, %v329_v23  ;;  %v278_v53 = vadd.s32 4294967288, %v273_v51  ;;  %v285_v56 = vadd.s32 4294967280, %v273_v51  ;;  %v1362_v50 = vld [vmem:[#allocation5 + $0x18] sm:$0xff]  ;;  %s5342_s21 = scalar_lea.vmem %s7918_s14, 1024  ;;  %s5346_s12 = sshll.u32 %s5421_s23, 4  ;;  %s5347_s12 = int_to_ptr.vmem [resolvable:$false] %s5346_s12 }
  0x5e   : > { %v5626_v21 = vsub.f32 %v327_v17, %v338_v19  ;;  %v5638_v30 = vsub.f32 %v328_v22, %v341_v26  ;;  %v5654_v45 = vpack.c.bf16 %v338_v19, %v335_v18  ;;  %v276_v59 = vsub.s32 %v273_v51, %v5670_v54  ;;  %p5343_p4 = scmp.ne.s32.totalorder %s7918_s14, %s5342_s21  ;;  %s5348_s13 = scalar_lea.vmem %s5347_s12, 2048 }
  0x5f   : > { %249 = vadd.xlane.f32.xlu1 %v248_v10  ;;  %v416_v24 = vand.u32 4294901760, %v5624_v20  ;;  %v5640_v31 = vsub.f32 %v329_v23, %v344_v27  ;;  %v5662_v47 = vpack.c.bf16 %v344_v27, %v341_v26  ;;  %v281_v58 = vsub.s32 %v278_v53, %v5670_v54  ;;  %p5349_p10 = scmp.lt.s32.totalorder %s7918_s14, %s5347_s12  ;;  %p5350_p13 = scmp.lt.s32.totalorder %s5348_s13, %s5342_s21 }
  0x60   : > { %243 = vadd.xlane.f32.xlu0 %v242_v11  ;;  %v423_v25 = vand.u32 4294901760, %v5626_v21  ;;  %v430_v34 = vand.u32 4294901760, %v5638_v30  ;;  %v4368_v44 = vpack.c.bf16 %v5626_v21, %v5624_v20  ;;  %4357 = vmatpush3.bf16.msra.mxu1 %v5654_v45  ;;  %v292_v61 = vadd.s32 4294967272, %v273_v51  ;;  %v1424_v51 = vld [vmem:[#allocation5 + $0x208] sm:$0xff]  ;;  %p5344_p6 = pnand %p5343_p4, %p5543_p12 }
  0x61   : > { %v417_v28 = vsub.f32 %v5624_v20, %v416_v24  ;;  %v437_v35 = vand.u32 4294901760, %v5640_v31  ;;  %4358 = vmatprep.subr.bf16.mxu1 %v5418_v36  ;;  %v4371_v46 = vpack.c.bf16 %v5640_v31, %v5638_v30  ;;  %v288_v0 = vsub.s32 %v285_v56, %v5670_v54  ;;  %p5351_p3 = por %p5350_p13, %p5349_p10 }
  0x62   : > { %v424_v29 = vsub.f32 %v5626_v21, %v423_v25  ;;  %v431_v38 = vsub.f32 %v5638_v30, %v430_v34  ;;  %v5666_v48 = vpack.c.bf16 %v423_v25, %v416_v24  ;;  %v295_v5 = vsub.s32 %v292_v61, %v5670_v54  ;;  %p5345_p8 = pneg %p5344_p6 }
  0x63   : > { %260 = vmax.xlane.f32.xlu1 %v259_v12  ;;  %v418_v32 = vand.u32 4294901760, %v417_v28  ;;  %v438_v39 = vsub.f32 %v5640_v31, %v437_v35  ;;  %v5668_v49 = vpack.c.bf16 %v437_v35, %v430_v34  ;;  %vm324_vm4 = vcmask 1040384  }
  0x64   : > { %257 = vmax.xlane.f32.xlu0 %v256_v13  ;;  %v425_v33 = vand.u32 4294901760, %v424_v29  ;;  %v432_v40 = vand.u32 4294901760, %v431_v38  ;;  %4360 = vmatpush3.bf16.msra.mxu1 %v5662_v47  ;;  %vm330_vm5 = vcmask 261120   ;;  %v820_v29 = vld [vmem:[%s7964_s2] sm:$0x3]  ;;  %vm825_vm6 = vcmask 1041408   ;;  %p5352_p7 = pnand %p5351_p3, %p5345_p8 }
  0x65   : > { %v439_v41 = vand.u32 4294901760, %v438_v39  ;;  %4325 = vmatprep.subr.mxu1 %v5420_v43  ;;  %v827_v30 = vsel %vm825_vm6, %v820_v29, 0  ;;  %vm821_vm7 = vcmask 15360   ;;  %v1491_v53 = vand.u32 4294901760, %v1362_v50  ;;  %v1432_v29 = vld [vmem:[#allocation5 + $0x248] sm:$0xff] }
  0x66   : > { %v4362_v37 = vpack.c.bf16 %v425_v33, %v418_v32  ;;  %v830_v31 = vand.u32 4294901760, %v827_v30  ;;  %v2771_v56 = vand.u32 4294901760, %v1424_v51 }
  0x67   : > { %266 = vmax.xlane.f32.xlu1 %v265_v14  ;;  %v4365_v42 = vpack.c.bf16 %v439_v41, %v432_v40 }
  0x68   : > { %263 = vmax.xlane.f32.xlu0 %v262_v15  ;;  %4363 = vmatpush3.bf16.msra.mxu0 %v4362_v37  ;;  %v907_v38 = vsub.f32 %v827_v30, %v830_v31 }
  0x69   : > { %4364 = vmatprep.subr.bf16.mxu0 %v5418_v36 }
  0x6a   : > { %v908_v40 = vand.u32 4294901760, %v907_v38 }
  0x6c   : > { %4366 = vmatpush3.bf16.msra.mxu0 %v4365_v42 }
  0x6d   : > { %4367 = vmatprep.subr.bf16.mxu0 %v5418_v36 }
  0xe8   : > { %v247_v52 = vpop.xlane.xlu1 %246 }
  0xe9   : > { %v241_v55 = vpop.xlane.xlu0 %240  ;;  %v254_v1 = vmul.f32 0.00390625, %v247_v52 }
  0xea   : > { %v252_v60 = vmul.f32 0.00390625, %v241_v55  ;;  %v1426_v55 = vld [vmem:[#allocation5 + $0x218] sm:$0xff] }
  0xeb   : > { %v289_v11 = vrot.slane %v254_v1, %v288_v0 }
  0xec   : > { %v250_v57 = vpop.xlane.xlu1 %249  ;;  %v277_v4 = vrot.slane %v252_v60, %v276_v59 }
  0xed   : > { %v244_v62 = vpop.xlane.xlu0 %243  ;;  %v255_v6 = vmul.f32 0.00390625, %v250_v57  ;;  %v1359_v57 = vld [vmem:[#allocation5] sm:$0xff] }
  0xee   : > { %v253_v63 = vmul.f32 0.00390625, %v244_v62  ;;  %v1489_v60 = vand.u32 4294901760, %v1359_v57  ;;  %v1423_v62 = vld [vmem:[#allocation5 + $0x200] sm:$0xff] }
  0xef   : > { %v296_v13 = vrot.slane %v255_v6, %v295_v5  ;;  %v1430_v6 = vld [vmem:[#allocation5 + $0x238] sm:$0xff] }
  0xf0   : > { %v282_v2 = vrot.slane %v253_v63, %v281_v58  ;;  %v261_v3 = vpop.xlane.xlu1 %260  ;;  %v1425_v63 = vld [vmem:[#allocation5 + $0x210] sm:$0xff] }
  0xf1   : > { %v258_v7 = vpop.xlane.xlu0 %257  ;;  %v311_v9 = vrot.slane %v261_v3, %v281_v58  ;;  %v1361_v58 = vld [vmem:[#allocation5 + $0x10] sm:$0xff]  ;;  %v5725_v3 = vsub.f32 %v1424_v51, %v2771_v56 }
  0xf2   : > { %v284_v8 = vsel %vm283_vm1, %v282_v2, %v277_v4  ;;  %v307_v10 = vrot.slane %v258_v7, %v276_v59  ;;  %v2775_v59 = vand.u32 4294901760, %v1426_v55  ;;  %v1493_v61 = vand.u32 4294901760, %v1361_v58  ;;  %v1366_v4 = vld [vmem:[#allocation5 + $0x38] sm:$0xff]  ;;  %v1433_v51 = vld [vmem:[#allocation5 + $0x250] sm:$0xff] }
  0xf3   : > { %v291_v16 = vsel %vm290_vm2, %v289_v11, %v284_v8  ;;  %8408 = vst [vmem:[#allocation14_spill] sm:$0xff] %v5725_v3  ;;  %v1363_v11 = vld [vmem:[#allocation5 + $0x20] sm:$0xff] }
  0xf4   : > { %v267_v12 = vpop.xlane.xlu1 %266  ;;  %v312_v18 = vsel %vm283_vm1, %v311_v9, %v307_v10  ;;  %v298_v20 = vsel %vm297_vm3, %v296_v13, %v291_v16  ;;  %v5727_v7 = vpack.c.bf16 %v2775_v59, %v2771_v56  ;;  %v5729_v8 = vsub.f32 %v1426_v55, %v2775_v59  ;;  %v1365_v16 = vld [vmem:[#allocation5 + $0x30] sm:$0xff]  ;;  %v1436_v59 = vld [vmem:[#allocation5 + $0x268] sm:$0xff] }
  0xf5   : > { %v264_v14 = vpop.xlane.xlu0 %263  ;;  %v321_v15 = vrot.slane %v267_v12, %v295_v5  ;;  %v1428_v5 = vld [vmem:[#allocation5 + $0x228] sm:$0xff]  ;;  %v5731_v9 = vpack.c.bf16 %v1493_v61, %v1489_v60  ;;  %v5733_v10 = vsub.f32 %v1359_v57, %v1489_v60  ;;  %v5736_v12 = vsub.f32 %v1361_v58, %v1493_v61  ;;  %v1374_v58 = vld [vmem:[#allocation5 + $0x78] sm:$0xff] }
  0xf6   : > { %v316_v17 = vrot.slane %v264_v14, %v288_v0  ;;  %v1364_v0 = vld [vmem:[#allocation5 + $0x28] sm:$0xff]  ;;  %8409 = vst [vmem:[#allocation15_spill] sm:$0xff] %v5727_v7  ;;  %8410 = vst [vmem:[#allocation16_spill] sm:$0xff] %v5729_v8  ;;  %v2773_v13 = vand.u32 4294901760, %v1423_v62  ;;  %v2777_v14 = vand.u32 4294901760, %v1425_v63  ;;  %v1438_v60 = vld [vmem:[#allocation5 + $0x278] sm:$0xff] }
  0xf7   : > { %8411 = vst [vmem:[#allocation17_spill] sm:$0xff] %v5731_v9  ;;  %8412 = vst [vmem:[#allocation18_spill] sm:$0xff] %v5733_v10 }
  0xf8   : > { %v317_v19 = vsel %vm290_vm2, %v316_v17, %v312_v18  ;;  %8413 = vst [vmem:[#allocation19_spill] sm:$0xff] %v5736_v12  ;;  %v1499_v17 = vand.u32 4294901760, %v1366_v4  ;;  %v2779_v18 = vand.u32 4294901760, %v1428_v5 }
  0xf9   : > { %v322_v21 = vsel %vm297_vm3, %v321_v15, %v317_v19  ;;  %v1495_v15 = vand.u32 4294901760, %v1364_v0  ;;  %v2783_v19 = vand.u32 4294901760, %v1430_v6 }
  0xfa   : > { %v325_v22 = vsel %vm324_vm4, %v298_v20, %v322_v21  ;;  %v1497_v20 = vand.u32 4294901760, %v1363_v11  ;;  %v1427_v21 = vld [vmem:[#allocation5 + $0x220] sm:$0xff] }
  0xfb   : > { %v332_v23 = vsel %vm330_vm5, %v325_v22, 0  ;;  %v1429_v22 = vld [vmem:[#allocation5 + $0x230] sm:$0xff]  ;;  %v5748_v30 = vpack.c.bf16 %v1499_v17, %v1495_v15 }
  0xfc   : > { %v403_v24 = vand.u32 4294901760, %v332_v23 }
  0xfd   : > { %8418 = vst [vmem:[#allocation24_spill] sm:$0xff] %v5748_v30 }
  0xfe   : > { %4279 = vmatmul.mubr.f32.vlgmr.msra.gmra.mrb[0].mxu0 %v403_v24  ;;  %v404_v25 = vsub.f32 %v332_v23, %v403_v24  ;;  %v5740_v23 = vpack.c.bf16 %v2777_v14, %v2773_v13 }
  0xff   : > { %4369 = vmatpush3.bf16.msra.mxu0 %v4368_v44  ;;  %4289 = vmatprep.mubr.msk.f32.mxu0 %vm5419_vm0, %v5420_v43  ;;  %v909_v44 = vsub.f32 %v907_v38, %v908_v40 }
 0x100   : > { %4370 = vmatprep.subr.bf16.mxu0 %v5418_v36  ;;  %v405_v26 = vand.u32 4294901760, %v404_v25  ;;  %8414 = vst [vmem:[#allocation20_spill] sm:$0xff] %v5740_v23 }
 0x102   : > { %v406_v27 = vsub.f32 %v404_v25, %v405_v26 }
 0x103   : > { %4372 = vmatpush3.bf16.msra.mxu0 %v4371_v46 }
 0x104   : > { %4373 = vmatprep.subr.bf16.mxu0 %v5418_v36  ;;  %v407_v28 = vand.u32 4294901760, %v406_v27  ;;  %v1368_v27 = vld [vmem:[#allocation5 + $0x48] sm:$0xff] }
 0x106   : > { %4268 = vmatmul.mubr.f32.vlgmr.msra.gmra.mrb[0].mxu1 %v407_v28  ;;  %4290 = vmatmul.mubr.f32.vlgmr.msra.gmra.mrb[0].mxu0 %v404_v25  ;;  %v5744_v25 = vsub.f32 %v1425_v63, %v2777_v14  ;;  %v1370_v28 = vld [vmem:[#allocation5 + $0x58] sm:$0xff]  ;;  %v1515_v14 = vand.u32 4294901760, %v1374_v58 }
 0x107   : > { %4375 = vmatpush3.bf16.msra.mxu0 %v5654_v45  ;;  %4300 = vmatprep.mubr.msk.f32.mxu0 %vm5419_vm0, %v5420_v43 }
 0x108   : > { %4376 = vmatprep.subr.bf16.mxu0 %v5418_v36  ;;  %4327 = vmatprep.mubr.msk.f32.mxu1 %vm5419_vm0, %v5420_v43  ;;  %8416 = vst [vmem:[#allocation22_spill] sm:$0xff] %v5744_v25 }
 0x109   : > { %4326 = vmatpush3.msra.mxu1 %v830_v31 }
 0x10a   : > { %4330 = vmatprep.subr.mxu1 %v5420_v43 }
 0x10b   : > { %4378 = vmatpush3.bf16.msra.mxu0 %v5662_v47 }
 0x10c   : > { %4379 = vmatprep.subr.bf16.mxu0 %v5418_v36 }
 0x10e   : > { %4301 = vmatmul.mubr.f32.vlgmr.msra.gmra.mrb[0].mxu0 %v405_v26  ;;  %v5746_v26 = vsub.f32 %v1364_v0, %v1495_v15  ;;  %v2795_v15 = vand.u32 4294901760, %v1436_v59 }
 0x10f   : > { %4381 = vmatpush3.bf16.msra.mxu0 %v5666_v48  ;;  %4311 = vmatprep.mubr.msk.f32.mxu0 %vm5419_vm0, %v5420_v43 }
 0x110   : > { %4382 = vmatprep.subr.bf16.mxu0 %v5418_v36  ;;  %8417 = vst [vmem:[#allocation23_spill] sm:$0xff] %v5746_v26 }
 0x113   : > { %4384 = vmatpush3.bf16.msra.mxu0 %v5668_v49  ;;  %v1360_v49 = vld [vmem:[#allocation5 + $0x8] sm:$0xff] }
 0x114   : > { %4385 = vmatprep.subr.bf16.mxu0 %v5418_v36  ;;  %v1487_v52 = vand.u32 4294901760, %v1360_v49 }
 0x116   : > { %4312 = vmatmul.mubr.f32.vlgmr.msra.gmra.mrb[0].mxu0 %v403_v24  ;;  %v5719_v1 = vpack.c.bf16 %v1491_v53, %v1487_v52  ;;  %v5721_v2 = vsub.f32 %v1360_v49, %v1487_v52  ;;  %v1372_v52 = vld [vmem:[#allocation5 + $0x68] sm:$0xff] }
 0x117   : > { %4387 = vmatpush3.bf16.msra.mxu0 %v5654_v45  ;;  %4322 = vmatprep.mubr.msk.f32.mxu0 %vm5419_vm0, %v5420_v43 }
 0x118   : > { %4388 = vmatprep.subr.bf16.mxu0 %v5418_v36  ;;  %8405 = vst [vmem:[#allocation11_spill] sm:$0xff] %v5719_v1  ;;  %8406 = vst [vmem:[#allocation12_spill] sm:$0xff] %v5721_v2 }
 0x11b   : > { %4390 = vmatpush3.bf16.msra.mxu0 %v5662_v47  ;;  %v910_v47 = vand.u32 4294901760, %v909_v44  ;;  %v1367_v44 = vld [vmem:[#allocation5 + $0x40] sm:$0xff] }
 0x11c   : > { %4392 = vmatprep.subr.bf16.mxu0 %v5719_v1 }
 0x11e   : > { %4323 = vmatmul.mubr.f32.vlgmr.msra.gmra.mrb[0].mxu0 %v403_v24  ;;  %v5742_v24 = vsub.f32 %v1423_v62, %v2773_v13  ;;  %v1511_v13 = vand.u32 4294901760, %v1372_v52 }
 0x11f   : > { %4394 = vmatpush1.bf16.msra.mxu0 %v5731_v9 }
 0x120   : > { %8415 = vst [vmem:[#allocation21_spill] sm:$0xff] %v5742_v24  ;;  %4396 = vmatprep.subr.bf16.mxu0 %v5748_v30  ;;  %v1444_v30 = vld [vmem:[#allocation5 + $0x2a8] sm:$0xff] }
 0x1d9   : > { %v409_v32 = vpop.f32.mrb[0].mxu1 }
 0x1da   : > { %v4269_v33 = vpop.f32.mrb[1].mxu1 }
 0x1db   : > { %v5754_v33 = vsub.f32 %v1428_v5, %v2779_v18 }
 0x1dd   : > { %8421 = vst [vmem:[#allocation27_spill] sm:$0xff] %v5754_v33 }
 0x1f1   : > { %v815_v34 = vpop.f32.mrb[0].mxu0 }
 0x1f2   : > { %v5159_v35 = vadd.f32 %v815_v34, %v409_v32  ;;  %v4324_v37 = vpop.f32.mrb[1].mxu0  ;;  %v5752_v32 = vpack.c.bf16 %v2783_v19, %v2779_v18  ;;  %v1434_v34 = vld [vmem:[#allocation5 + $0x258] sm:$0xff] }
 0x1f3   : > { %v1501_v37 = vand.u32 4294901760, %v1365_v16  ;;  %v2791_v49 = vand.u32 4294901760, %v1434_v34 }
 0x1f4   : > { %v819_v36 = vmax.f32 %v5159_v35, 0.0  ;;  %8420 = vst [vmem:[#allocation26_spill] sm:$0xff] %v5752_v32  ;;  %v5757_v35 = vsub.f32 %v1430_v6, %v2783_v19 }
 0x1f5   : > { %v5784_v0 = vsub.f32 %v1434_v34, %v2791_v49 }
 0x1f6   : > { %v823_v39 = vsel %vm821_vm7, %v819_v36, 0  ;;  %8422 = vst [vmem:[#allocation28_spill] sm:$0xff] %v5757_v35  ;;  %v2781_v36 = vand.u32 4294901760, %v1427_v21 }
 0x1f7   : > { %v895_v41 = vand.u32 4294901760, %v823_v39  ;;  %8434 = vst [vmem:[#allocation40_spill] sm:$0xff] %v5784_v0  ;;  %v6168_v0 = vld [vmem:[#allocation5 + $0x3a8] sm:$0xff] }
 0x1f8   : > { %v8565_v35 = vand.u32 4294901760, %v6168_v0 }
 0x1f9   : > { %v896_v42 = vsub.f32 %v823_v39, %v895_v41  ;;  %v2785_v39 = vand.u32 4294901760, %v1429_v22 }
 0x1fb   : > { %v897_v45 = vand.u32 4294901760, %v896_v42  ;;  %v5771_v55 = vsub.f32 %v1429_v22, %v2785_v39  ;;  %v1373_v22 = vld [vmem:[#allocation5 + $0x70] sm:$0xff] }
 0x1fd   : > { %v898_v46 = vsub.f32 %v896_v42, %v897_v45  ;;  %8428 = vst [vmem:[#allocation34_spill] sm:$0xff] %v5771_v55  ;;  %v6185_v55 = vld [vmem:[#allocation5 + $0x1b0] sm:$0xff] }
 0x1ff   : > { %v899_v48 = vand.u32 4294901760, %v898_v46  ;;  %v5763_v46 = vpack.c.bf16 %v1501_v37, %v1497_v20 }
 0x201   : > { %4328 = vmatmul.mubr.f32.vlgmr.msra.gmra.mrb[2].mxu1 %v899_v48  ;;  %8424 = vst [vmem:[#allocation30_spill] sm:$0xff] %v5763_v46  ;;  %v5767_v48 = vsub.f32 %v1427_v21, %v2781_v36  ;;  %4398 = vmatpush1.bf16.msra.mxu0 %v5763_v46 }
 0x202   : > { %4331 = vmatpush3.msra.mxu1 %v910_v47  ;;  %4332 = vmatprep.mubr.msk.f32.mxu1 %vm5419_vm0, %v5420_v43  ;;  %v5765_v47 = vsub.f32 %v1365_v16, %v1501_v37  ;;  %v2799_v16 = vand.u32 4294901760, %v1438_v60  ;;  %v5801_v37 = vpack.c.bf16 %v1515_v14, %v1511_v13 }
 0x203   : > { %4335 = vmatprep.subr.mxu1 %v5420_v43  ;;  %8426 = vst [vmem:[#allocation32_spill] sm:$0xff] %v5767_v48  ;;  %v6188_v48 = vld [vmem:[#allocation5 + $0x3a0] sm:$0xff] }
 0x204   : > { %8425 = vst [vmem:[#allocation31_spill] sm:$0xff] %v5765_v47  ;;  %8441 = vst [vmem:[#allocation47_spill] sm:$0xff] %v5801_v37 }
 0x209   : > { %4333 = vmatmul.mubr.f32.vlgmr.msra.gmra.mrb[2].mxu1 %v895_v41 }
 0x20a   : > { %4336 = vmatpush3.msra.mxu1 %v907_v38  ;;  %4337 = vmatprep.mubr.msk.f32.mxu1 %vm5419_vm0, %v5420_v43  ;;  %v5759_v38 = vsub.f32 %v1363_v11, %v1497_v20  ;;  %v2793_v11 = vand.u32 4294901760, %v1433_v51 }
 0x20b   : > { %4340 = vmatprep.subr.mxu1 %v5420_v43 }
 0x20c   : > { %8423 = vst [vmem:[#allocation29_spill] sm:$0xff] %v5759_v38  ;;  %v5799_v34 = vsub.f32 %v1433_v51, %v2793_v11  ;;  %v1517_v51 = vand.u32 4294901760, %v1373_v22 }
 0x20e   : > { %8440 = vst [vmem:[#allocation46_spill] sm:$0xff] %v5799_v34 }
 0x211   : > { %4338 = vmatmul.mubr.f32.vlgmr.msra.gmra.mrb[2].mxu1 %v896_v42  ;;  %v2787_v42 = vand.u32 4294901760, %v1432_v29 }
 0x212   : > { %4341 = vmatpush3.msra.mxu1 %v830_v31  ;;  %4342 = vmatprep.mubr.msk.f32.mxu1 %vm5419_vm0, %v5420_v43 }
 0x213   : > { %4345 = vmatprep.subr.mxu1 %v5420_v43  ;;  %v5780_v62 = vpack.c.bf16 %v2791_v49, %v2787_v42  ;;  %v5782_v63 = vsub.f32 %v1432_v29, %v2787_v42  ;;  %v5807_v42 = vsub.f32 %v1374_v58, %v1515_v14  ;;  %v1375_v14 = vld [vmem:[#allocation5 + $0x80] sm:$0xff] }
 0x215   : > { %8432 = vst [vmem:[#allocation38_spill] sm:$0xff] %v5780_v62  ;;  %8433 = vst [vmem:[#allocation39_spill] sm:$0xff] %v5782_v63 }
 0x216   : > { %8443 = vst [vmem:[#allocation49_spill] sm:$0xff] %v5807_v42 }
 0x219   : > { %4343 = vmatmul.mubr.f32.vlgmr.msra.gmra.mrb[2].mxu1 %v897_v45  ;;  %v1369_v45 = vld [vmem:[#allocation5 + $0x50] sm:$0xff] }
 0x21a   : > { %4346 = vmatpush3.msra.mxu1 %v908_v40  ;;  %4347 = vmatprep.mubr.msk.f32.mxu1 %vm5419_vm0, %v5420_v43  ;;  %v1503_v40 = vand.u32 4294901760, %v1368_v27  ;;  %v1509_v5 = vand.u32 4294901760, %v1369_v45 }
 0x21b   : > { %4350 = vmatprep.subr.mxu1 %v5420_v43 }
 0x21c   : > { %v5775_v57 = vsub.f32 %v1368_v27, %v1503_v40  ;;  %v5793_v20 = vsub.f32 %v1369_v45, %v1509_v5  ;;  %v1435_v27 = vld [vmem:[#allocation5 + $0x260] sm:$0xff]  ;;  %v5811_v45 = vsub.f32 %v1436_v59, %v2795_v15 }
 0x21d   : > { %v1439_v59 = vld [vmem:[#allocation5 + $0x280] sm:$0xff] }
 0x21e   : > { %8430 = vst [vmem:[#allocation36_spill] sm:$0xff] %v5775_v57  ;;  %8437 = vst [vmem:[#allocation43_spill] sm:$0xff] %v5793_v20  ;;  %v1597_v57 = vand.u32 4294901760, %v6185_v55 }
 0x21f   : > { %8445 = vst [vmem:[#allocation51_spill] sm:$0xff] %v5811_v45  ;;  %v1457_v45 = vld [vmem:[#allocation5 + $0x310] sm:$0xff] }
 0x221   : > { %4348 = vmatmul.mubr.f32.vlgmr.msra.gmra.mrb[2].mxu1 %v895_v41 }
 0x222   : > { %4351 = vmatpush3.msra.mxu1 %v830_v31  ;;  %4352 = vmatprep.mubr.msk.f32.mxu1 %vm5419_vm0, %v5420_v43  ;;  %v5723_v43 = vsub.f32 %v1362_v50, %v1491_v53  ;;  %v5750_v31 = vsub.f32 %v1366_v4, %v1499_v17  ;;  %v1431_v50 = vld [vmem:[#allocation5 + $0x240] sm:$0xff]  ;;  %v5769_v53 = vpack.c.bf16 %v2785_v39, %v2781_v36  ;;  %v1505_v4 = vand.u32 4294901760, %v1367_v44  ;;  %v1376_v39 = vld [vmem:[#allocation5 + $0x88] sm:$0xff] }
 0x223   : > { %4776 = vmatprep.subr.bf16.mxu1 %v5727_v7  ;;  %v2789_v6 = vand.u32 4294901760, %v1431_v50  ;;  %v1371_v17 = vld [vmem:[#allocation5 + $0x60] sm:$0xff]  ;;  %v5803_v36 = vsub.f32 %v1372_v52, %v1511_v13  ;;  %v2797_v52 = vand.u32 4294901760, %v1435_v27 }
 0x224   : > { %8407 = vst [vmem:[#allocation13_spill] sm:$0xff] %v5723_v43  ;;  %8419 = vst [vmem:[#allocation25_spill] sm:$0xff] %v5750_v31  ;;  %v5789_v18 = vpack.c.bf16 %v1509_v5, %v1505_v4  ;;  %v5791_v19 = vsub.f32 %v1367_v44, %v1505_v4  ;;  %v5809_v44 = vpack.c.bf16 %v2799_v16, %v2795_v15  ;;  %v1513_v49 = vand.u32 4294901760, %v1371_v17  ;;  %v1442_v5 = vld [vmem:[#allocation5 + $0x298] sm:$0xff] }
 0x225   : > { %8427 = vst [vmem:[#allocation33_spill] sm:$0xff] %v5769_v53  ;;  %v5795_v21 = vpack.c.bf16 %v2793_v11, %v2789_v6  ;;  %v5797_v29 = vsub.f32 %v1431_v50, %v2789_v6  ;;  %8442 = vst [vmem:[#allocation48_spill] sm:$0xff] %v5803_v36  ;;  %v5814_v50 = vsub.f32 %v1438_v60, %v2799_v16  ;;  %v1519_v11 = vand.u32 4294901760, %v1376_v39 }
 0x226   : > { %8435 = vst [vmem:[#allocation41_spill] sm:$0xff] %v5789_v18  ;;  %8436 = vst [vmem:[#allocation42_spill] sm:$0xff] %v5791_v19  ;;  %v5817_v6 = vsub.f32 %v1371_v17, %v1513_v49  ;;  %v5819_v15 = vpack.c.bf16 %v1517_v51, %v1513_v49  ;;  %v5825_v16 = vsub.f32 %v1435_v27, %v2797_v52  ;;  %v1521_v27 = vand.u32 4294901760, %v1375_v14  ;;  %v6166_v19 = vld [vmem:[#allocation5 + $0x1b8] sm:$0xff] }
 0x227   : > { %8438 = vst [vmem:[#allocation44_spill] sm:$0xff] %v5795_v21  ;;  %8439 = vst [vmem:[#allocation45_spill] sm:$0xff] %v5797_v29 }
 0x228   : > { %8444 = vst [vmem:[#allocation50_spill] sm:$0xff] %v5809_v44  ;;  %8446 = vst [vmem:[#allocation52_spill] sm:$0xff] %v5814_v50  ;;  %v1455_v50 = vld [vmem:[#allocation5 + $0x300] sm:$0xff] }
 0x229   : > { %4353 = vmatmul.mubr.f32.vlgmr.msra.gmra.mrb[2].mxu1 %v895_v41  ;;  %v1507_v41 = vand.u32 4294901760, %v1370_v28  ;;  %8447 = vst [vmem:[#allocation53_spill] sm:$0xff] %v5817_v6  ;;  %8448 = vst [vmem:[#allocation54_spill] sm:$0xff] %v5819_v15 }
 0x22a   : > { %4778 = vmatpush1.bf16.msra.mxu1 %v5740_v23  ;;  %8451 = vst [vmem:[#allocation57_spill] sm:$0xff] %v5825_v16  ;;  %v1443_v23 = vld [vmem:[#allocation5 + $0x2a0] sm:$0xff] }
 0x22b   : > { %4780 = vmatprep.subr.bf16.mxu1 %v5752_v32  ;;  %v5773_v56 = vpack.c.bf16 %v1507_v41, %v1503_v40  ;;  %v5778_v61 = vsub.f32 %v1370_v28, %v1507_v41  ;;  %v1437_v28 = vld [vmem:[#allocation5 + $0x270] sm:$0xff]  ;;  %v1378_v40 = vld [vmem:[#allocation5 + $0x98] sm:$0xff]  ;;  %v1440_v41 = vld [vmem:[#allocation5 + $0x288] sm:$0xff] }
 0x22c   : > { %v2801_v4 = vand.u32 4294901760, %v1437_v28  ;;  %v1523_v58 = vand.u32 4294901760, %v1378_v40  ;;  %v2803_v13 = vand.u32 4294901760, %v1440_v41 }
 0x22d   : > { %8429 = vst [vmem:[#allocation35_spill] sm:$0xff] %v5773_v56  ;;  %8431 = vst [vmem:[#allocation37_spill] sm:$0xff] %v5778_v61  ;;  %4400 = vmatprep.subr.bf16.mxu0 %v5773_v56  ;;  %v1382_v56 = vld [vmem:[#allocation5 + $0xb8] sm:$0xff]  ;;  %v6182_v61 = vld [vmem:[#allocation5 + $0x1a0] sm:$0xff] }
 0x22e   : > { %4782 = vmatpush1.bf16.msra.mxu1 %v5769_v53  ;;  %4402 = vmatpush1.bf16.msra.mxu0 %v5789_v18  ;;  %v5821_v18 = vsub.f32 %v1373_v22, %v1517_v51  ;;  %v5823_v60 = vpack.c.bf16 %v2801_v4, %v2797_v52  ;;  %v5829_v17 = vpack.c.bf16 %v1523_v58, %v1519_v11  ;;  %v2807_v22 = vand.u32 4294901760, %v1442_v5 }
 0x22f   : > { %4784 = vmatprep.subr.bf16.mxu1 %v5780_v62  ;;  %4404 = vmatprep.subr.bf16.mxu0 %v5801_v37  ;;  %v1441_v37 = vld [vmem:[#allocation5 + $0x290] sm:$0xff]  ;;  %v1380_v62 = vld [vmem:[#allocation5 + $0xa8] sm:$0xff]  ;;  %v5831_v53 = vsub.f32 %v1376_v39, %v1519_v11  ;;  %v5833_v46 = vsub.f32 %v1378_v40, %v1523_v58  ;;  %v5837_v49 = vsub.f32 %v1440_v41, %v2803_v13  ;;  %v2805_v52 = vand.u32 4294901760, %v1439_v59  ;;  %v1446_v39 = vld [vmem:[#allocation5 + $0x2b8] sm:$0xff] }
 0x230   : > { %8449 = vst [vmem:[#allocation55_spill] sm:$0xff] %v5821_v18  ;;  %8450 = vst [vmem:[#allocation56_spill] sm:$0xff] %v5823_v60  ;;  %v1531_v32 = vand.u32 4294901760, %v1382_v56  ;;  %v5840_v11 = vpack.c.bf16 %v2807_v22, %v2803_v13  ;;  %v5842_v40 = vsub.f32 %v1442_v5, %v2807_v22  ;;  %v1379_v41 = vld [vmem:[#allocation5 + $0xa0] sm:$0xff]  ;;  %v1384_v13 = vld [vmem:[#allocation5 + $0xc8] sm:$0xff]  ;;  %v8568_v26 = vand.u32 4294901760, %v6182_v61 }
 0x231   : > { %8453 = vst [vmem:[#allocation59_spill] sm:$0xff] %v5829_v17  ;;  %8454 = vst [vmem:[#allocation60_spill] sm:$0xff] %v5831_v53  ;;  %v5852_v7 = vsub.f32 %v1439_v59, %v2805_v52  ;;  %v2815_v59 = vand.u32 4294901760, %v1446_v39 }
 0x232   : > { %4786 = vmatpush1.bf16.msra.mxu1 %v5795_v21  ;;  %v1377_v21 = vld [vmem:[#allocation5 + $0x90] sm:$0xff]  ;;  %8455 = vst [vmem:[#allocation61_spill] sm:$0xff] %v5833_v46  ;;  %4406 = vmatpush1.bf16.msra.mxu0 %v5819_v15  ;;  %8456 = vst [vmem:[#allocation62_spill] sm:$0xff] %v5837_v49  ;;  %v1386_v46 = vld [vmem:[#allocation5 + $0xd8] sm:$0xff]  ;;  %v5862_v22 = vsub.f32 %v1382_v56, %v1531_v32  ;;  %v6225_v25 = vpack.c.bf16 %v1597_v57, %v8568_v26 }
 0x233   : > { %4788 = vmatprep.subr.bf16.mxu1 %v5809_v44  ;;  %v5827_v44 = vsub.f32 %v1437_v28, %v2801_v4  ;;  %v1525_v51 = vand.u32 4294901760, %v1377_v21  ;;  %4408 = vmatprep.subr.bf16.mxu0 %v5829_v17  ;;  %v2809_v28 = vand.u32 4294901760, %v1441_v37  ;;  %v1527_v4 = vand.u32 4294901760, %v1380_v62  ;;  %8457 = vst [vmem:[#allocation63_spill] sm:$0xff] %v5840_v11  ;;  %8458 = vst [vmem:[#allocation64_spill] sm:$0xff] %v5842_v40  ;;  %v1381_v15 = vld [vmem:[#allocation5 + $0xb0] sm:$0xff] }
 0x234   : > { %8463 = vst [vmem:[#allocation69_spill] sm:$0xff] %v5852_v7  ;;  %v1445_v49 = vld [vmem:[#allocation5 + $0x2b0] sm:$0xff]  ;;  %8467 = vst [vmem:[#allocation73_spill] sm:$0xff] %v5862_v22  ;;  %v1450_v7 = vld [vmem:[#allocation5 + $0x2d8] sm:$0xff] }
 0x235   : > { %8452 = vst [vmem:[#allocation58_spill] sm:$0xff] %v5827_v44  ;;  %v5844_v58 = vpack.c.bf16 %v1525_v51, %v1521_v27  ;;  %v5848_v9 = vsub.f32 %v1377_v21, %v1525_v51  ;;  %v5850_v17 = vpack.c.bf16 %v2809_v28, %v2805_v52  ;;  %v5854_v1 = vsub.f32 %v1441_v37, %v2809_v28  ;;  %v1385_v22 = vld [vmem:[#allocation5 + $0xd0] sm:$0xff] }
 0x236   : > { %4790 = vmatpush1.bf16.msra.mxu1 %v5823_v60  ;;  %v5846_v60 = vsub.f32 %v1375_v14, %v1521_v27  ;;  %v5858_v5 = vpack.c.bf16 %v1531_v32, %v1527_v4  ;;  %v5860_v14 = vsub.f32 %v1380_v62, %v1527_v4  ;;  %v2811_v21 = vand.u32 4294901760, %v1444_v30  ;;  %8569 = vst [vmem:[#allocation138_spill] sm:$0xff] %v6225_v25 }
 0x237   : > { %8459 = vst [vmem:[#allocation65_spill] sm:$0xff] %v5844_v58  ;;  %8461 = vst [vmem:[#allocation67_spill] sm:$0xff] %v5848_v9  ;;  %4792 = vmatprep.subr.bf16.mxu1 %v5840_v11  ;;  %4410 = vmatpush1.bf16.msra.mxu0 %v5844_v58  ;;  %v1529_v27 = vand.u32 4294901760, %v1379_v41  ;;  %v1533_v37 = vand.u32 4294901760, %v1381_v15  ;;  %v2813_v51 = vand.u32 4294901760, %v1443_v23  ;;  %v2817_v28 = vand.u32 4294901760, %v1445_v49 }
 0x238   : > { %8460 = vst [vmem:[#allocation66_spill] sm:$0xff] %v5846_v60  ;;  %8462 = vst [vmem:[#allocation68_spill] sm:$0xff] %v5850_v17  ;;  %4412 = vmatprep.subr.bf16.mxu0 %v5858_v5  ;;  %v5866_v52 = vsub.f32 %v1444_v30, %v2811_v21  ;;  %v1535_v11 = vand.u32 4294901760, %v1384_v13  ;;  %v1539_v58 = vand.u32 4294901760, %v1386_v46  ;;  %v5868_v62 = vpack.c.bf16 %v2815_v59, %v2811_v21  ;;  %v1449_v60 = vld [vmem:[#allocation5 + $0x2d0] sm:$0xff] }
 0x239   : > { %8464 = vst [vmem:[#allocation70_spill] sm:$0xff] %v5854_v1  ;;  %8465 = vst [vmem:[#allocation71_spill] sm:$0xff] %v5858_v5  ;;  %v1448_v1 = vld [vmem:[#allocation5 + $0x2c8] sm:$0xff]  ;;  %v5870_v32 = vsub.f32 %v1446_v39, %v2815_v59  ;;  %v5872_v56 = vpack.c.bf16 %v1533_v37, %v1529_v27  ;;  %v5874_v4 = vsub.f32 %v1379_v41, %v1529_v27 }
 0x23a   : > { %8466 = vst [vmem:[#allocation72_spill] sm:$0xff] %v5860_v14  ;;  %4794 = vmatpush1.bf16.msra.mxu1 %v5850_v17  ;;  %8468 = vst [vmem:[#allocation74_spill] sm:$0xff] %v5866_v52  ;;  %v1383_v17 = vld [vmem:[#allocation5 + $0xc0] sm:$0xff]  ;;  %v5876_v9 = vsub.f32 %v1381_v15, %v1533_v37  ;;  %v5878_v30 = vpack.c.bf16 %v2817_v28, %v2813_v51  ;;  %v5880_v5 = vsub.f32 %v1443_v23, %v2813_v51 }
 0x23b   : > { %8469 = vst [vmem:[#allocation75_spill] sm:$0xff] %v5868_v62  ;;  %8470 = vst [vmem:[#allocation76_spill] sm:$0xff] %v5870_v32  ;;  %v1447_v14 = vld [vmem:[#allocation5 + $0x2c0] sm:$0xff]  ;;  %v5882_v52 = vsub.f32 %v1445_v49, %v2817_v28  ;;  %4796 = vmatprep.subr.bf16.mxu1 %v5868_v62  ;;  %4414 = vmatpush1.bf16.msra.mxu0 %v5872_v56  ;;  %v5886_v39 = vpack.c.bf16 %v1539_v58, %v1535_v11  ;;  %v2819_v59 = vand.u32 4294901760, %v1448_v1  ;;  %v1393_v32 = vld [vmem:[#allocation5 + $0x110] sm:$0xff] }
 0x23c   : > { %8471 = vst [vmem:[#allocation77_spill] sm:$0xff] %v5872_v56  ;;  %8472 = vst [vmem:[#allocation78_spill] sm:$0xff] %v5874_v4  ;;  %v5888_v41 = vsub.f32 %v1384_v13, %v1535_v11  ;;  %v5890_v21 = vsub.f32 %v1386_v46, %v1539_v58  ;;  %v2823_v15 = vand.u32 4294901760, %v1450_v7  ;;  %v1537_v27 = vand.u32 4294901760, %v1383_v17  ;;  %v1391_v4 = vld [vmem:[#allocation5 + $0x100] sm:$0xff] }
 0x23d   : > { %8473 = vst [vmem:[#allocation79_spill] sm:$0xff] %v5876_v9  ;;  %8474 = vst [vmem:[#allocation80_spill] sm:$0xff] %v5878_v30  ;;  %v1541_v23 = vand.u32 4294901760, %v1385_v22  ;;  %v2821_v37 = vand.u32 4294901760, %v1447_v14  ;;  %4416 = vmatprep.subr.bf16.mxu0 %v5886_v39  ;;  %v5894_v49 = vsub.f32 %v1448_v1, %v2819_v59  ;;  %v2825_v51 = vand.u32 4294901760, %v1449_v60 }
 0x23e   : > { %8475 = vst [vmem:[#allocation81_spill] sm:$0xff] %v5880_v5  ;;  %8476 = vst [vmem:[#allocation82_spill] sm:$0xff] %v5882_v52  ;;  %4798 = vmatpush1.bf16.msra.mxu1 %v5878_v30  ;;  %v5896_v28 = vpack.c.bf16 %v2823_v15, %v2819_v59  ;;  %v5898_v56 = vsub.f32 %v1450_v7, %v2823_v15  ;;  %v5902_v46 = vsub.f32 %v1383_v17, %v1537_v27  ;;  %v1458_v5 = vld [vmem:[#allocation5 + $0x318] sm:$0xff] }
 0x23f   : > { %8477 = vst [vmem:[#allocation83_spill] sm:$0xff] %v5886_v39  ;;  %8478 = vst [vmem:[#allocation84_spill] sm:$0xff] %v5888_v41  ;;  %v5900_v11 = vpack.c.bf16 %v1541_v23, %v1537_v27  ;;  %v5904_v58 = vsub.f32 %v1385_v22, %v1541_v23  ;;  %v5906_v13 = vpack.c.bf16 %v2825_v51, %v2821_v37  ;;  %v1388_v22 = vld [vmem:[#allocation5 + $0xe8] sm:$0xff]  ;;  %v1390_v27 = vld [vmem:[#allocation5 + $0xf8] sm:$0xff]  ;;  %v1553_v53 = vand.u32 4294901760, %v1391_v4 }
 0x240   : > { %8479 = vst [vmem:[#allocation85_spill] sm:$0xff] %v5890_v21  ;;  %8480 = vst [vmem:[#allocation86_spill] sm:$0xff] %v5894_v49  ;;  %v5908_v30 = vsub.f32 %v1447_v14, %v2821_v37  ;;  %v5910_v62 = vsub.f32 %v1449_v60, %v2825_v51  ;;  %4800 = vmatprep.subr.bf16.mxu1 %v5896_v28  ;;  %v1452_v23 = vld [vmem:[#allocation5 + $0x2e8] sm:$0xff]  ;;  %v1543_v14 = vand.u32 4294901760, %v1388_v22  ;;  %v1547_v37 = vand.u32 4294901760, %v1390_v27  ;;  %v1454_v60 = vld [vmem:[#allocation5 + $0x2f8] sm:$0xff] }
 0x241   : > { %8481 = vst [vmem:[#allocation87_spill] sm:$0xff] %v5896_v28  ;;  %8482 = vst [vmem:[#allocation88_spill] sm:$0xff] %v5898_v56  ;;  %4418 = vmatpush1.bf16.msra.mxu0 %v5900_v11  ;;  %v2827_v51 = vand.u32 4294901760, %v1452_v23  ;;  %v1389_v28 = vld [vmem:[#allocation5 + $0xf0] sm:$0xff]  ;;  %v1392_v56 = vld [vmem:[#allocation5 + $0x108] sm:$0xff]  ;;  %v1557_v44 = vand.u32 4294901760, %v1393_v32 }
 0x242   : > { %8483 = vst [vmem:[#allocation89_spill] sm:$0xff] %v5900_v11  ;;  %8484 = vst [vmem:[#allocation90_spill] sm:$0xff] %v5902_v46  ;;  %4802 = vmatpush1.bf16.msra.mxu1 %v5906_v13  ;;  %v2831_v11 = vand.u32 4294901760, %v1454_v60  ;;  %v5915_v46 = vpack.c.bf16 %v1547_v37, %v1543_v14  ;;  %v1394_v49 = vld [vmem:[#allocation5 + $0x118] sm:$0xff]  ;;  %v1456_v21 = vld [vmem:[#allocation5 + $0x308] sm:$0xff]  ;;  %v5925_v16 = vsub.f32 %v1388_v22, %v1543_v14 }
 0x243   : > { %8485 = vst [vmem:[#allocation91_spill] sm:$0xff] %v5904_v58  ;;  %8486 = vst [vmem:[#allocation92_spill] sm:$0xff] %v5906_v13  ;;  %v1451_v58 = vld [vmem:[#allocation5 + $0x2e0] sm:$0xff]  ;;  %v1453_v13 = vld [vmem:[#allocation5 + $0x2f0] sm:$0xff]  ;;  %v1555_v52 = vand.u32 4294901760, %v1394_v49  ;;  %v2835_v9 = vand.u32 4294901760, %v1456_v21  ;;  %v5927_v18 = vsub.f32 %v1390_v27, %v1547_v37 }
 0x244   : > { %8487 = vst [vmem:[#allocation93_spill] sm:$0xff] %v5908_v30  ;;  %8488 = vst [vmem:[#allocation94_spill] sm:$0xff] %v5910_v62  ;;  %v1387_v62 = vld [vmem:[#allocation5 + $0xe0] sm:$0xff]  ;;  %4420 = vmatprep.subr.bf16.mxu0 %v5915_v46  ;;  %v5931_v6 = vsub.f32 %v1454_v60, %v2831_v11  ;;  %v5943_v27 = vld [vmem:[#allocation5 + $0x128] sm:$0xff]  ;;  %v2841_v60 = vand.u32 4294901760, %v1457_v45 }
 0x245   : > { %8489 = vst [vmem:[#allocation95_spill] sm:$0xff] %v5915_v46  ;;  %8493 = vst [vmem:[#allocation99_spill] sm:$0xff] %v5925_v16  ;;  %v5929_v46 = vsub.f32 %v1452_v23, %v2827_v51  ;;  %v5945_v23 = vld [vmem:[#allocation5 + $0x138] sm:$0xff]  ;;  %v8571_v12 = vand.u32 4294901760, %v5943_v27 }
 0x246   : > { %8494 = vst [vmem:[#allocation100_spill] sm:$0xff] %v5927_v18  ;;  %8496 = vst [vmem:[#allocation102_spill] sm:$0xff] %v5931_v6  ;;  %v6120_v18 = vld [vmem:[#allocation5 + $0x180] sm:$0xff] }
 0x247   : > { %8495 = vst [vmem:[#allocation101_spill] sm:$0xff] %v5929_v46  ;;  %v6118_v46 = vld [vmem:[#allocation5 + $0x398] sm:$0xff] }
 0x2fc   : > { %v1271_v1 = vpop.f32.mrb[2].mxu1 }
 0x2fd   : > { %v1276_v7 = vrot.slane %v1271_v1, 1  ;;  %v4354_v59 = vpop.f32.mrb[3].mxu1 }
 0x2fe   : > { %v1545_v59 = vand.u32 4294901760, %v1387_v62 }
 0x2ff   : > { %v1278_v15 = vadd.f32 %v1276_v7, %v1271_v1  ;;  %v1549_v1 = vand.u32 4294901760, %v1389_v28  ;;  %v2829_v7 = vand.u32 4294901760, %v1451_v58 }
 0x300   : > { %v5934_v42 = vsub.f32 %v1387_v62, %v1545_v59  ;;  %v5954_v62 = vpack.c.bf16 %v1557_v44, %v1553_v53 }
 0x301   : > { %v4207_v17 = vmul.f32 -1.442695, %v1278_v15  ;;  %v5917_v15 = vpack.c.bf16 %v2831_v11, %v2827_v51  ;;  %v5920_v41 = vpack.c.bf16 %v1549_v1, %v1545_v59  ;;  %v5939_v36 = vsub.f32 %v1451_v58, %v2829_v7 }
 0x302   : > { %8497 = vst [vmem:[#allocation103_spill] sm:$0xff] %v5934_v42  ;;  %v5948_v11 = vsub.s32 0, %v5670_v54  ;;  %8504 = vst [vmem:[#allocation110_spill] sm:$0xff] %v5954_v62  ;;  %v5960_v51 = vsub.f32 %v1394_v49, %v1555_v52  ;;  %v5963_v54 = vsub.f32 %v1456_v21, %v2835_v9  ;;  %v5983_v21 = vld [vmem:[#allocation5 + $0x320] sm:$0xff]  ;;  %v5989_v58 = vsub.f32 %v1457_v45, %v2841_v60  ;;  %v6021_v45 = vld [vmem:[#allocation5 + $0x350] sm:$0xff] }
 0x303   : > { %5264 = vpow2.f32 %v4207_v17  ;;  %8490 = vst [vmem:[#allocation96_spill] sm:$0xff] %v5917_v15  ;;  %v2833_v17 = vand.u32 4294901760, %v1453_v13  ;;  %8491 = vst [vmem:[#allocation97_spill] sm:$0xff] %v5920_v41  ;;  %4804 = vmatprep.subr.bf16.mxu1 %v5917_v15  ;;  %4422 = vmatpush1.bf16.msra.mxu0 %v5920_v41  ;;  %v5936_v15 = vsub.f32 %v1389_v28, %v1549_v1  ;;  %v2837_v28 = vand.u32 4294901760, %v1455_v50  ;;  %v5966_v1 = vld [vmem:[#allocation5 + $0x328] sm:$0xff] }
 0x304   : > { %8499 = vst [vmem:[#allocation105_spill] sm:$0xff] %v5939_v36  ;;  %8501 = vst [vmem:[#allocation107_spill] sm:$0xff] %v5948_v11  ;;  %v8523_v41 = vand.u32 4294901760, %v5983_v21  ;;  %v6073_v36 = vld [vmem:[#allocation5 + $0x370] sm:$0xff]  ;;  %v8536_v6 = vand.u32 4294901760, %v6021_v45 }
 0x305   : > { %v5923_v40 = vpack.c.bf16 %v2833_v17, %v2829_v7  ;;  %8498 = vst [vmem:[#allocation104_spill] sm:$0xff] %v5936_v15  ;;  %v5941_v22 = vsub.f32 %v1453_v13, %v2833_v17  ;;  %8506 = vst [vmem:[#allocation112_spill] sm:$0xff] %v5960_v51  ;;  %v5968_v7 = vld [vmem:[#allocation5 + $0x338] sm:$0xff]  ;;  %v5970_v17 = vld [vmem:[#allocation5 + $0x120] sm:$0xff]  ;;  %v5979_v49 = vpack.c.bf16 %v2841_v60, %v2837_v28 }
 0x306   : > { %8507 = vst [vmem:[#allocation113_spill] sm:$0xff] %v5963_v54  ;;  %v5987_v59 = vsub.f32 %v1455_v50, %v2837_v28  ;;  %8513 = vst [vmem:[#allocation119_spill] sm:$0xff] %v5989_v58  ;;  %v6007_v60 = vld [vmem:[#allocation5 + $0x358] sm:$0xff]  ;;  %v6019_v50 = vld [vmem:[#allocation5 + $0x340] sm:$0xff]  ;;  %v8517_v28 = vand.u32 4294901760, %v5966_v1  ;;  %v8518_v58 = vand.u32 4294901760, %v5968_v7 }
 0x307   : > { %8492 = vst [vmem:[#allocation98_spill] sm:$0xff] %v5923_v40  ;;  %4806 = vmatpush1.bf16.msra.mxu1 %v5923_v40  ;;  %8500 = vst [vmem:[#allocation106_spill] sm:$0xff] %v5941_v22  ;;  %v6055_v54 = vld [vmem:[#allocation5 + $0x378] sm:$0xff]  ;;  %v6057_v51 = vld [vmem:[#allocation5 + $0x160] sm:$0xff]  ;;  %v8577_v26 = vand.u32 4294901760, %v5968_v7  ;;  %v8579_v3 = vand.u32 4294901760, %v5970_v17 }
 0x308   : > { %8511 = vst [vmem:[#allocation117_spill] sm:$0xff] %v5979_v49  ;;  %8512 = vst [vmem:[#allocation118_spill] sm:$0xff] %v5987_v59  ;;  %v6035_v59 = vld [vmem:[#allocation5 + $0x178] sm:$0xff]  ;;  %v8544_v20 = vand.u32 4294901760, %v6057_v51 }
 0x309   : > { %v6103_v22 = vld [vmem:[#allocation5 + $0x198] sm:$0xff]  ;;  %v6247_v8 = vsub.f32 %v5968_v7, %v8577_v26 }
 0x30b   : > { %8578 = vst [vmem:[#allocation143_spill] sm:$0xff] %v6247_v8  ;;  %v8676_v8 = vld [vmem:[#allocation29_spill] sm:$0xff] }
 0x30d   : > { %v5265_v39 = vpop.eup %5264 }
 0x30e   : > { %v1282_v30 = vadd.f32 1.0, %v5265_v39  ;;  %v1551_v39 = vand.u32 4294901760, %v1392_v56 }
 0x310   : > { %5266 = vrcp.f32 %v1282_v30  ;;  %v2839_v30 = vand.u32 4294901760, %v1458_v5  ;;  %v5950_v14 = vpack.c.bf16 %v1555_v52, %v1551_v39  ;;  %v5958_v13 = vsub.f32 %v1392_v56, %v1551_v39  ;;  %v5985_v39 = vld [vmem:[#allocation5 + $0x330] sm:$0xff] }
 0x311   : > { %v5975_v56 = vsub.f32 %v1391_v4, %v1553_v53  ;;  %v5977_v52 = vsub.f32 %v1393_v32, %v1557_v44  ;;  %v5995_v53 = vld [vmem:[#allocation5 + $0x348] sm:$0xff]  ;;  %v8514_v32 = vand.u32 4294901760, %v5943_v27  ;;  %v8515_v4 = vand.u32 4294901760, %v5945_v23 }
 0x312   : > { %8502 = vst [vmem:[#allocation108_spill] sm:$0xff] %v5950_v14  ;;  %v5952_v37 = vpack.c.bf16 %v2839_v30, %v2835_v9  ;;  %4424 = vmatprep.subr.bf16.mxu0 %v5950_v14  ;;  %8505 = vst [vmem:[#allocation111_spill] sm:$0xff] %v5958_v13  ;;  %v5972_v40 = vsub.f32 %v1458_v5, %v2839_v30  ;;  %v5981_v9 = vld [vmem:[#allocation5 + $0x130] sm:$0xff]  ;;  %v5991_v5 = vld [vmem:[#allocation5 + $0x148] sm:$0xff] }
 0x313   : > { %4426 = vmatpush1.bf16.msra.mxu0 %v5954_v62  ;;  %8509 = vst [vmem:[#allocation115_spill] sm:$0xff] %v5975_v56  ;;  %8510 = vst [vmem:[#allocation116_spill] sm:$0xff] %v5977_v52  ;;  %v5993_v30 = vld [vmem:[#allocation5 + $0x158] sm:$0xff]  ;;  %v6002_v62 = vpack.c.bf16 %v8515_v4, %v8514_v32  ;;  %v6017_v4 = vld [vmem:[#allocation5 + $0x150] sm:$0xff]  ;;  %v8524_v32 = vand.u32 4294901760, %v5985_v39  ;;  %v8526_v13 = vand.u32 4294901760, %v5991_v5 }
 0x314   : > { %8503 = vst [vmem:[#allocation109_spill] sm:$0xff] %v5952_v37  ;;  %4808 = vmatprep.subr.bf16.mxu1 %v5952_v37  ;;  %8508 = vst [vmem:[#allocation114_spill] sm:$0xff] %v5972_v40  ;;  %v6009_v37 = vld [vmem:[#allocation5 + $0x140] sm:$0xff]  ;;  %v6037_v52 = vld [vmem:[#allocation5 + $0x368] sm:$0xff] }
 0x315   : > { %4810 = vmatpush1.bf16.msra.mxu1 %v5979_v49  ;;  %8516 = vst [vmem:[#allocation120_spill] sm:$0xff] %v6002_v62  ;;  %4428 = vmatprep.subr.bf16.mxu0 %v6002_v62  ;;  %v8520_v62 = vand.u32 4294901760, %v5970_v17  ;;  %v6051_v49 = vpack.c.bf16 %v8524_v32, %v8523_v41  ;;  %v6069_v56 = vld [vmem:[#allocation5 + $0x170] sm:$0xff]  ;;  %v6071_v40 = vld [vmem:[#allocation5 + $0x360] sm:$0xff]  ;;  %v8532_v15 = vand.u32 4294901760, %v6009_v37  ;;  %v6101_v41 = vld [vmem:[#allocation5 + $0x188] sm:$0xff] }
 0x316   : > { %v8541_v16 = vand.u32 4294901760, %v6037_v52  ;;  %v6133_v32 = vld [vmem:[#allocation5 + $0x380] sm:$0xff] }
 0x317   : > { %8525 = vst [vmem:[#allocation123_spill] sm:$0xff] %v6051_v49 }
 0x31a   : > { %v5267_v44 = vpop.eup %5266 }
 0x31b   : > { %v6012_v14 = vrot.slane %v5267_v44, %v5948_v11  ;;  %v6028_v44 = vpack.c.bf16 %v8518_v58, %v8517_v28  ;;  %v6033_v11 = vld [vmem:[#allocation5 + $0x168] sm:$0xff]  ;;  %v8521_v58 = vand.u32 4294901760, %v5981_v9 }
 0x31d   : > { %8519 = vst [vmem:[#allocation121_spill] sm:$0xff] %v6028_v44  ;;  %1302 = vbcast.lane.b32.xlu1 %v6012_v14, 264  ;;  %1298 = vbcast.lane.b32.xlu0 %v6012_v14, 256  ;;  %v6045_v28 = vpack.c.bf16 %v8521_v58, %v8520_v62  ;;  %v8527_v62 = vand.u32 4294901760, %v5993_v30 }
 0x31e   : > { %4812 = vmatprep.subr.bf16.mxu1 %v6028_v44  ;;  %v8529_v44 = vand.u32 4294901760, %v5995_v53 }
 0x31f   : > { %8522 = vst [vmem:[#allocation122_spill] sm:$0xff] %v6045_v28  ;;  %v6064_v58 = vpack.c.bf16 %v8527_v62, %v8526_v13  ;;  %4430 = vmatpush1.bf16.msra.mxu0 %v6045_v28  ;;  %4814 = vmatpush1.bf16.msra.mxu1 %v6051_v49  ;;  %v8530_v13 = vand.u32 4294901760, %v6007_v60  ;;  %v8533_v28 = vand.u32 4294901760, %v6017_v4  ;;  %v8535_v49 = vand.u32 4294901760, %v6019_v50 }
 0x321   : > { %8528 = vst [vmem:[#allocation124_spill] sm:$0xff] %v6064_v58  ;;  %v6081_v62 = vpack.c.bf16 %v8530_v13, %v8529_v44  ;;  %4432 = vmatprep.subr.bf16.mxu0 %v6064_v58  ;;  %v6091_v42 = vpack.c.bf16 %v8533_v28, %v8532_v15  ;;  %v6097_v44 = vpack.c.bf16 %v8536_v6, %v8535_v49  ;;  %v6105_v58 = vld [vmem:[#allocation5 + $0x388] sm:$0xff]  ;;  %v8538_v15 = vand.u32 4294901760, %v6033_v11  ;;  %v6131_v49 = vld [vmem:[#allocation5 + $0x190] sm:$0xff] }
 0x322   : > { %1306 = vbcast.lane.b32.xlu1 %v6012_v14, 272  ;;  %v8539_v28 = vand.u32 4294901760, %v6035_v59  ;;  %v6135_v13 = vld [vmem:[#allocation5 + $0x390] sm:$0xff] }
 0x323   : > { %8531 = vst [vmem:[#allocation125_spill] sm:$0xff] %v6081_v62  ;;  %8534 = vst [vmem:[#allocation126_spill] sm:$0xff] %v6091_v42  ;;  %4816 = vmatprep.subr.bf16.mxu1 %v6081_v62  ;;  %v8542_v62 = vand.u32 4294901760, %v6055_v54  ;;  %4434 = vmatpush1.bf16.msra.mxu0 %v6091_v42  ;;  %v8551_v42 = vand.u32 4294901760, %v6103_v22 }
 0x324   : > { %8537 = vst [vmem:[#allocation127_spill] sm:$0xff] %v6097_v44  ;;  %v6113_v6 = vpack.c.bf16 %v8539_v28, %v8538_v15  ;;  %4818 = vmatpush1.bf16.msra.mxu1 %v6097_v44  ;;  %v8547_v15 = vand.u32 4294901760, %v6071_v40  ;;  %v8548_v28 = vand.u32 4294901760, %v6073_v36  ;;  %v8550_v44 = vand.u32 4294901760, %v6101_v41 }
 0x325   : > { %v6126_v34 = vpack.c.bf16 %v8542_v62, %v8541_v16  ;;  %v8545_v16 = vand.u32 4294901760, %v6069_v56 }
 0x326   : > { %8540 = vst [vmem:[#allocation128_spill] sm:$0xff] %v6113_v6  ;;  %v6149_v29 = vpack.c.bf16 %v8548_v28, %v8547_v15  ;;  %4436 = vmatprep.subr.bf16.mxu0 %v6113_v6  ;;  %v6164_v28 = vld [vmem:[#allocation5 + $0x1a8] sm:$0xff]  ;;  %1310 = vbcast.lane.b32.xlu1 %v6012_v14, 280  ;;  %v8554_v6 = vand.u32 4294901760, %v6118_v46  ;;  %v8557_v15 = vand.u32 4294901760, %v6131_v49 }
 0x327   : > { %8543 = vst [vmem:[#allocation129_spill] sm:$0xff] %v6126_v34  ;;  %v6143_v62 = vpack.c.bf16 %v8545_v16, %v8544_v20  ;;  %4820 = vmatprep.subr.bf16.mxu1 %v6126_v34  ;;  %v6159_v20 = vpack.c.bf16 %v8551_v42, %v8550_v44  ;;  %v8553_v34 = vand.u32 4294901760, %v6105_v58  ;;  %v6179_v16 = vld [vmem:[#allocation5 + $0x3b8] sm:$0xff]  ;;  %v2877_v44 = vand.u32 4294901760, %v6188_v48 }
 0x328   : > { %8549 = vst [vmem:[#allocation131_spill] sm:$0xff] %v6149_v29  ;;  %4822 = vmatpush1.bf16.msra.mxu1 %v6149_v29  ;;  %v8560_v29 = vand.u32 4294901760, %v6135_v13  ;;  %v8562_v38 = vand.u32 4294901760, %v6164_v28  ;;  %v8566_v33 = vand.u32 4294901760, %v6179_v16 }
 0x329   : > { %8546 = vst [vmem:[#allocation130_spill] sm:$0xff] %v6143_v62  ;;  %8552 = vst [vmem:[#allocation132_spill] sm:$0xff] %v6159_v20  ;;  %v6175_v42 = vpack.c.bf16 %v8554_v6, %v8553_v34  ;;  %v6190_v34 = vld [vmem:[#allocation5 + $0x3b0] sm:$0xff]  ;;  %4438 = vmatpush1.bf16.msra.mxu0 %v6143_v62  ;;  %v8556_v6 = vand.u32 4294901760, %v6120_v18  ;;  %v8559_v62 = vand.u32 4294901760, %v6133_v32 }
 0x32a   : > { %v2881_v14 = vand.u32 4294901760, %v6190_v34  ;;  %4440 = vmatprep.subr.bf16.mxu0 %v6159_v20  ;;  %v6221_v31 = vpack.c.bf16 %v8566_v33, %v8565_v35  ;;  %v1416_v20 = vld [vmem:[#allocation5 + $0x1c8] sm:$0xff]  ;;  %v8575_v35 = vand.u32 4294901760, %v5966_v1 }
 0x32b   : > { %8555 = vst [vmem:[#allocation133_spill] sm:$0xff] %v6175_v42  ;;  %v6198_v63 = vpack.c.bf16 %v8557_v15, %v8556_v6  ;;  %4824 = vmatprep.subr.bf16.mxu1 %v6175_v42  ;;  %v6209_v47 = vpack.c.bf16 %v8560_v29, %v8559_v62  ;;  %v8563_v15 = vand.u32 4294901760, %v6166_v19  ;;  %v1418_v42 = vld [vmem:[#allocation5 + $0x1d8] sm:$0xff]  ;;  %v1599_v62 = vand.u32 4294901760, %v1416_v20 }
 0x32c   : > { %8567 = vst [vmem:[#allocation137_spill] sm:$0xff] %v6221_v31  ;;  %v6227_v29 = vpack.c.bf16 %v2881_v14, %v2877_v44  ;;  %v1603_v24 = vand.u32 4294901760, %v1418_v42  ;;  %v6242_v10 = vsub.f32 %v5966_v1, %v8575_v35  ;;  %v8585_v35 = vand.u32 4294901760, %v5985_v39 }
 0x32d   : > { %8558 = vst [vmem:[#allocation134_spill] sm:$0xff] %v6198_v63  ;;  %8561 = vst [vmem:[#allocation135_spill] sm:$0xff] %v6209_v47  ;;  %v6215_v6 = vpack.c.bf16 %v8563_v15, %v8562_v38  ;;  %v6232_v38 = vsub.f32 %v5943_v27, %v8571_v12  ;;  %v8573_v15 = vand.u32 4294901760, %v5945_v23  ;;  %v6252_v12 = vsub.f32 %v5970_v17, %v8579_v3 }
 0x32e   : > { %8570 = vst [vmem:[#allocation139_spill] sm:$0xff] %v6227_v29  ;;  %8576 = vst [vmem:[#allocation142_spill] sm:$0xff] %v6242_v10  ;;  %v8581_v27 = vand.u32 4294901760, %v5981_v9  ;;  %v6267_v7 = vsub.f32 %v5985_v39, %v8585_v35  ;;  %4442 = vmatpush1.bf16.msra.mxu0 %v6198_v63  ;;  %v8587_v3 = vand.u32 4294901760, %v5991_v5  ;;  %v8593_v39 = vand.u32 4294901760, %v6007_v60  ;;  %4826 = vmatpush1.bf16.msra.mxu1 %v6209_v47 }
 0x32f   : > { %8564 = vst [vmem:[#allocation136_spill] sm:$0xff] %v6215_v6  ;;  %8572 = vst [vmem:[#allocation140_spill] sm:$0xff] %v6232_v38  ;;  %v6237_v33 = vsub.f32 %v5945_v23, %v8573_v15  ;;  %v8583_v15 = vand.u32 4294901760, %v5983_v21  ;;  %4444 = vmatprep.subr.bf16.mxu0 %v6215_v6  ;;  %4828 = vmatprep.subr.bf16.mxu1 %v6221_v31  ;;  %v1417_v31 = vld [vmem:[#allocation5 + $0x1d0] sm:$0xff]  ;;  %v1479_v6 = vld [vmem:[#allocation5 + $0x3c0] sm:$0xff]  ;;  %v6429_v47 = vpack.c.bf16 %v1603_v24, %v1599_v62 }
 0x330   : > { %8580 = vst [vmem:[#allocation144_spill] sm:$0xff] %v6252_v12  ;;  %v6257_v23 = vsub.f32 %v5981_v9, %v8581_v27  ;;  %8586 = vst [vmem:[#allocation147_spill] sm:$0xff] %v6267_v7  ;;  %v6273_v17 = vsub.f32 %v5991_v5, %v8587_v3  ;;  %v8589_v9 = vand.u32 4294901760, %v5993_v30  ;;  %v8595_v5 = vand.u32 4294901760, %v6009_v37  ;;  %v8675_v12 = vld [vmem:[#allocation28_spill] sm:$0xff] }
 0x331   : > { %8574 = vst [vmem:[#allocation141_spill] sm:$0xff] %v6237_v33  ;;  %v6262_v1 = vsub.f32 %v5983_v21, %v8583_v15  ;;  %v8591_v21 = vand.u32 4294901760, %v5995_v53  ;;  %v6288_v15 = vsub.f32 %v6007_v60, %v8593_v39  ;;  %v8601_v60 = vand.u32 4294901760, %v6021_v45  ;;  %8640 = vst [vmem:[#allocation172_spill] sm:$0xff] %v6429_v47 }
 0x332   : > { %8582 = vst [vmem:[#allocation145_spill] sm:$0xff] %v6257_v23  ;;  %8588 = vst [vmem:[#allocation148_spill] sm:$0xff] %v6273_v17  ;;  %v6278_v26 = vsub.f32 %v5993_v30, %v8589_v9  ;;  %v6294_v35 = vsub.f32 %v6009_v37, %v8595_v5  ;;  %v8597_v30 = vand.u32 4294901760, %v6017_v4  ;;  %v8603_v37 = vand.u32 4294901760, %v6033_v11  ;;  %4446 = vmatpush1.bf16.msra.mxu0 %v6225_v25  ;;  %v1415_v25 = vld [vmem:[#allocation5 + $0x1c0] sm:$0xff] }
 0x333   : > { %8584 = vst [vmem:[#allocation146_spill] sm:$0xff] %v6262_v1  ;;  %v6283_v27 = vsub.f32 %v5995_v53, %v8591_v21  ;;  %8594 = vst [vmem:[#allocation151_spill] sm:$0xff] %v6288_v15  ;;  %v8599_v53 = vand.u32 4294901760, %v6019_v50  ;;  %v6309_v21 = vsub.f32 %v6021_v45, %v8601_v60  ;;  %v8609_v45 = vand.u32 4294901760, %v6055_v54  ;;  %4830 = vmatpush1.bf16.msra.mxu1 %v6227_v29  ;;  %v1482_v29 = vld [vmem:[#allocation5 + $0x3d8] sm:$0xff] }
 0x334   : > { %8590 = vst [vmem:[#allocation149_spill] sm:$0xff] %v6278_v26  ;;  %8596 = vst [vmem:[#allocation152_spill] sm:$0xff] %v6294_v35  ;;  %v6299_v3 = vsub.f32 %v6017_v4, %v8597_v30  ;;  %v6315_v39 = vsub.f32 %v6033_v11, %v8603_v37  ;;  %v8605_v4 = vand.u32 4294901760, %v6035_v59  ;;  %v8611_v11 = vand.u32 4294901760, %v6057_v51  ;;  %4448 = vmatprep.subr.bf16.mxu0 %v6429_v47  ;;  %v1485_v35 = vld [vmem:[#allocation5 + $0x3f0] sm:$0xff] }
 0x335   : > { %8592 = vst [vmem:[#allocation150_spill] sm:$0xff] %v6283_v27  ;;  %v6304_v9 = vsub.f32 %v6019_v50, %v8599_v53  ;;  %8602 = vst [vmem:[#allocation155_spill] sm:$0xff] %v6309_v21  ;;  %v8607_v50 = vand.u32 4294901760, %v6037_v52  ;;  %v6330_v53 = vsub.f32 %v6055_v54, %v8609_v45  ;;  %v8616_v54 = vand.u32 4294901760, %v6073_v36  ;;  %v1483_v21 = vld [vmem:[#allocation5 + $0x3e0] sm:$0xff] }
 0x336   : > { %8598 = vst [vmem:[#allocation153_spill] sm:$0xff] %v6299_v3  ;;  %8604 = vst [vmem:[#allocation156_spill] sm:$0xff] %v6315_v39  ;;  %v6320_v5 = vsub.f32 %v6035_v59, %v8605_v4  ;;  %v6336_v60 = vsub.f32 %v6057_v51, %v8611_v11  ;;  %v8613_v59 = vand.u32 4294901760, %v6069_v56  ;;  %v8617_v51 = vand.u32 4294901760, %v6101_v41  ;;  %v1421_v39 = vld [vmem:[#allocation5 + $0x1f0] sm:$0xff] }
 0x337   : > { %8600 = vst [vmem:[#allocation154_spill] sm:$0xff] %v6304_v9  ;;  %v6325_v30 = vsub.f32 %v6037_v52, %v8607_v50  ;;  %8610 = vst [vmem:[#allocation159_spill] sm:$0xff] %v6330_v53  ;;  %v8615_v52 = vand.u32 4294901760, %v6071_v40  ;;  %v6351_v50 = vsub.f32 %v6073_v36, %v8616_v54  ;;  %v8620_v36 = vand.u32 4294901760, %v6118_v46  ;;  %v1484_v53 = vld [vmem:[#allocation5 + $0x3e8] sm:$0xff] }
 0x338   : > { %8606 = vst [vmem:[#allocation157_spill] sm:$0xff] %v6320_v5  ;;  %8612 = vst [vmem:[#allocation160_spill] sm:$0xff] %v6336_v60  ;;  %v6341_v37 = vsub.f32 %v6069_v56, %v8613_v59  ;;  %v6357_v45 = vsub.f32 %v6101_v41, %v8617_v51  ;;  %v8618_v56 = vand.u32 4294901760, %v6103_v22  ;;  %v8622_v41 = vand.u32 4294901760, %v6120_v18 }
 0x339   : > { %8608 = vst [vmem:[#allocation158_spill] sm:$0xff] %v6325_v30  ;;  %v6346_v4 = vsub.f32 %v6071_v40, %v8615_v52  ;;  %v8619_v40 = vand.u32 4294901760, %v6105_v58  ;;  %v6372_v52 = vsub.f32 %v6118_v46, %v8620_v36  ;;  %v8627_v46 = vand.u32 4294901760, %v6135_v13  ;;  %v1480_v36 = vld [vmem:[#allocation5 + $0x3c8] sm:$0xff]  ;;  %v1486_v30 = vld [vmem:[#allocation5 + $0x3f8] sm:$0xff] }
 0x33a   : > { %8614 = vst [vmem:[#allocation161_spill] sm:$0xff] %v6341_v37  ;;  %v6362_v11 = vsub.f32 %v6103_v22, %v8618_v56  ;;  %v6378_v54 = vsub.f32 %v6120_v18, %v8622_v41  ;;  %v8624_v22 = vand.u32 4294901760, %v6131_v49  ;;  %v8629_v18 = vand.u32 4294901760, %v6164_v28 }
 0x33b   : > { %v6367_v59 = vsub.f32 %v6105_v58, %v8619_v40  ;;  %8621 = vst [vmem:[#allocation162_spill] sm:$0xff] %v6372_v52  ;;  %v8626_v58 = vand.u32 4294901760, %v6133_v32  ;;  %v6393_v40 = vsub.f32 %v6135_v13, %v8627_v46  ;;  %v8633_v13 = vand.u32 4294901760, %v6179_v16 }
 0x33c   : > { %8623 = vst [vmem:[#allocation163_spill] sm:$0xff] %v6378_v54  ;;  %v6383_v51 = vsub.f32 %v6131_v49, %v8624_v22  ;;  %v6398_v41 = vsub.f32 %v6164_v28, %v8629_v18  ;;  %v8630_v49 = vand.u32 4294901760, %v6166_v19  ;;  %v8635_v28 = vand.u32 4294901760, %v6182_v61 }
 0x33d   : > { %v6388_v56 = vsub.f32 %v6133_v32, %v8626_v58  ;;  %8628 = vst [vmem:[#allocation165_spill] sm:$0xff] %v6393_v40  ;;  %v8631_v32 = vand.u32 4294901760, %v6168_v0  ;;  %v6413_v46 = vsub.f32 %v6179_v16, %v8633_v13  ;;  %v1420_v16 = vld [vmem:[#allocation5 + $0x1e8] sm:$0xff]  ;;  %v1422_v13 = vld [vmem:[#allocation5 + $0x1f8] sm:$0xff]  ;;  %v6431_v63 = vsub.f32 %v1416_v20, %v1599_v62  ;;  %v1419_v62 = vld [vmem:[#allocation5 + $0x1e0] sm:$0xff] }
 0x33e   : > { %8625 = vst [vmem:[#allocation164_spill] sm:$0xff] %v6383_v51  ;;  %v6403_v22 = vsub.f32 %v6166_v19, %v8630_v49  ;;  %v6418_v18 = vsub.f32 %v6182_v61, %v8635_v28  ;;  %v6421_v19 = vsub.f32 %v6185_v55, %v1597_v57  ;;  %v6424_v49 = vsub.f32 %v6188_v48, %v2877_v44 }
 0x33f   : > { %v6408_v58 = vsub.f32 %v6168_v0, %v8631_v32  ;;  %8634 = vst [vmem:[#allocation167_spill] sm:$0xff] %v6413_v46  ;;  %v6427_v0 = vsub.f32 %v6190_v34, %v2881_v14  ;;  %v1481_v32 = vld [vmem:[#allocation5 + $0x3d0] sm:$0xff]  ;;  %8641 = vst [vmem:[#allocation173_spill] sm:$0xff] %v6431_v63  ;;  %v6433_v37 = vsub.f32 %v1418_v42, %v1603_v24  ;;  %v2883_v61 = vand.u32 4294901760, %v1480_v36 }
 0x340   : > { %8636 = vst [vmem:[#allocation168_spill] sm:$0xff] %v6418_v18  ;;  %8637 = vst [vmem:[#allocation169_spill] sm:$0xff] %v6421_v19  ;;  %v2887_v28 = vand.u32 4294901760, %v1482_v29  ;;  %v1601_v60 = vand.u32 4294901760, %v1415_v25  ;;  %v1605_v55 = vand.u32 4294901760, %v1417_v31  ;;  %v2885_v57 = vand.u32 4294901760, %v1479_v6 }
 0x341   : > { %8632 = vst [vmem:[#allocation166_spill] sm:$0xff] %v6408_v58  ;;  %8638 = vst [vmem:[#allocation170_spill] sm:$0xff] %v6424_v49  ;;  %v6436_v48 = vsub.f32 %v1480_v36, %v2883_v61  ;;  %v2889_v44 = vand.u32 4294901760, %v1481_v32  ;;  %v1607_v14 = vand.u32 4294901760, %v1420_v16  ;;  %v1611_v34 = vand.u32 4294901760, %v1422_v13 }
 0x342   : > { %8639 = vst [vmem:[#allocation171_spill] sm:$0xff] %v6427_v0  ;;  %8642 = vst [vmem:[#allocation174_spill] sm:$0xff] %v6433_v37  ;;  %v6438_v5 = vpack.c.bf16 %v2887_v28, %v2883_v61  ;;  %v6440_v20 = vsub.f32 %v1482_v29, %v2887_v28  ;;  %v6442_v24 = vpack.c.bf16 %v1605_v55, %v1601_v60  ;;  %v2891_v61 = vand.u32 4294901760, %v1484_v53 }
 0x343   : > { %8643 = vst [vmem:[#allocation175_spill] sm:$0xff] %v6436_v48  ;;  %v6444_v42 = vsub.f32 %v1415_v25, %v1601_v60  ;;  %v6446_v9 = vsub.f32 %v1417_v31, %v1605_v55  ;;  %v6448_v36 = vpack.c.bf16 %v2889_v44, %v2885_v57  ;;  %v6450_v47 = vsub.f32 %v1479_v6, %v2885_v57 }
 0x344   : > { %8644 = vst [vmem:[#allocation176_spill] sm:$0xff] %v6438_v5  ;;  %8645 = vst [vmem:[#allocation177_spill] sm:$0xff] %v6440_v20  ;;  %v6452_v3 = vsub.f32 %v1481_v32, %v2889_v44  ;;  %4832 = vmatprep.subr.bf16.mxu1 %v6438_v5  ;;  %4450 = vmatpush1.bf16.msra.mxu0 %v6442_v24  ;;  %v6456_v29 = vpack.c.bf16 %v1611_v34, %v1607_v14  ;;  %v2895_v31 = vand.u32 4294901760, %v1486_v30 }
 0x345   : > { %8646 = vst [vmem:[#allocation178_spill] sm:$0xff] %v6442_v24  ;;  %8647 = vst [vmem:[#allocation179_spill] sm:$0xff] %v6444_v42  ;;  %v6458_v25 = vsub.f32 %v1420_v16, %v1607_v14  ;;  %v6460_v60 = vsub.f32 %v1422_v13, %v1611_v34  ;;  %4834 = vmatpush1.bf16.msra.mxu1 %v6448_v36  ;;  %v1609_v28 = vand.u32 4294901760, %v1419_v62  ;;  %v1613_v6 = vand.u32 4294901760, %v1421_v39 }
 0x346   : > { %8648 = vst [vmem:[#allocation180_spill] sm:$0xff] %v6446_v9  ;;  %8649 = vst [vmem:[#allocation181_spill] sm:$0xff] %v6448_v36  ;;  %v2893_v55 = vand.u32 4294901760, %v1483_v21  ;;  %4452 = vmatprep.subr.bf16.mxu0 %v6456_v29  ;;  %v6464_v32 = vsub.f32 %v1484_v53, %v2891_v61  ;;  %v2897_v57 = vand.u32 4294901760, %v1485_v35  ;;  %v8175_v44 = vand.u32 4294901760, %v5721_v2 }
 0x347   : > { %8650 = vst [vmem:[#allocation182_spill] sm:$0xff] %v6450_v47  ;;  %8651 = vst [vmem:[#allocation183_spill] sm:$0xff] %v6452_v3  ;;  %v8174_v24 = vand.u32 4294901760, %v5723_v43  ;;  %v6468_v16 = vpack.c.bf16 %v2895_v31, %v2891_v61  ;;  %v6470_v13 = vsub.f32 %v1486_v30, %v2895_v31  ;;  %v6472_v14 = vpack.c.bf16 %v1613_v6, %v1609_v28  ;;  %v8665_v31 = vld [vmem:[#allocation16_spill] sm:$0xff]  ;;  %v8686_v3 = vld [vmem:[#allocation42_spill] sm:$0xff] }
 0x348   : > { %8652 = vst [vmem:[#allocation184_spill] sm:$0xff] %v6456_v29  ;;  %8653 = vst [vmem:[#allocation185_spill] sm:$0xff] %v6458_v25  ;;  %v6474_v34 = vsub.f32 %v1419_v62, %v1609_v28  ;;  %v6476_v36 = vsub.f32 %v1421_v39, %v1613_v6  ;;  %v6478_v5 = vpack.c.bf16 %v2897_v57, %v2893_v55  ;;  %v8664_v39 = vld [vmem:[#allocation14_spill] sm:$0xff]  ;;  %v8185_v28 = vand.u32 4294901760, %v8665_v31 }
 0x349   : > { %8654 = vst [vmem:[#allocation186_spill] sm:$0xff] %v6460_v60  ;;  %8655 = vst [vmem:[#allocation187_spill] sm:$0xff] %v6464_v32  ;;  %v6480_v29 = vsub.f32 %v1483_v21, %v2893_v55  ;;  %v6482_v53 = vsub.f32 %v1485_v35, %v2897_v57  ;;  %4836 = vmatprep.subr.bf16.mxu1 %v6468_v16  ;;  %4454 = vmatpush1.bf16.msra.mxu0 %v6472_v14  ;;  %v8184_v61 = vand.u32 4294901760, %v8664_v39  ;;  %v8682_v32 = vld [vmem:[#allocation37_spill] sm:$0xff]  ;;  %v8684_v60 = vld [vmem:[#allocation40_spill] sm:$0xff] }
 0x34a   : > { %8656 = vst [vmem:[#allocation188_spill] sm:$0xff] %v6468_v16  ;;  %8657 = vst [vmem:[#allocation189_spill] sm:$0xff] %v6470_v13  ;;  %v1635_v30 = vsub.f32 %v5721_v2, %v8175_v44  ;;  %v1647_v62 = vsub.f32 %v5723_v43, %v8174_v24  ;;  %4838 = vmatpush1.bf16.msra.mxu1 %v6478_v5  ;;  %v2931_v55 = vsub.f32 %v8665_v31, %v8185_v28  ;;  %v8668_v43 = vld [vmem:[#allocation21_spill] sm:$0xff]  ;;  %v5278_v31 = vld [vmem:[%s5600_s29] sm:$0xff] }
 0x34b   : > { %8658 = vst [vmem:[#allocation190_spill] sm:$0xff] %v6472_v14  ;;  %8659 = vst [vmem:[#allocation191_spill] sm:$0xff] %v6474_v34  ;;  %v2919_v6 = vsub.f32 %v8664_v39, %v8184_v61  ;;  %v8192_v61 = vand.u32 4294901760, %v8668_v43  ;;  %v6524_v39 = vmul.f32 %v5278_v31, %v5278_v31  ;;  %v5280_v2 = vld [vmem:[%s5600_s29 + $0x20] sm:$0xff]  ;;  %v8680_v34 = vld [vmem:[#allocation34_spill] sm:$0xff]  ;;  %v8689_v13 = vand.u32 4294901760, %v8675_v12 }
 0x34c   : > { %8660 = vst [vmem:[#allocation192_spill] sm:$0xff] %v6476_v36  ;;  %8661 = vst [vmem:[#allocation193_spill] sm:$0xff] %v6478_v5  ;;  %v1636_v35 = vand.u32 4294901760, %v1635_v30  ;;  %v1648_v21 = vand.u32 4294901760, %v1647_v62  ;;  %v2932_v44 = vand.u32 4294901760, %v2931_v55  ;;  %v8666_v30 = vld [vmem:[#allocation18_spill] sm:$0xff]  ;;  %v6531_v15 = vmul.f32 %v5280_v2, %v5280_v2 }
 0x34d   : > { %8662 = vst [vmem:[#allocation194_spill] sm:$0xff] %v6480_v29  ;;  %8663 = vst [vmem:[#allocation195_spill] sm:$0xff] %v6482_v53  ;;  %v2920_v24 = vand.u32 4294901760, %v2919_v6  ;;  %v8186_v62 = vand.u32 4294901760, %v8666_v30  ;;  %v8667_v5 = vld [vmem:[#allocation19_spill] sm:$0xff]  ;;  %v8679_v29 = vld [vmem:[#allocation32_spill] sm:$0xff] }
 0x34e   : > { %v4455_v57 = vpack.c.bf16 %v1648_v21, %v1636_v35  ;;  %v8190_v16 = vand.u32 4294901760, %v8667_v5  ;;  %v5276_v21 = vld [vmem:[%s5600_s29 + $0x10] sm:$0xff]  ;;  %v8670_v55 = vld [vmem:[#allocation23_spill] sm:$0xff]  ;;  %v8690_v23 = vand.u32 4294901760, %v8676_v8  ;;  %v8693_v47 = vand.u32 4294901760, %v8680_v34 }
 0x34f   : > { %v4839_v14 = vpack.c.bf16 %v2932_v44, %v2920_v24  ;;  %v1641_v28 = vsub.f32 %v8666_v30, %v8186_v62  ;;  %v6513_v24 = vsub.f32 %v8668_v43, %v8192_v61  ;;  %v8669_v44 = vld [vmem:[#allocation22_spill] sm:$0xff]  ;;  %v6517_v6 = vmul.f32 %v5276_v21, %v5276_v21  ;;  %v8671_v61 = vld [vmem:[#allocation25_spill] sm:$0xff] }
 0x350   : > { %4456 = vmatprep.subr.bf16.mxu0 %v4455_v57  ;;  %v1653_v35 = vsub.f32 %v8667_v5, %v8190_v16  ;;  %v5277_v62 = vld [vmem:[%s5600_s29 + $0x18] sm:$0xff]  ;;  %v5279_v16 = vld [vmem:[%s5600_s29 + $0x8] sm:$0xff]  ;;  %v5282_v21 = vld [vmem:[%s5600_s29 + $0x30] sm:$0xff]  ;;  %v8673_v2 = vand.u32 4294901760, %v8670_v55 }
 0x351   : > { %4840 = vmatprep.subr.bf16.mxu1 %v4839_v14  ;;  %v6521_v30 = vmul.f32 %v5277_v62, %v5277_v62  ;;  %v6527_v5 = vmul.f32 %v5279_v16, %v5279_v16  ;;  %v5281_v14 = vld [vmem:[%s5600_s29 + $0x28] sm:$0xff]  ;;  %v6537_v26 = vmul.f32 %v5282_v21, %v5282_v21  ;;  %v5283_v57 = vld [vmem:[%s5600_s29 + $0x38] sm:$0xff]  ;;  %v1642_v17 = vand.u32 4294901760, %v1641_v28  ;;  %s4100_s29 = scalar_lea.sflag [#allocation4], %s5594_s11 }
 0x352   : > { %v6534_v27 = vmul.f32 %v5281_v14, %v5281_v14  ;;  %v6540_v62 = vmul.f32 %v5283_v57, %v5283_v57  ;;  %v1654_v31 = vand.u32 4294901760, %v1653_v35  ;;  %v2926_v7 = vand.u32 4294901760, %v6513_v24  ;;  %v8674_v14 = vld [vmem:[#allocation27_spill] sm:$0xff] }
 0x353   : > { %v8672_v16 = vand.u32 4294901760, %v8669_v44  ;;  %v1659_v1 = vsub.f32 %v8670_v55, %v8673_v2  ;;  %v8677_v57 = vand.u32 4294901760, %v8671_v61  ;;  %v8678_v35 = vld [vmem:[#allocation31_spill] sm:$0xff]  ;;  %v8688_v36 = vand.u32 4294901760, %v8674_v14 }
 0x354   : > { %v8683_v55 = vld [vmem:[#allocation39_spill] sm:$0xff]  ;;  %v6562_v25 = vpack.c.bf16 %v1654_v31, %v1642_v17  ;;  %v2955_v2 = vsub.f32 %v8675_v12, %v8689_v13  ;;  %v1665_v21 = vsub.f32 %v8676_v8, %v8690_v23  ;;  %v8695_v12 = vand.u32 4294901760, %v8682_v32 }
 0x355   : > { %v2937_v43 = vsub.f32 %v8669_v44, %v8672_v16  ;;  %v1671_v28 = vsub.f32 %v8671_v61, %v8677_v57  ;;  %v8681_v44 = vld [vmem:[#allocation36_spill] sm:$0xff]  ;;  %v8687_v57 = vld [vmem:[#allocation43_spill] sm:$0xff]  ;;  %v1660_v24 = vand.u32 4294901760, %v1659_v1  ;;  %v2943_v16 = vsub.f32 %v8674_v14, %v8688_v36 }
 0x356   : > { %8685 = vst [vmem:[#allocation196_spill] sm:$0xff] %v6562_v25  ;;  %v8692_v61 = vand.u32 4294901760, %v8679_v29  ;;  %v2961_v36 = vsub.f32 %v8680_v34, %v8693_v47  ;;  %v8694_v14 = vand.u32 4294901760, %v8681_v44  ;;  %v1695_v23 = vsub.f32 %v8682_v32, %v8695_v12  ;;  %v8701_v25 = vld [vmem:[#allocation46_spill] sm:$0xff] }
 0x357   : > { %v2938_v53 = vand.u32 4294901760, %v2937_v43  ;;  %v1672_v17 = vand.u32 4294901760, %v1671_v28  ;;  %v8691_v43 = vand.u32 4294901760, %v8678_v35  ;;  %v8696_v28 = vand.u32 4294901760, %v8683_v55 }
 0x358   : > { %v2949_v1 = vsub.f32 %v8679_v29, %v8692_v61  ;;  %v1683_v13 = vsub.f32 %v8681_v44, %v8694_v14  ;;  %v8698_v29 = vand.u32 4294901760, %v8686_v3  ;;  %v8699_v34 = vand.u32 4294901760, %v8687_v57  ;;  %v8700_v44 = vld [vmem:[#allocation45_spill] sm:$0xff] }
 0x359   : > { %v1677_v31 = vsub.f32 %v8678_v35, %v8691_v43  ;;  %v2967_v43 = vsub.f32 %v8683_v55, %v8696_v28  ;;  %v8697_v35 = vand.u32 4294901760, %v8684_v60  ;;  %v8237_v8 = vand.u32 4294901760, %v8700_v44  ;;  %v8702_v28 = vld [vmem:[#allocation48_spill] sm:$0xff] }
 0x35a   : > { %v1689_v47 = vsub.f32 %v8686_v3, %v8698_v29  ;;  %v1701_v14 = vsub.f32 %v8687_v57, %v8699_v34  ;;  %v2944_v32 = vand.u32 4294901760, %v2943_v16  ;;  %v2956_v9 = vand.u32 4294901760, %v2955_v2 }
 0x35b   : > { %v2979_v61 = vsub.f32 %v8684_v60, %v8697_v35  ;;  %v1666_v42 = vand.u32 4294901760, %v1665_v21  ;;  %v8238_v55 = vand.u32 4294901760, %v8702_v28  ;;  %v1678_v20 = vand.u32 4294901760, %v1677_v31  ;;  %v8703_v60 = vld [vmem:[#allocation49_spill] sm:$0xff] }
 0x35c   : > { %v2950_v48 = vand.u32 4294901760, %v2949_v1  ;;  %v2962_v35 = vand.u32 4294901760, %v2961_v36  ;;  %v8240_v37 = vand.u32 4294901760, %v8703_v60  ;;  %v1684_v63 = vand.u32 4294901760, %v1683_v13  ;;  %v8707_v36 = vld [vmem:[#allocation51_spill] sm:$0xff] }
 0x35d   : > { %v1696_v29 = vand.u32 4294901760, %v1695_v23  ;;  %v2968_v3 = vand.u32 4294901760, %v2967_v43  ;;  %v2980_v0 = vand.u32 4294901760, %v2979_v61  ;;  %v1690_v49 = vand.u32 4294901760, %v1689_v47  ;;  %v8708_v43 = vld [vmem:[#allocation52_spill] sm:$0xff]  ;;  %v8709_v47 = vld [vmem:[#allocation53_spill] sm:$0xff] }
 0x35e   : > { %v1702_v34 = vand.u32 4294901760, %v1701_v14  ;;  %v2973_v12 = vsub.f32 %v8700_v44, %v8237_v8  ;;  %v8704_v16 = vand.u32 4294901760, %v8701_v25  ;;  %v6612_v2 = vpack.c.bf16 %v2938_v53, %v2926_v7  ;;  %v8710_v8 = vld [vmem:[#allocation55_spill] sm:$0xff]  ;;  %v8730_v44 = vld [vmem:[#allocation69_spill] sm:$0xff] }
 0x35f   : > { %v6614_v31 = vpack.c.bf16 %v1672_v17, %v1660_v24  ;;  %v1707_v1 = vsub.f32 %v8702_v28, %v8238_v55  ;;  %v1719_v23 = vsub.f32 %v8703_v60, %v8240_v37  ;;  %v6626_v7 = vpack.c.bf16 %v2956_v9, %v2944_v32  ;;  %v8719_v32 = vld [vmem:[#allocation58_spill] sm:$0xff] }
 0x360   : > { %v2985_v21 = vsub.f32 %v8701_v25, %v8704_v16  ;;  %8705 = vst [vmem:[#allocation197_spill] sm:$0xff] %v6612_v2  ;;  %v6628_v53 = vpack.c.bf16 %v1678_v20, %v1666_v42  ;;  %v6630_v24 = vpack.c.bf16 %v2962_v35, %v2950_v48  ;;  %v6632_v17 = vpack.c.bf16 %v1696_v29, %v1684_v63  ;;  %v8718_v16 = vld [vmem:[#allocation57_spill] sm:$0xff]  ;;  %v8723_v35 = vld [vmem:[#allocation60_spill] sm:$0xff] }
 0x361   : > { %8706 = vst [vmem:[#allocation198_spill] sm:$0xff] %v6614_v31  ;;  %8711 = vst [vmem:[#allocation199_spill] sm:$0xff] %v6626_v7  ;;  %v6634_v55 = vpack.c.bf16 %v2980_v0, %v2968_v3  ;;  %v6636_v13 = vpack.c.bf16 %v1702_v34, %v1690_v49  ;;  %v2974_v28 = vand.u32 4294901760, %v2973_v12  ;;  %v1708_v60 = vand.u32 4294901760, %v1707_v1  ;;  %v8724_v34 = vld [vmem:[#allocation61_spill] sm:$0xff]  ;;  %v8725_v1 = vld [vmem:[#allocation62_spill] sm:$0xff] }
 0x362   : > { %8712 = vst [vmem:[#allocation200_spill] sm:$0xff] %v6628_v53  ;;  %8713 = vst [vmem:[#allocation201_spill] sm:$0xff] %v6630_v24  ;;  %v2986_v37 = vand.u32 4294901760, %v2985_v21  ;;  %v8717_v61 = vand.u32 4294901760, %v8707_v36  ;;  %v1720_v42 = vand.u32 4294901760, %v1719_v23  ;;  %v8720_v48 = vand.u32 4294901760, %v8708_v43 }
 0x363   : > { %8714 = vst [vmem:[#allocation202_spill] sm:$0xff] %v6632_v17  ;;  %8715 = vst [vmem:[#allocation203_spill] sm:$0xff] %v6634_v55  ;;  %v8721_v3 = vand.u32 4294901760, %v8709_v47  ;;  %v8722_v0 = vand.u32 4294901760, %v8710_v8  ;;  %v8726_v20 = vld [vmem:[#allocation64_spill] sm:$0xff]  ;;  %v8731_v57 = vand.u32 4294901760, %v8718_v16 }
 0x364   : > { %8716 = vst [vmem:[#allocation204_spill] sm:$0xff] %v6636_v13  ;;  %v2991_v14 = vsub.f32 %v8707_v36, %v8717_v61  ;;  %v3003_v63 = vsub.f32 %v8708_v43, %v8720_v48  ;;  %v6656_v9 = vpack.c.bf16 %v2986_v37, %v2974_v28  ;;  %v8728_v36 = vld [vmem:[#allocation66_spill] sm:$0xff]  ;;  %v8729_v43 = vld [vmem:[#allocation67_spill] sm:$0xff]  ;;  %v8732_v29 = vand.u32 4294901760, %v8719_v32 }
 0x365   : > { %v1713_v49 = vsub.f32 %v8709_v47, %v8721_v3  ;;  %v1725_v12 = vsub.f32 %v8710_v8, %v8722_v0  ;;  %v2997_v0 = vsub.f32 %v8718_v16, %v8731_v57  ;;  %v8733_v61 = vld [vmem:[#allocation70_spill] sm:$0xff]  ;;  %v6668_v23 = vpack.c.bf16 %v1720_v42, %v1708_v60  ;;  %v8742_v8 = vld [vmem:[#allocation72_spill] sm:$0xff] }
 0x366   : > { %8727 = vst [vmem:[#allocation205_spill] sm:$0xff] %v6656_v9  ;;  %v2992_v47 = vand.u32 4294901760, %v2991_v14  ;;  %v3009_v21 = vsub.f32 %v8719_v32, %v8732_v29  ;;  %v3004_v37 = vand.u32 4294901760, %v3003_v63  ;;  %v8735_v25 = vand.u32 4294901760, %v8723_v35  ;;  %v8747_v55 = vld [vmem:[#allocation78_spill] sm:$0xff] }
 0x367   : > { %8734 = vst [vmem:[#allocation206_spill] sm:$0xff] %v6668_v23  ;;  %v1714_v28 = vand.u32 4294901760, %v1713_v49  ;;  %v1726_v48 = vand.u32 4294901760, %v1725_v12  ;;  %v8736_v14 = vand.u32 4294901760, %v8724_v34  ;;  %v8737_v57 = vand.u32 4294901760, %v8725_v1  ;;  %v8745_v23 = vld [vmem:[#allocation74_spill] sm:$0xff] }
 0x368   : > { %v1731_v3 = vsub.f32 %v8723_v35, %v8735_v25  ;;  %v8738_v29 = vand.u32 4294901760, %v8726_v20  ;;  %v8739_v42 = vand.u32 4294901760, %v8728_v36  ;;  %v8740_v49 = vand.u32 4294901760, %v8729_v43 }
 0x369   : > { %v1743_v9 = vsub.f32 %v8724_v34, %v8736_v14  ;;  %v3015_v16 = vsub.f32 %v8725_v1, %v8737_v57  ;;  %v8741_v12 = vand.u32 4294901760, %v8730_v44  ;;  %v2998_v35 = vand.u32 4294901760, %v2997_v0 }
 0x36a   : > { %v3027_v60 = vsub.f32 %v8726_v20, %v8738_v29  ;;  %v1737_v63 = vsub.f32 %v8728_v36, %v8739_v42  ;;  %v1749_v25 = vsub.f32 %v8729_v43, %v8740_v49  ;;  %v3010_v57 = vand.u32 4294901760, %v3009_v21  ;;  %v8744_v20 = vld [vmem:[#allocation73_spill] sm:$0xff]  ;;  %v8746_v36 = vld [vmem:[#allocation76_spill] sm:$0xff]  ;;  %v8748_v43 = vld [vmem:[#allocation79_spill] sm:$0xff] }
 0x36b   : > { %v3021_v14 = vsub.f32 %v8730_v44, %v8741_v12  ;;  %v8743_v1 = vand.u32 4294901760, %v8733_v61  ;;  %v1732_v24 = vand.u32 4294901760, %v1731_v3  ;;  %v1744_v12 = vand.u32 4294901760, %v1743_v9  ;;  %v8751_v49 = vld [vmem:[#allocation81_spill] sm:$0xff]  ;;  %v8752_v3 = vld [vmem:[#allocation82_spill] sm:$0xff] }
 0x36c   : > { %v3016_v44 = vand.u32 4294901760, %v3015_v16  ;;  %v3028_v34 = vand.u32 4294901760, %v3027_v60  ;;  %v1738_v0 = vand.u32 4294901760, %v1737_v63  ;;  %v1750_v21 = vand.u32 4294901760, %v1749_v25 }
 0x36d   : > { %v3033_v29 = vsub.f32 %v8733_v61, %v8743_v1  ;;  %v3022_v53 = vand.u32 4294901760, %v3021_v14  ;;  %v8749_v7 = vand.u32 4294901760, %v8742_v8  ;;  %v8750_v42 = vand.u32 4294901760, %v8744_v20  ;;  %v8774_v61 = vld [vmem:[#allocation99_spill] sm:$0xff] }
 0x36e   : > { %v8753_v16 = vand.u32 4294901760, %v8745_v23  ;;  %v8754_v63 = vand.u32 4294901760, %v8746_v36  ;;  %v8755_v25 = vand.u32 4294901760, %v8747_v55  ;;  %v6732_v9 = vpack.c.bf16 %v3004_v37, %v2992_v47 }
 0x36f   : > { %v6703_v1 = vsub.f32 %v8742_v8, %v8749_v7  ;;  %v3034_v32 = vand.u32 4294901760, %v3033_v29  ;;  %v6708_v13 = vsub.f32 %v8744_v20, %v8750_v42  ;;  %v8756_v29 = vand.u32 4294901760, %v8748_v43 }
 0x370   : > { %v6715_v60 = vsub.f32 %v8745_v23, %v8753_v16  ;;  %v6720_v7 = vsub.f32 %v8746_v36, %v8754_v63  ;;  %v6725_v14 = vsub.f32 %v8747_v55, %v8755_v25  ;;  %8757 = vst [vmem:[#allocation207_spill] sm:$0xff] %v6732_v9  ;;  %v6734_v17 = vpack.c.bf16 %v1726_v48, %v1714_v28  ;;  %v8763_v55 = vld [vmem:[#allocation84_spill] sm:$0xff]  ;;  %v8790_v9 = vld [vmem:[#allocation106_spill] sm:$0xff] }
 0x371   : > { %v6730_v42 = vsub.f32 %v8748_v43, %v8756_v29  ;;  %v6736_v16 = vpack.c.bf16 %v3010_v57, %v2998_v35  ;;  %v6738_v23 = vpack.c.bf16 %v1744_v12, %v1732_v24  ;;  %v6740_v63 = vpack.c.bf16 %v3028_v34, %v3016_v44  ;;  %v8768_v57 = vld [vmem:[#allocation86_spill] sm:$0xff]  ;;  %v8769_v12 = vld [vmem:[#allocation88_spill] sm:$0xff] }
 0x372   : > { %8758 = vst [vmem:[#allocation208_spill] sm:$0xff] %v6734_v17  ;;  %v6742_v36 = vpack.c.bf16 %v1750_v21, %v1738_v0  ;;  %v1756_v25 = vand.u32 4294901760, %v6703_v1  ;;  %v8267_v20 = vand.u32 4294901760, %v8763_v55  ;;  %v6746_v8 = vpack.c.bf16 %v3034_v32, %v3022_v53  ;;  %v8767_v53 = vld [vmem:[#allocation85_spill] sm:$0xff]  ;;  %v8770_v21 = vld [vmem:[#allocation90_spill] sm:$0xff]  ;;  %v8779_v17 = vld [vmem:[#allocation104_spill] sm:$0xff] }
 0x373   : > { %8759 = vst [vmem:[#allocation209_spill] sm:$0xff] %v6736_v16  ;;  %8760 = vst [vmem:[#allocation210_spill] sm:$0xff] %v6738_v23  ;;  %v1768_v29 = vand.u32 4294901760, %v6708_v13  ;;  %v8765_v47 = vand.u32 4294901760, %v8751_v49  ;;  %v8766_v35 = vand.u32 4294901760, %v8752_v3  ;;  %v3040_v44 = vand.u32 4294901760, %v6715_v60 }
 0x374   : > { %8761 = vst [vmem:[#allocation211_spill] sm:$0xff] %v6740_v63  ;;  %8762 = vst [vmem:[#allocation212_spill] sm:$0xff] %v6742_v36  ;;  %v3052_v34 = vand.u32 4294901760, %v6720_v7  ;;  %v1762_v37 = vand.u32 4294901760, %v6725_v14  ;;  %v1774_v28 = vand.u32 4294901760, %v6730_v42  ;;  %v8776_v36 = vld [vmem:[#allocation101_spill] sm:$0xff] }
 0x375   : > { %8764 = vst [vmem:[#allocation213_spill] sm:$0xff] %v6746_v8  ;;  %v3045_v48 = vsub.f32 %v8751_v49, %v8765_v47  ;;  %v3057_v24 = vsub.f32 %v8752_v3, %v8766_v35  ;;  %v1779_v47 = vsub.f32 %v8763_v55, %v8267_v20  ;;  %v8771_v35 = vld [vmem:[#allocation91_spill] sm:$0xff]  ;;  %v8772_v3 = vld [vmem:[#allocation93_spill] sm:$0xff]  ;;  %v8773_v49 = vld [vmem:[#allocation94_spill] sm:$0xff]  ;;  %v8780_v60 = vand.u32 4294901760, %v8767_v53 }
 0x376   : > { %v8775_v8 = vld [vmem:[#allocation100_spill] sm:$0xff]  ;;  %v8777_v63 = vld [vmem:[#allocation102_spill] sm:$0xff]  ;;  %v8778_v23 = vld [vmem:[#allocation103_spill] sm:$0xff]  ;;  %v8781_v14 = vand.u32 4294901760, %v8768_v57  ;;  %v8783_v0 = vand.u32 4294901760, %v8770_v21  ;;  %v8784_v16 = vand.u32 4294901760, %v8771_v35 }
 0x377   : > { %v3046_v43 = vand.u32 4294901760, %v3045_v48  ;;  %v3058_v42 = vand.u32 4294901760, %v3057_v24  ;;  %v1791_v7 = vsub.f32 %v8767_v53, %v8780_v60  ;;  %v8782_v24 = vand.u32 4294901760, %v8769_v12 }
 0x378   : > { %v3063_v48 = vsub.f32 %v8768_v57, %v8781_v14  ;;  %v1785_v1 = vsub.f32 %v8770_v21, %v8783_v0  ;;  %v1780_v32 = vand.u32 4294901760, %v1779_v47  ;;  %v1797_v20 = vsub.f32 %v8771_v35, %v8784_v16  ;;  %v8789_v47 = vld [vmem:[#allocation105_spill] sm:$0xff] }
 0x379   : > { %v3075_v13 = vsub.f32 %v8769_v12, %v8782_v24  ;;  %v8785_v55 = vand.u32 4294901760, %v8772_v3  ;;  %v8786_v53 = vand.u32 4294901760, %v8773_v49  ;;  %v8787_v57 = vand.u32 4294901760, %v8774_v61 }
 0x37a   : > { %v8788_v12 = vand.u32 4294901760, %v8775_v8  ;;  %v8791_v35 = vand.u32 4294901760, %v8776_v36  ;;  %v3064_v21 = vand.u32 4294901760, %v3063_v48  ;;  %v1786_v16 = vand.u32 4294901760, %v1785_v1 }
 0x37b   : > { %v3069_v60 = vsub.f32 %v8772_v3, %v8785_v55  ;;  %v3081_v14 = vsub.f32 %v8773_v49, %v8786_v53  ;;  %v1803_v24 = vsub.f32 %v8774_v61, %v8787_v57  ;;  %v8792_v3 = vand.u32 4294901760, %v8777_v63 }
 0x37c   : > { %v1815_v0 = vsub.f32 %v8775_v8, %v8788_v12  ;;  %v3087_v55 = vsub.f32 %v8776_v36, %v8791_v35  ;;  %v8793_v49 = vand.u32 4294901760, %v8778_v23  ;;  %v8794_v61 = vand.u32 4294901760, %v8779_v17  ;;  %v8795_v35 = vld [vmem:[#allocation111_spill] sm:$0xff] }
 0x37d   : > { %v3099_v53 = vsub.f32 %v8777_v63, %v8792_v3  ;;  %v1792_v8 = vand.u32 4294901760, %v1791_v7  ;;  %v3076_v31 = vand.u32 4294901760, %v3075_v13  ;;  %v1798_v2 = vand.u32 4294901760, %v1797_v20 }
 0x37e   : > { %v1809_v57 = vsub.f32 %v8778_v23, %v8793_v49  ;;  %v1821_v12 = vsub.f32 %v8779_v17, %v8794_v61  ;;  %v3070_v19 = vand.u32 4294901760, %v3069_v60  ;;  %v3082_v18 = vand.u32 4294901760, %v3081_v14  ;;  %v8798_v14 = vld [vmem:[#allocation112_spill] sm:$0xff] }
 0x37f   : > { %v1804_v46 = vand.u32 4294901760, %v1803_v24  ;;  %v1816_v58 = vand.u32 4294901760, %v1815_v0  ;;  %v8796_v3 = vand.u32 4294901760, %v8789_v47  ;;  %v8797_v49 = vand.u32 4294901760, %v8790_v9 }
 0x380   : > { %v3088_v61 = vand.u32 4294901760, %v3087_v55  ;;  %v3100_v7 = vand.u32 4294901760, %v3099_v53  ;;  %v1810_v48 = vand.u32 4294901760, %v1809_v57  ;;  %v1822_v13 = vand.u32 4294901760, %v1821_v12  ;;  %v8800_v55 = vld [vmem:[#allocation113_spill] sm:$0xff] }
 0x381   : > { %v3093_v63 = vsub.f32 %v8789_v47, %v8796_v3  ;;  %v3105_v23 = vsub.f32 %v8790_v9, %v8797_v49  ;;  %v6823_v1 = vpack.c.bf16 %v1768_v29, %v1756_v25  ;;  %v6825_v20 = vpack.c.bf16 %v3052_v34, %v3040_v44 }
 0x382   : > { %v6827_v60 = vpack.c.bf16 %v1774_v28, %v1762_v37  ;;  %v8288_v24 = vand.u32 4294901760, %v8798_v14  ;;  %v6830_v0 = vpack.c.bf16 %v3058_v42, %v3046_v43  ;;  %v6832_v36 = vpack.c.bf16 %v1792_v8, %v1780_v32  ;;  %v8802_v32 = vld [vmem:[#allocation114_spill] sm:$0xff] }
 0x383   : > { %v8799_v3 = vand.u32 4294901760, %v8795_v35  ;;  %v8287_v53 = vand.u32 4294901760, %v8800_v55  ;;  %v6838_v57 = vpack.c.bf16 %v3076_v31, %v3064_v21  ;;  %v6840_v25 = vpack.c.bf16 %v1798_v2, %v1786_v16 }
 0x384   : > { %v3094_v29 = vand.u32 4294901760, %v3093_v63  ;;  %v3106_v44 = vand.u32 4294901760, %v3105_v23  ;;  %v6842_v34 = vpack.c.bf16 %v3082_v18, %v3070_v19  ;;  %v6844_v37 = vpack.c.bf16 %v1816_v58, %v1804_v46  ;;  %v8803_v46 = vld [vmem:[#allocation115_spill] sm:$0xff]  ;;  %v8804_v19 = vld [vmem:[#allocation116_spill] sm:$0xff] }
 0x385   : > { %v1827_v49 = vsub.f32 %v8795_v35, %v8799_v3  ;;  %v6846_v43 = vpack.c.bf16 %v3100_v7, %v3088_v61  ;;  %v6848_v8 = vpack.c.bf16 %v1822_v13, %v1810_v48  ;;  %v1839_v28 = vsub.f32 %v8798_v14, %v8288_v24 }
 0x386   : > { %v8289_v42 = vand.u32 4294901760, %v8802_v32  ;;  %v8285_v31 = vand.u32 4294901760, %v6346_v4  ;;  %v8286_v2 = vand.u32 4294901760, %v6351_v50  ;;  %v6859_v58 = vsub.f32 %v8800_v55, %v8287_v53 }
 0x387   : > { %8801 = vst [vmem:[#allocation214_spill] sm:$0xff] %v6848_v8  ;;  %v1828_v63 = vand.u32 4294901760, %v1827_v49  ;;  %v8290_v18 = vand.u32 4294901760, %v8803_v46  ;;  %v8291_v23 = vand.u32 4294901760, %v8804_v19  ;;  %v6863_v12 = vpack.c.bf16 %v3106_v44, %v3094_v29  ;;  %v8852_v8 = vld [vmem:[#allocation180_spill] sm:$0xff] }
 0x388   : > { %v3189_v61 = vsub.f32 %v6346_v4, %v8285_v31  ;;  %v3201_v7 = vsub.f32 %v6351_v50, %v8286_v2  ;;  %v8295_v48 = vand.u32 4294901760, %v6357_v45  ;;  %v1840_v44 = vand.u32 4294901760, %v1839_v28  ;;  %v8810_v2 = vld [vmem:[#allocation118_spill] sm:$0xff] }
 0x389   : > { %8805 = vst [vmem:[#allocation215_spill] sm:$0xff] %v6863_v12  ;;  %v6887_v31 = vsub.f32 %v8802_v32, %v8289_v42  ;;  %v8298_v28 = vand.u32 4294901760, %v6362_v11  ;;  %v8300_v32 = vand.u32 4294901760, %v6372_v52 }
 0x38a   : > { %v3190_v24 = vand.u32 4294901760, %v3189_v61 }
 0x38f   : > { %v1303_v21 = vpop.permute.xlu1 %1302  ;;  %v1299_v16 = vpop.permute.xlu0 %1298 }
 0x390   : > { %v6873_v13 = vmul.f32 %v1303_v21, %v6517_v6  ;;  %v6876_v3 = vmul.f32 %v1303_v21, %v6521_v30  ;;  %v6879_v49 = vmul.f32 %v1299_v16, %v6524_v39  ;;  %v6882_v29 = vmul.f32 %v1299_v16, %v6527_v5  ;;  %v8811_v39 = vld [vmem:[#allocation119_spill] sm:$0xff] }
 0x391   : > { %v6894_v30 = vsub.f32 %v8803_v46, %v8290_v18  ;;  %v6899_v5 = vsub.f32 %v8804_v19, %v8291_v23  ;;  %v3202_v6 = vand.u32 4294901760, %v3201_v7  ;;  %v1923_v23 = vsub.f32 %v6357_v45, %v8295_v48 }
 0x392   : > { %8806 = vst [vmem:[#allocation216_spill] sm:$0xff] %v6873_v13  ;;  %8807 = vst [vmem:[#allocation217_spill] sm:$0xff] %v6876_v3  ;;  %v1320_v21 = vadd.f32 %v6873_v13, %v6879_v49  ;;  %v1329_v16 = vadd.f32 %v6876_v3, %v6882_v29  ;;  %v1935_v7 = vsub.f32 %v6362_v11, %v8298_v28 }
 0x393   : > { %8808 = vst [vmem:[#allocation218_spill] sm:$0xff] %v6879_v49  ;;  %8809 = vst [vmem:[#allocation219_spill] sm:$0xff] %v6882_v29  ;;  %v6917_v19 = vpack.c.bf16 %v3202_v6, %v3190_v24  ;;  %v1924_v46 = vand.u32 4294901760, %v1923_v23  ;;  %v8819_v23 = vand.u32 4294901760, %v6378_v54 }
 0x394   : > { %v1307_v61 = vpop.permute.xlu1 %1306 }
 0x395   : > { %v6908_v18 = vmul.f32 %v1307_v61, %v6531_v15  ;;  %v6911_v53 = vmul.f32 %v1307_v61, %v6534_v27  ;;  %8814 = vst [vmem:[#allocation222_spill] sm:$0xff] %v6917_v19  ;;  %v6924_v27 = vpack.c.bf16 %v1840_v44, %v1828_v63  ;;  %v8818_v44 = vand.u32 4294901760, %v6367_v59 }
 0x396   : > { %v3219_v61 = vsub.f32 %v6372_v52, %v8300_v32 }
 0x397   : > { %8812 = vst [vmem:[#allocation220_spill] sm:$0xff] %v6908_v18  ;;  %8813 = vst [vmem:[#allocation221_spill] sm:$0xff] %v6911_v53  ;;  %v1321_v15 = vadd.f32 %v1320_v21, %v6908_v18  ;;  %v1330_v42 = vadd.f32 %v1329_v16, %v6911_v53  ;;  %v1341_v48 = vmax.f32 %v6879_v49, %v6908_v18 }
 0x398   : > { %8815 = vst [vmem:[#allocation223_spill] sm:$0xff] %v6924_v27  ;;  %v1350_v24 = vmax.f32 %v6882_v29, %v6911_v53  ;;  %v1311_v6 = vpop.permute.xlu1 %1310  ;;  %v3207_v16 = vsub.f32 %v6367_v59, %v8818_v44  ;;  %v1936_v53 = vand.u32 4294901760, %v1935_v7  ;;  %v1929_v29 = vsub.f32 %v6378_v54, %v8819_v23 }
 0x399   : > { %v6935_v21 = vmul.f32 %v1311_v6, %v6537_v26  ;;  %v6938_v63 = vmul.f32 %v1311_v6, %v6540_v62 }
 0x39a   : > { %v6959_v49 = vpack.c.bf16 %v1936_v53, %v1924_v46  ;;  %v3208_v23 = vand.u32 4294901760, %v3207_v16  ;;  %v1930_v35 = vand.u32 4294901760, %v1929_v29 }
 0x39b   : > { %8816 = vst [vmem:[#allocation224_spill] sm:$0xff] %v6935_v21  ;;  %8817 = vst [vmem:[#allocation225_spill] sm:$0xff] %v6938_v63  ;;  %v1322_v62 = vadd.f32 %v1321_v15, %v6935_v21  ;;  %v1331_v6 = vadd.f32 %v1330_v42, %v6938_v63  ;;  %v1342_v44 = vmax.f32 %v6873_v13, %v6935_v21  ;;  %v3220_v15 = vand.u32 4294901760, %v3219_v61 }
 0x39c   : > { %v1351_v18 = vmax.f32 %v6876_v3, %v6938_v63  ;;  %8820 = vst [vmem:[#allocation226_spill] sm:$0xff] %v6959_v49  ;;  %v8821_v42 = vand.u32 4294901760, %v6383_v51  ;;  %v8822_v13 = vand.u32 4294901760, %v6388_v56  ;;  %v8829_v49 = vld [vmem:[#allocation168_spill] sm:$0xff] }
 0x39d   : > { %v1323_v28 = vrot.slane %v1322_v62, 4  ;;  %v1332_v55 = vrot.slane %v1331_v6, 4  ;;  %v1343_v26 = vmax.f32 %v1341_v48, %v1342_v44  ;;  %v6967_v46 = vpack.c.bf16 %v3220_v15, %v3208_v23 }
 0x39e   : > { %v1352_v14 = vmax.f32 %v1350_v24, %v1351_v18  ;;  %v1941_v21 = vsub.f32 %v6383_v51, %v8821_v42  ;;  %v3213_v63 = vsub.f32 %v6388_v56, %v8822_v13  ;;  %v8310_v18 = vand.u32 4294901760, %v6393_v40 }
 0x39f   : > { %v1324_v7 = vadd.f32 %v1323_v28, %v1322_v62  ;;  %v1333_v3 = vadd.f32 %v1332_v55, %v1331_v6  ;;  %v1344_v32 = vrot.slane %v1343_v26, 4  ;;  %8823 = vst [vmem:[#allocation227_spill] sm:$0xff] %v6967_v46  ;;  %v8311_v55 = vand.u32 4294901760, %v6398_v41 }
 0x3a0   : > { %v1353_v53 = vrot.slane %v1352_v14, 4  ;;  %v1942_v16 = vand.u32 4294901760, %v1941_v21  ;;  %v3214_v9 = vand.u32 4294901760, %v3213_v63  ;;  %v3225_v13 = vsub.f32 %v6393_v40, %v8310_v18 }
 0x3a1   : > { %v1325_v48 = vrot.slane %v1324_v7, 2  ;;  %v1334_v29 = vrot.slane %v1333_v3, 2  ;;  %v1345_v61 = vmax.f32 %v1343_v26, %v1344_v32  ;;  %v8314_v28 = vand.u32 4294901760, %v6403_v22 }
 0x3a2   : > { %v1354_v24 = vmax.f32 %v1352_v14, %v1353_v53  ;;  %v6970_v44 = vpack.c.bf16 %v1942_v16, %v1930_v35  ;;  %v3226_v23 = vand.u32 4294901760, %v3225_v13  ;;  %v1947_v32 = vsub.f32 %v6398_v41, %v8311_v55  ;;  %v8825_v14 = vld [vmem:[#allocation166_spill] sm:$0xff] }
 0x3a3   : > { %v1326_v62 = vadd.f32 %v1325_v48, %v1324_v7  ;;  %v1335_v6 = vadd.f32 %v1334_v29, %v1333_v3  ;;  %v1346_v21 = vrot.slane %v1345_v61, 2  ;;  %v1959_v35 = vsub.f32 %v6403_v22, %v8314_v28 }
 0x3a4   : > { %8824 = vst [vmem:[#allocation228_spill] sm:$0xff] %v6970_v44  ;;  %v1355_v63 = vrot.slane %v1354_v24, 2  ;;  %v8318_v26 = vand.u32 4294901760, %v8825_v14  ;;  %v6984_v18 = vpack.c.bf16 %v3226_v23, %v3214_v9  ;;  %v1948_v3 = vand.u32 4294901760, %v1947_v32  ;;  %v8828_v44 = vld [vmem:[#allocation167_spill] sm:$0xff] }
 0x3a5   : > { %v1327_v15 = vrot.slane %v1326_v62, 1  ;;  %v1336_v42 = vrot.slane %v1335_v6, 1  ;;  %v1347_v53 = vmax.f32 %v1345_v61, %v1346_v21  ;;  %v1960_v7 = vand.u32 4294901760, %v1959_v35  ;;  %v8831_v35 = vld [vmem:[#allocation170_spill] sm:$0xff] }
 0x3a6   : > { %v1356_v16 = vmax.f32 %v1354_v24, %v1355_v63  ;;  %8826 = vst [vmem:[#allocation229_spill] sm:$0xff] %v6984_v18  ;;  %v3231_v48 = vsub.f32 %v8825_v14, %v8318_v26  ;;  %v8316_v46 = vand.u32 4294901760, %v8828_v44  ;;  %v8315_v61 = vand.u32 4294901760, %v8829_v49  ;;  %v8841_v26 = vld [vmem:[#allocation171_spill] sm:$0xff] }
 0x3a7   : > { %v1328_v29 = vadd.f32 %v1327_v15, %v1326_v62  ;;  %v1337_v13 = vadd.f32 %v1336_v42, %v1335_v6  ;;  %v1348_v55 = vrot.slane %v1347_v53, 1  ;;  %v6989_v17 = vpack.c.bf16 %v1960_v7, %v1948_v3  ;;  %v8830_v6 = vld [vmem:[#allocation169_spill] sm:$0xff] }
 0x3a8   : > { %v1357_v47 = vrot.slane %v1356_v16, 1  ;;  %v3232_v28 = vand.u32 4294901760, %v3231_v48  ;;  %v3243_v23 = vsub.f32 %v8828_v44, %v8316_v46  ;;  %v1953_v62 = vsub.f32 %v8829_v49, %v8315_v61  ;;  %v8941_v44 = vld [vmem:[#allocation161_spill] sm:$0xff] }
 0x3a9   : > { %8827 = vst [vmem:[#allocation230_spill] sm:$0xff] %v6989_v17  ;;  %v1339_v24 = vmul.f32 0.03125, %v1328_v29  ;;  %v1349_v9 = vmax.f32 %v1347_v53, %v1348_v55  ;;  %v1340_v21 = vmul.f32 0.03125, %v1337_v13  ;;  %v8317_v32 = vand.u32 4294901760, %v8830_v6 }
 0x3aa   : > { %v1358_v63 = vmax.f32 %v1356_v16, %v1357_v47  ;;  %v8319_v15 = vand.u32 4294901760, %v8831_v35  ;;  %v3244_v47 = vand.u32 4294901760, %v3243_v23  ;;  %v1954_v53 = vand.u32 4294901760, %v1953_v62 }
 0x3ab   : > { %v7001_v42 = vand.u32 4294901760, %v1339_v24  ;;  %v7003_v3 = vand.u32 4294901760, %v1349_v9  ;;  %v7005_v7 = vand.u32 4294901760, %v1340_v21  ;;  %v1965_v16 = vsub.f32 %v8830_v6, %v8317_v32 }
 0x3ac   : > { %v7007_v55 = vand.u32 4294901760, %v1358_v63  ;;  %v3237_v48 = vsub.f32 %v8831_v35, %v8319_v15  ;;  %v7027_v62 = vpack.c.bf16 %v3244_v47, %v3232_v28  ;;  %v8320_v17 = vand.u32 4294901760, %v8841_v26  ;;  %v8843_v28 = vld [vmem:[#allocation173_spill] sm:$0xff]  ;;  %v8844_v47 = vld [vmem:[#allocation174_spill] sm:$0xff]  ;;  %v8942_v35 = vld [vmem:[#allocation223_spill] sm:$0xff] }
 0x3ad   : > { %8832 = vst [vmem:[#allocation231_spill] sm:$0xff] %v7001_v42  ;;  %8833 = vst [vmem:[#allocation232_spill] sm:$0xff] %v7003_v3  ;;  %v7016_v29 = vsub.f32 %v1340_v21, %v7005_v7  ;;  %v7022_v61 = vsub.f32 %v1339_v24, %v7001_v42  ;;  %v7025_v23 = vsub.f32 %v1349_v9, %v7003_v3  ;;  %v1966_v46 = vand.u32 4294901760, %v1965_v16 }
 0x3ae   : > { %8834 = vst [vmem:[#allocation233_spill] sm:$0xff] %v7005_v7  ;;  %8835 = vst [vmem:[#allocation234_spill] sm:$0xff] %v7007_v55  ;;  %v7019_v13 = vsub.f32 %v1358_v63, %v7007_v55  ;;  %v3238_v32 = vand.u32 4294901760, %v3237_v48  ;;  %v3249_v24 = vsub.f32 %v8841_v26, %v8320_v17  ;;  %v8333_v9 = vand.u32 4294901760, %v8843_v28 }
 0x3af   : > { %8836 = vst [vmem:[#allocation235_spill] sm:$0xff] %v7016_v29  ;;  %8838 = vst [vmem:[#allocation237_spill] sm:$0xff] %v7022_v61  ;;  %v8325_v15 = vand.u32 4294901760, %v7016_v29  ;;  %v7034_v19 = vpack.c.bf16 %v1966_v46, %v1954_v53  ;;  %v8845_v63 = vand.u32 4294901760, %v7022_v61  ;;  %v8846_v53 = vand.u32 4294901760, %v7025_v23 }
 0x3b0   : > { %8837 = vst [vmem:[#allocation236_spill] sm:$0xff] %v7019_v13  ;;  %8839 = vst [vmem:[#allocation238_spill] sm:$0xff] %v7025_v23  ;;  %v8328_v21 = vand.u32 4294901760, %v7019_v13  ;;  %v3250_v3 = vand.u32 4294901760, %v3249_v24  ;;  %v1971_v16 = vsub.f32 %v8843_v28, %v8333_v9  ;;  %v8847_v42 = vand.u32 4294901760, %v8844_v47 }
 0x3b1   : > { %8840 = vst [vmem:[#allocation239_spill] sm:$0xff] %v7027_v62  ;;  %8842 = vst [vmem:[#allocation240_spill] sm:$0xff] %v7034_v19  ;;  %v1618_v48 = vsub.f32 %v7016_v29, %v8325_v15  ;;  %v1624_v46 = vsub.f32 %v7022_v61, %v8845_v63  ;;  %v2908_v17 = vsub.f32 %v7025_v23, %v8846_v53  ;;  %v8848_v29 = vld [vmem:[#allocation175_spill] sm:$0xff]  ;;  %v8850_v53 = vld [vmem:[#allocation177_spill] sm:$0xff] }
 0x3b2   : > { %v2902_v18 = vsub.f32 %v7019_v13, %v8328_v21  ;;  %v1983_v15 = vsub.f32 %v8844_v47, %v8847_v42  ;;  %v8337_v19 = vand.u32 4294901760, %v8848_v29  ;;  %v7060_v63 = vpack.c.bf16 %v3250_v3, %v3238_v32  ;;  %v8851_v23 = vld [vmem:[#allocation179_spill] sm:$0xff] }
 0x3b3   : > { %v1619_v21 = vand.u32 4294901760, %v1618_v48  ;;  %v1625_v62 = vand.u32 4294901760, %v1624_v46  ;;  %v2909_v27 = vand.u32 4294901760, %v2908_v17  ;;  %v1972_v61 = vand.u32 4294901760, %v1971_v16  ;;  %v8853_v48 = vld [vmem:[#allocation182_spill] sm:$0xff]  ;;  %v8856_v16 = vld [vmem:[#allocation185_spill] sm:$0xff] }
 0x3b4   : > { %v2903_v13 = vand.u32 4294901760, %v2902_v18  ;;  %8849 = vst [vmem:[#allocation241_spill] sm:$0xff] %v7060_v63  ;;  %v1984_v12 = vand.u32 4294901760, %v1983_v15  ;;  %v3255_v24 = vsub.f32 %v8848_v29, %v8337_v19  ;;  %v8340_v9 = vand.u32 4294901760, %v8850_v53  ;;  %v8855_v15 = vld [vmem:[#allocation183_spill] sm:$0xff]  ;;  %v8857_v19 = vld [vmem:[#allocation196_spill] sm:$0xff] }
 0x3b5   : > { %1620 = vmatprep.mubr.f32.mxu0 %v1619_v21  ;;  %v8338_v42 = vand.u32 4294901760, %v8851_v23  ;;  %v8339_v47 = vand.u32 4294901760, %v8852_v8  ;;  %v8345_v18 = vand.u32 4294901760, %v8853_v48  ;;  %v8348_v3 = vand.u32 4294901760, %v8855_v15 }
 0x3b6   : > { %2904 = vmatprep.mubr.f32.mxu1 %v2903_v13  ;;  %1626 = vmatmul.mubr.f32.vlgmr.msra.gmra.mrb[2].mxu0 %v1625_v62  ;;  %v7069_v17 = vpack.c.bf16 %v1984_v12, %v1972_v61  ;;  %v3256_v32 = vand.u32 4294901760, %v3255_v24  ;;  %v8349_v46 = vand.u32 4294901760, %v8856_v16  ;;  %v8858_v13 = vld [vmem:[#allocation197_spill] sm:$0xff]  ;;  %v3267_v21 = vsub.f32 %v8850_v53, %v8340_v9  ;;  %v8861_v9 = vld [vmem:[#allocation198_spill] sm:$0xff]  ;;  %v8862_v61 = vld [vmem:[#allocation199_spill] sm:$0xff] }
 0x3b7   : > { %2910 = vmatmul.mubr.f32.vlgmr.msra.gmra.mrb[4].mxu1 %v2909_v27  ;;  %4458 = vmatpush1.bf16.msra.mxu0 %v8857_v19  ;;  %v1977_v62 = vsub.f32 %v8851_v23, %v8338_v42  ;;  %v1989_v12 = vsub.f32 %v8852_v8, %v8339_v47  ;;  %v8859_v27 = vld [vmem:[#allocation186_spill] sm:$0xff]  ;;  %v3261_v19 = vsub.f32 %v8853_v48, %v8345_v18  ;;  %v8860_v42 = vld [vmem:[#allocation187_spill] sm:$0xff] }
 0x3b8   : > { %8854 = vst [vmem:[#allocation242_spill] sm:$0xff] %v7069_v17  ;;  %4842 = vmatpush1.bf16.msra.mxu1 %v8858_v13  ;;  %2017 = vmatprep.mubr.f32.mxu0 %v7005_v7  ;;  %v3273_v24 = vsub.f32 %v8855_v15, %v8348_v3  ;;  %v1995_v13 = vsub.f32 %v8856_v16, %v8349_v46  ;;  %v8353_v47 = vand.u32 4294901760, %v8860_v42  ;;  %v3268_v7 = vand.u32 4294901760, %v3267_v21  ;;  %v8864_v16 = vld [vmem:[#allocation200_spill] sm:$0xff]  ;;  %v8865_v15 = vld [vmem:[#allocation201_spill] sm:$0xff]  ;;  %v8869_v23 = vld [vmem:[#allocation202_spill] sm:$0xff] }
 0x3b9   : > { %3301 = vmatprep.mubr.f32.mxu1 %v7007_v55  ;;  %4460 = vmatprep.subr.bf16.mxu0 %v8861_v9  ;;  %v1978_v55 = vand.u32 4294901760, %v1977_v62  ;;  %v1990_v17 = vand.u32 4294901760, %v1989_v12  ;;  %v8863_v63 = vand.u32 4294901760, %v8859_v27  ;;  %v3262_v48 = vand.u32 4294901760, %v3261_v19  ;;  %v8868_v12 = vld [vmem:[#allocation189_spill] sm:$0xff] }
 0x3ba   : > { %4844 = vmatprep.subr.bf16.mxu1 %v8862_v61  ;;  %v3274_v8 = vand.u32 4294901760, %v3273_v24  ;;  %v1996_v3 = vand.u32 4294901760, %v1995_v13  ;;  %v3279_v46 = vsub.f32 %v8860_v42, %v8353_v47  ;;  %v7107_v9 = vpack.c.bf16 %v3268_v7, %v3256_v32  ;;  %v8872_v13 = vld [vmem:[#allocation191_spill] sm:$0xff]  ;;  %v8873_v42 = vld [vmem:[#allocation192_spill] sm:$0xff] }
 0x3bb   : > { %v2007_v18 = vsub.f32 %v8859_v27, %v8863_v63  ;;  %4462 = vmatpush1.bf16.msra.mxu0 %v8864_v16  ;;  %v7109_v21 = vpack.c.bf16 %v1990_v17, %v1978_v55  ;;  %v8356_v61 = vand.u32 4294901760, %v8868_v12  ;;  %v8870_v63 = vld [vmem:[#allocation203_spill] sm:$0xff]  ;;  %v8358_v47 = vand.u32 4294901760, %v8872_v13  ;;  %v8875_v55 = vld [vmem:[#allocation194_spill] sm:$0xff] }
 0x3bc   : > { %4846 = vmatpush1.bf16.msra.mxu1 %v8865_v15  ;;  %8866 = vst [vmem:[#allocation196_spill] sm:$0xff] %v7107_v9  ;;  %4464 = vmatprep.subr.bf16.mxu0 %v8869_v23  ;;  %v7114_v19 = vpack.c.bf16 %v3274_v8, %v3262_v48  ;;  %v3280_v24 = vand.u32 4294901760, %v3279_v46  ;;  %v8359_v16 = vand.u32 4294901760, %v8873_v42  ;;  %v8876_v17 = vld [vmem:[#allocation195_spill] sm:$0xff]  ;;  %v8877_v23 = vand.u32 4294901760, %v8810_v2 }
 0x3bd   : > { %8867 = vst [vmem:[#allocation197_spill] sm:$0xff] %v7109_v21  ;;  %v2008_v62 = vand.u32 4294901760, %v2007_v18  ;;  %4848 = vmatprep.subr.bf16.mxu1 %v8870_v63  ;;  %v3291_v7 = vsub.f32 %v8868_v12, %v8356_v61  ;;  %v8878_v48 = vld [vmem:[#allocation143_spill] sm:$0xff]  ;;  %v2001_v46 = vsub.f32 %v8872_v13, %v8358_v47  ;;  %v8880_v63 = vld [vmem:[#allocation205_spill] sm:$0xff]  ;;  %v8881_v61 = vand.u32 4294901760, %v8811_v39 }
 0x3be   : > { %8871 = vst [vmem:[#allocation198_spill] sm:$0xff] %v7114_v19  ;;  %v3117_v8 = vsub.f32 %v8810_v2, %v8877_v23  ;;  %v8882_v23 = vand.u32 4294901760, %v8875_v55  ;;  %v8883_v2 = vand.u32 4294901760, %v8876_v17  ;;  %v8887_v19 = vand.u32 4294901760, %v6237_v33 }
 0x3bf   : > { %v7118_v27 = vpack.c.bf16 %v2008_v62, %v1996_v3  ;;  %v2013_v3 = vsub.f32 %v8873_v42, %v8359_v16  ;;  %v8879_v62 = vld [vmem:[#allocation204_spill] sm:$0xff]  ;;  %v3129_v32 = vsub.f32 %v8811_v39, %v8881_v61  ;;  %v3292_v18 = vand.u32 4294901760, %v3291_v7  ;;  %v8885_v16 = vld [vmem:[#allocation207_spill] sm:$0xff] }
 0x3c0   : > { %4466 = vmatpush1.bf16.msra.mxu0 %v8879_v62  ;;  %4850 = vmatpush1.bf16.msra.mxu1 %v8880_v63  ;;  %v3285_v15 = vsub.f32 %v8875_v55, %v8882_v23  ;;  %v3297_v47 = vsub.f32 %v8876_v17, %v8883_v2  ;;  %v8886_v62 = vand.u32 4294901760, %v6232_v38  ;;  %v1863_v61 = vsub.f32 %v6237_v33, %v8887_v19  ;;  %v8891_v55 = vld [vmem:[#allocation144_spill] sm:$0xff]  ;;  %v8899_v33 = vld [vmem:[#allocation210_spill] sm:$0xff] }
 0x3c1   : > { %8874 = vst [vmem:[#allocation199_spill] sm:$0xff] %v7118_v27  ;;  %v8884_v27 = vld [vmem:[#allocation206_spill] sm:$0xff]  ;;  %4852 = vmatprep.subr.bf16.mxu1 %v8885_v16  ;;  %v2002_v7 = vand.u32 4294901760, %v2001_v46  ;;  %v2014_v39 = vand.u32 4294901760, %v2013_v3  ;;  %v8888_v23 = vand.u32 4294901760, %v6242_v10  ;;  %v7157_v9 = vpack.c.bf16 %v3292_v18, %v3280_v24  ;;  %v8894_v19 = vld [vmem:[#allocation208_spill] sm:$0xff] }
 0x3c2   : > { %4468 = vmatprep.subr.bf16.mxu0 %v8884_v27  ;;  %v1851_v63 = vsub.f32 %v6232_v38, %v8886_v62  ;;  %v3286_v2 = vand.u32 4294901760, %v3285_v15  ;;  %v3298_v27 = vand.u32 4294901760, %v3297_v47  ;;  %v8890_v16 = vand.u32 4294901760, %v8878_v48  ;;  %v8892_v38 = vld [vmem:[#allocation145_spill] sm:$0xff]  ;;  %v8896_v3 = vld [vmem:[#allocation146_spill] sm:$0xff]  ;;  %v8897_v24 = vld [vmem:[#allocation147_spill] sm:$0xff] }
 0x3c3   : > { %v3135_v21 = vsub.f32 %v6242_v10, %v8888_v23  ;;  %8889 = vst [vmem:[#allocation200_spill] sm:$0xff] %v7157_v9  ;;  %v7164_v13 = vpack.c.bf16 %v2014_v39, %v2002_v7  ;;  %v8895_v46 = vld [vmem:[#allocation209_spill] sm:$0xff]  ;;  %v8898_v15 = vld [vmem:[#allocation148_spill] sm:$0xff]  ;;  %v1834_v42 = vand.u32 4294901760, %v6894_v30  ;;  %v1846_v39 = vand.u32 4294901760, %v6899_v5  ;;  %v8902_v62 = vld [vmem:[#allocation150_spill] sm:$0xff] }
 0x3c4   : > { %v3147_v17 = vsub.f32 %v8878_v48, %v8890_v16  ;;  %4470 = vmatpush1.bf16.msra.mxu0 %v8894_v19  ;;  %4854 = vmatpush1.bf16.msra.mxu1 %v8895_v46  ;;  %v7171_v10 = vpack.c.bf16 %v3298_v27, %v3286_v2  ;;  %v8900_v16 = vld [vmem:[#allocation211_spill] sm:$0xff]  ;;  %v8901_v7 = vld [vmem:[#allocation149_spill] sm:$0xff]  ;;  %v3118_v48 = vand.u32 4294901760, %v3117_v8  ;;  %v3130_v23 = vand.u32 4294901760, %v3129_v32 }
 0x3c5   : > { %8893 = vst [vmem:[#allocation201_spill] sm:$0xff] %v7164_v13  ;;  %4472 = vmatprep.subr.bf16.mxu0 %v8899_v33  ;;  %4856 = vmatprep.subr.bf16.mxu1 %v8900_v16  ;;  %v8375_v19 = vand.u32 4294901760, %v8901_v7  ;;  %v1852_v13 = vand.u32 4294901760, %v1851_v63  ;;  %v8903_v18 = vld [vmem:[#allocation151_spill] sm:$0xff]  ;;  %v1864_v47 = vand.u32 4294901760, %v1863_v61  ;;  %v3136_v2 = vand.u32 4294901760, %v3135_v21 }
 0x3c6   : > { %v8904_v27 = vand.u32 4294901760, %v8891_v55  ;;  %v8905_v30 = vand.u32 4294901760, %v8892_v38  ;;  %v8906_v16 = vld [vmem:[#allocation212_spill] sm:$0xff]  ;;  %v8907_v46 = vld [vmem:[#allocation213_spill] sm:$0xff]  ;;  %v3148_v32 = vand.u32 4294901760, %v3147_v17  ;;  %v8908_v8 = vand.u32 4294901760, %v8896_v3 }
 0x3c7   : > { %v8909_v21 = vand.u32 4294901760, %v8897_v24  ;;  %v8911_v17 = vand.u32 4294901760, %v6859_v58 }
 0x3c8   : > { %v7183_v33 = vsub.f32 %v8891_v55, %v8904_v27  ;;  %v7188_v5 = vsub.f32 %v8892_v38, %v8905_v30  ;;  %4474 = vmatpush1.bf16.msra.mxu0 %v8906_v16  ;;  %4858 = vmatpush1.bf16.msra.mxu1 %v8907_v46  ;;  %v7195_v63 = vsub.f32 %v8896_v3, %v8908_v8  ;;  %v8910_v27 = vand.u32 4294901760, %v8898_v15 }
 0x3c9   : > { %v7200_v61 = vsub.f32 %v8897_v24, %v8909_v21  ;;  %4476 = vmatprep.subr.bf16.mxu0 %v6823_v1  ;;  %4860 = vmatprep.subr.bf16.mxu1 %v6825_v20  ;;  %v8912_v46 = vand.u32 4294901760, %v6887_v31  ;;  %v7216_v8 = vsub.f32 %v8901_v7, %v8375_v19  ;;  %v8913_v21 = vand.u32 4294901760, %v8902_v62  ;;  %v8916_v31 = vld [vmem:[#allocation153_spill] sm:$0xff] }
 0x3ca   : > { %v7205_v30 = vsub.f32 %v8898_v15, %v8910_v27  ;;  %v8914_v27 = vld [vmem:[#allocation152_spill] sm:$0xff]  ;;  %v7224_v1 = vpack.c.bf16 %v1846_v39, %v1834_v42  ;;  %v8915_v20 = vand.u32 4294901760, %v8903_v18  ;;  %v4873_v3 = vpack.c.bf16 %v3130_v23, %v3118_v48 }
 0x3cb   : > { %v4871_v16 = vpack.c.bf16 %v8912_v46, %v8911_v17  ;;  %v7221_v9 = vsub.f32 %v8902_v62, %v8913_v21  ;;  %v8378_v15 = vand.u32 4294901760, %v8914_v27  ;;  %v8917_v46 = vld [vmem:[#allocation154_spill] sm:$0xff]  ;;  %v7231_v19 = vpack.c.bf16 %v1864_v47, %v1852_v13  ;;  %v8940_v23 = vld [vmem:[#allocation160_spill] sm:$0xff] }
 0x3cc   : > { %v3171_v58 = vsub.f32 %v8903_v18, %v8915_v20  ;;  %v8377_v24 = vand.u32 4294901760, %v8917_v46  ;;  %v1858_v7 = vand.u32 4294901760, %v7183_v33  ;;  %v1870_v21 = vand.u32 4294901760, %v7188_v5  ;;  %4478 = vmatpush1.bf16.msra.mxu0 %v6827_v60  ;;  %4862 = vmatpush1.bf16.msra.mxu1 %v6830_v0  ;;  %v8918_v0 = vld [vmem:[#allocation155_spill] sm:$0xff] }
 0x3cd   : > { %v4875_v42 = vpack.c.bf16 %v3148_v32, %v3136_v2  ;;  %v3142_v39 = vand.u32 4294901760, %v7195_v63  ;;  %v3154_v20 = vand.u32 4294901760, %v7200_v61  ;;  %v1876_v17 = vand.u32 4294901760, %v7205_v30  ;;  %4480 = vmatprep.subr.bf16.mxu0 %v6832_v36  ;;  %4864 = vmatprep.subr.bf16.mxu1 %v6838_v57  ;;  %v8920_v57 = vld [vmem:[#allocation156_spill] sm:$0xff]  ;;  %v8921_v32 = vld [vmem:[#allocation157_spill] sm:$0xff]  ;;  %v8923_v30 = vld [vmem:[#allocation159_spill] sm:$0xff] }
 0x3ce   : > { %v1888_v13 = vand.u32 4294901760, %v7216_v8  ;;  %v3160_v48 = vand.u32 4294901760, %v7221_v9  ;;  %v1881_v60 = vsub.f32 %v8914_v27, %v8378_v15  ;;  %v3172_v47 = vand.u32 4294901760, %v3171_v58  ;;  %v8922_v8 = vld [vmem:[#allocation158_spill] sm:$0xff]  ;;  %v8926_v58 = vld [vmem:[#allocation180_spill] sm:$0xff]  ;;  %v8937_v15 = vld [vmem:[#allocation215_spill] sm:$0xff] }
 0x3cf   : > { %v8919_v2 = vand.u32 4294901760, %v8916_v31  ;;  %v3165_v36 = vsub.f32 %v8917_v46, %v8377_v24  ;;  %v8936_v24 = vld [vmem:[#allocation214_spill] sm:$0xff]  ;;  %v8939_v63 = vand.u32 4294901760, %v8920_v57  ;;  %v8943_v28 = vand.u32 4294901760, %v8921_v32 }
 0x3d0   : > { %4482 = vmatpush1.bf16.msra.mxu0 %v6840_v25  ;;  %4866 = vmatpush1.bf16.msra.mxu1 %v6842_v34  ;;  %v4877_v49 = vpack.c.bf16 %v3154_v20, %v3142_v39  ;;  %v4495_v34 = vpack.c.bf16 %v1888_v13, %v1876_v17  ;;  %v1882_v12 = vand.u32 4294901760, %v1881_v60 }
 0x3d1   : > { %v1893_v33 = vsub.f32 %v8916_v31, %v8919_v2  ;;  %4484 = vmatprep.subr.bf16.mxu0 %v6844_v37  ;;  %4868 = vmatprep.subr.bf16.mxu1 %v6846_v43  ;;  %v8938_v43 = vand.u32 4294901760, %v8918_v0  ;;  %v1899_v14 = vsub.f32 %v8920_v57, %v8939_v63  ;;  %v4493_v63 = vpack.c.bf16 %v1870_v21, %v1858_v7 }
 0x3d2   : > { %v4879_v2 = vpack.c.bf16 %v3172_v47, %v3160_v48 }
 0x3d3   : > { %v3177_v5 = vsub.f32 %v8918_v0, %v8938_v43  ;;  %v8945_v43 = vand.u32 4294901760, %v8923_v30  ;;  %v1894_v25 = vand.u32 4294901760, %v1893_v33  ;;  %v1900_v7 = vand.u32 4294901760, %v1899_v14  ;;  %v8948_v14 = vld [vmem:[#allocation222_spill] sm:$0xff]  ;;  %v8954_v33 = vld [vmem:[#allocation239_spill] sm:$0xff] }
 0x3d4   : > { %4486 = vmatpush1.bf16.msra.mxu0 %v8936_v24  ;;  %4870 = vmatpush1.bf16.msra.mxu1 %v8937_v15  ;;  %v1911_v24 = vsub.f32 %v8921_v32, %v8943_v28  ;;  %v8944_v15 = vand.u32 4294901760, %v8922_v8  ;;  %v8946_v28 = vand.u32 4294901760, %v8940_v23 }
 0x3d5   : > { %4488 = vmatprep.subr.bf16.mxu0 %v8942_v35  ;;  %4872 = vmatprep.subr.bf16.mxu1 %v4871_v16  ;;  %v3195_v9 = vsub.f32 %v8923_v30, %v8945_v43  ;;  %v3166_v35 = vand.u32 4294901760, %v3165_v36  ;;  %v3178_v16 = vand.u32 4294901760, %v3177_v5  ;;  %v8955_v36 = vld [vmem:[#allocation240_spill] sm:$0xff]  ;;  %v8956_v5 = vld [vmem:[#allocation241_spill] sm:$0xff] }
 0x3d6   : > { %v3183_v26 = vsub.f32 %v8922_v8, %v8944_v15  ;;  %v1905_v61 = vsub.f32 %v8940_v23, %v8946_v28  ;;  %v8947_v15 = vand.u32 4294901760, %v8941_v44  ;;  %v1912_v17 = vand.u32 4294901760, %v1911_v24  ;;  %v8963_v24 = vld [vmem:[#allocation12_spill] sm:$0xff]  ;;  %v8964_v43 = vld [vmem:[#allocation13_spill] sm:$0xff] }
 0x3d7   : > { %v3196_v39 = vand.u32 4294901760, %v3195_v9  ;;  %v8957_v9 = vld [vmem:[#allocation242_spill] sm:$0xff] }
 0x3d8   : > { %4490 = vmatpush1.bf16.msra.mxu0 %v7224_v1  ;;  %4874 = vmatpush1.bf16.msra.mxu1 %v4873_v3  ;;  %v1917_v37 = vsub.f32 %v8941_v44, %v8947_v15  ;;  %v3184_v21 = vand.u32 4294901760, %v3183_v26  ;;  %v4497_v3 = vpack.c.bf16 %v1894_v25, %v1882_v12  ;;  %v4881_v1 = vpack.c.bf16 %v3178_v16, %v3166_v35  ;;  %v8949_v26 = vld [vmem:[#allocation226_spill] sm:$0xff]  ;;  %v8952_v12 = vld [vmem:[#allocation229_spill] sm:$0xff]  ;;  %v8966_v16 = vld [vmem:[#allocation16_spill] sm:$0xff] }
 0x3d9   : > { %4492 = vmatprep.subr.bf16.mxu0 %v7231_v19  ;;  %4876 = vmatprep.subr.bf16.mxu1 %v4875_v42  ;;  %v1906_v20 = vand.u32 4294901760, %v1905_v61  ;;  %v4499_v48 = vpack.c.bf16 %v1912_v17, %v1900_v7  ;;  %v8950_v19 = vld [vmem:[#allocation227_spill] sm:$0xff]  ;;  %v8953_v42 = vld [vmem:[#allocation230_spill] sm:$0xff]  ;;  %v8958_v61 = vld [vmem:[#allocation196_spill] sm:$0xff] }
 0x3da   : > { %v1918_v13 = vand.u32 4294901760, %v1917_v37  ;;  %v4883_v60 = vpack.c.bf16 %v3196_v39, %v3184_v21  ;;  %v8960_v25 = vld [vmem:[#allocation198_spill] sm:$0xff]  ;;  %v8962_v37 = vld [vmem:[#allocation200_spill] sm:$0xff]  ;;  %v8967_v15 = vld [vmem:[#allocation201_spill] sm:$0xff] }
 0x3db   : > { %v8965_v35 = vld [vmem:[#allocation14_spill] sm:$0xff]  ;;  %v8969_v17 = vld [vmem:[#allocation19_spill] sm:$0xff]  ;;  %v8970_v39 = vld [vmem:[#allocation21_spill] sm:$0xff] }
 0x3dc   : > { %4494 = vmatpush1.bf16.msra.mxu0 %v4493_v63  ;;  %4878 = vmatpush1.bf16.msra.mxu1 %v4877_v49  ;;  %v4501_v47 = vpack.c.bf16 %v1918_v13, %v1906_v20  ;;  %v8951_v49 = vld [vmem:[#allocation228_spill] sm:$0xff]  ;;  %v4519_v63 = vpack.c.bf16 %v8964_v43, %v8963_v24  ;;  %v4903_v28 = vpack.c.bf16 %v8966_v16, %v8965_v35  ;;  %v8968_v7 = vld [vmem:[#allocation18_spill] sm:$0xff]  ;;  %v8972_v20 = vld [vmem:[#allocation23_spill] sm:$0xff] }
 0x3dd   : > { %4496 = vmatprep.subr.bf16.mxu0 %v4495_v34  ;;  %4880 = vmatprep.subr.bf16.mxu1 %v4879_v2  ;;  %v8959_v2 = vld [vmem:[#allocation197_spill] sm:$0xff]  ;;  %v8961_v34 = vld [vmem:[#allocation199_spill] sm:$0xff]  ;;  %v4521_v21 = vpack.c.bf16 %v8969_v17, %v8968_v7 }
 0x3de   : > { %v8973_v13 = vld [vmem:[#allocation25_spill] sm:$0xff] }
 0x3e0   : > { %4498 = vmatpush1.bf16.msra.mxu0 %v4497_v3  ;;  %4882 = vmatpush1.bf16.msra.mxu1 %v4881_v1  ;;  %v8971_v3 = vld [vmem:[#allocation22_spill] sm:$0xff] }
 0x3e1   : > { %4500 = vmatprep.subr.bf16.mxu0 %v4499_v48  ;;  %4884 = vmatprep.subr.bf16.mxu1 %v4883_v60  ;;  %v4905_v1 = vpack.c.bf16 %v8971_v3, %v8970_v39  ;;  %v4523_v48 = vpack.c.bf16 %v8973_v13, %v8972_v20  ;;  %v8974_v60 = vld [vmem:[#allocation27_spill] sm:$0xff] }
 0x3e4   : > { %4502 = vmatpush1.bf16.msra.mxu0 %v4501_v47  ;;  %4886 = vmatpush1.bf16.msra.mxu1 %v8948_v14  ;;  %v8975_v47 = vld [vmem:[#allocation28_spill] sm:$0xff] }
 0x3e5   : > { %4504 = vmatprep.subr.bf16.mxu0 %v8949_v26  ;;  %4888 = vmatprep.subr.bf16.mxu1 %v8950_v19  ;;  %v4907_v14 = vpack.c.bf16 %v8975_v47, %v8974_v60  ;;  %v8976_v26 = vld [vmem:[#allocation231_spill] sm:$0xff]  ;;  %v8977_v19 = vld [vmem:[#allocation232_spill] sm:$0xff] }
 0x3e8   : > { %4506 = vmatpush1.bf16.msra.mxu0 %v8951_v49  ;;  %4890 = vmatpush1.bf16.msra.mxu1 %v8952_v12  ;;  %v8979_v49 = vld [vmem:[#allocation29_spill] sm:$0xff]  ;;  %v8980_v12 = vld [vmem:[#allocation31_spill] sm:$0xff] }
 0x3e9   : > { %4508 = vmatprep.subr.bf16.mxu0 %v8953_v42  ;;  %4892 = vmatprep.subr.bf16.mxu1 %v8954_v33  ;;  %v4525_v42 = vpack.c.bf16 %v8980_v12, %v8979_v49  ;;  %v8981_v33 = vld [vmem:[#allocation236_spill] sm:$0xff]  ;;  %v8993_v49 = vld [vmem:[#allocation49_spill] sm:$0xff] }
 0x3ea   : > { %v8992_v12 = vld [vmem:[#allocation48_spill] sm:$0xff] }
 0x3ec   : > { %4510 = vmatpush1.bf16.msra.mxu0 %v8955_v36  ;;  %4894 = vmatpush1.bf16.msra.mxu1 %v8956_v5  ;;  %v8982_v36 = vld [vmem:[#allocation32_spill] sm:$0xff]  ;;  %v8983_v5 = vld [vmem:[#allocation34_spill] sm:$0xff] }
 0x3ed   : > { %4512 = vmatprep.subr.bf16.mxu0 %v8957_v9  ;;  %4896 = vmatprep.subr.bf16.mxu1 %v8958_v61  ;;  %v4909_v9 = vpack.c.bf16 %v8983_v5, %v8982_v36  ;;  %v8984_v61 = vld [vmem:[#allocation36_spill] sm:$0xff]  ;;  %v4531_v5 = vpack.c.bf16 %v8993_v49, %v8992_v12  ;;  %v8994_v36 = vld [vmem:[#allocation51_spill] sm:$0xff] }
 0x3ee   : > { %v9005_v12 = vld [vmem:[#allocation67_spill] sm:$0xff] }
 0x3f0   : > { %4514 = vmatpush1.bf16.msra.mxu0 %v8959_v2  ;;  %4898 = vmatpush1.bf16.msra.mxu1 %v8960_v25  ;;  %v8985_v2 = vld [vmem:[#allocation37_spill] sm:$0xff] }
 0x3f1   : > { %4516 = vmatprep.subr.bf16.mxu0 %v8961_v34  ;;  %4900 = vmatprep.subr.bf16.mxu1 %v8962_v37  ;;  %v4527_v25 = vpack.c.bf16 %v8985_v2, %v8984_v61  ;;  %v8986_v34 = vld [vmem:[#allocation39_spill] sm:$0xff]  ;;  %v8987_v37 = vld [vmem:[#allocation40_spill] sm:$0xff] }
 0x3f2   : > { %v8995_v2 = vld [vmem:[#allocation52_spill] sm:$0xff]  ;;  %v8997_v61 = vld [vmem:[#allocation55_spill] sm:$0xff] }
 0x3f4   : > { %4518 = vmatpush1.bf16.msra.mxu0 %v8967_v15  ;;  %4902 = vmatpush1.bf16.msra.mxu1 %v7171_v10  ;;  %v8978_v10 = vld [vmem:[#allocation235_spill] sm:$0xff] }
 0x3f5   : > { %4520 = vmatprep.subr.bf16.mxu0 %v4519_v63  ;;  %4904 = vmatprep.subr.bf16.mxu1 %v4903_v28  ;;  %v4911_v63 = vpack.c.bf16 %v8987_v37, %v8986_v34  ;;  %v8988_v28 = vld [vmem:[#allocation42_spill] sm:$0xff]  ;;  %v8989_v15 = vld [vmem:[#allocation43_spill] sm:$0xff] }
 0x3f7   : > { %2019 = vmatmul.mubr.f32.vlgmr.msra.gmra.mrb[2].mxu0 %v8976_v26  ;;  %3303 = vmatmul.mubr.f32.vlgmr.msra.gmra.mrb[4].mxu1 %v8977_v19  ;;  %v8991_v19 = vld [vmem:[#allocation46_spill] sm:$0xff] }
 0x3f8   : > { %4522 = vmatpush1.bf16.msra.mxu0 %v4521_v21  ;;  %2219 = vmatprep.mubr.f32.mxu0 %v8978_v10  ;;  %v4529_v21 = vpack.c.bf16 %v8989_v15, %v8988_v28  ;;  %v8999_v15 = vld [vmem:[#allocation58_spill] sm:$0xff]  ;;  %v9001_v28 = vld [vmem:[#allocation61_spill] sm:$0xff] }
 0x3f9   : > { %4906 = vmatpush1.bf16.msra.mxu1 %v4905_v1  ;;  %3503 = vmatprep.mubr.f32.mxu1 %v8981_v33  ;;  %v8990_v1 = vld [vmem:[#allocation45_spill] sm:$0xff] }
 0x3fa   : > { %4524 = vmatprep.subr.bf16.mxu0 %v4523_v48  ;;  %4908 = vmatprep.subr.bf16.mxu1 %v4907_v14  ;;  %v4913_v26 = vpack.c.bf16 %v8991_v19, %v8990_v1  ;;  %v4915_v48 = vpack.c.bf16 %v8995_v2, %v8994_v36  ;;  %v8996_v14 = vld [vmem:[#allocation53_spill] sm:$0xff]  ;;  %v9002_v19 = vld [vmem:[#allocation62_spill] sm:$0xff]  ;;  %v9003_v1 = vld [vmem:[#allocation64_spill] sm:$0xff] }
 0x3fb   : > { %v4533_v37 = vpack.c.bf16 %v8997_v61, %v8996_v14  ;;  %v4919_v49 = vpack.c.bf16 %v9003_v1, %v9002_v19  ;;  %v9007_v61 = vld [vmem:[#allocation70_spill] sm:$0xff]  ;;  %v9009_v14 = vld [vmem:[#allocation73_spill] sm:$0xff] }
 0x3fc   : > { %4526 = vmatpush1.bf16.msra.mxu0 %v4525_v42  ;;  %v8998_v42 = vld [vmem:[#allocation57_spill] sm:$0xff] }
 0x3fd   : > { %4910 = vmatpush1.bf16.msra.mxu1 %v4909_v9  ;;  %4528 = vmatprep.subr.bf16.mxu0 %v4527_v25  ;;  %v4917_v9 = vpack.c.bf16 %v8999_v15, %v8998_v42  ;;  %v9000_v25 = vld [vmem:[#allocation60_spill] sm:$0xff]  ;;  %v9010_v15 = vld [vmem:[#allocation74_spill] sm:$0xff] }
 0x3fe   : > { %4912 = vmatprep.subr.bf16.mxu1 %v4911_v63  ;;  %v4535_v34 = vpack.c.bf16 %v9001_v28, %v9000_v25  ;;  %v9004_v63 = vld [vmem:[#allocation66_spill] sm:$0xff]  ;;  %v9011_v42 = vld [vmem:[#allocation76_spill] sm:$0xff]  ;;  %v9013_v25 = vld [vmem:[#allocation79_spill] sm:$0xff] }
 0x3ff   : > { %v4537_v2 = vpack.c.bf16 %v9005_v12, %v9004_v63  ;;  %v4923_v28 = vpack.c.bf16 %v9011_v42, %v9010_v15  ;;  %v9015_v12 = vld [vmem:[#allocation82_spill] sm:$0xff]  ;;  %v9017_v63 = vld [vmem:[#allocation85_spill] sm:$0xff] }
 0x400   : > { %4530 = vmatpush1.bf16.msra.mxu0 %v4529_v21  ;;  %v9006_v21 = vld [vmem:[#allocation69_spill] sm:$0xff] }
 0x401   : > { %4914 = vmatpush1.bf16.msra.mxu1 %v4913_v26  ;;  %4532 = vmatprep.subr.bf16.mxu0 %v4531_v5  ;;  %v4921_v26 = vpack.c.bf16 %v9007_v61, %v9006_v21  ;;  %v9008_v5 = vld [vmem:[#allocation72_spill] sm:$0xff]  ;;  %v9018_v61 = vld [vmem:[#allocation86_spill] sm:$0xff] }
 0x402   : > { %4916 = vmatprep.subr.bf16.mxu1 %v4915_v48  ;;  %v4539_v36 = vpack.c.bf16 %v9009_v14, %v9008_v5  ;;  %v9012_v48 = vld [vmem:[#allocation78_spill] sm:$0xff]  ;;  %v9019_v21 = vld [vmem:[#allocation88_spill] sm:$0xff]  ;;  %v9021_v5 = vld [vmem:[#allocation91_spill] sm:$0xff] }
 0x403   : > { %v4541_v1 = vpack.c.bf16 %v9013_v25, %v9012_v48  ;;  %v4927_v14 = vpack.c.bf16 %v9019_v21, %v9018_v61  ;;  %v9023_v25 = vld [vmem:[#allocation94_spill] sm:$0xff]  ;;  %v9025_v48 = vld [vmem:[#allocation100_spill] sm:$0xff] }
 0x404   : > { %4534 = vmatpush1.bf16.msra.mxu0 %v4533_v37  ;;  %v9014_v37 = vld [vmem:[#allocation81_spill] sm:$0xff] }
 0x405   : > { %4918 = vmatpush1.bf16.msra.mxu1 %v4917_v9  ;;  %4536 = vmatprep.subr.bf16.mxu0 %v4535_v34  ;;  %v4925_v9 = vpack.c.bf16 %v9015_v12, %v9014_v37  ;;  %v9016_v34 = vld [vmem:[#allocation84_spill] sm:$0xff]  ;;  %v9026_v12 = vld [vmem:[#allocation101_spill] sm:$0xff]  ;;  %v9027_v37 = vld [vmem:[#allocation102_spill] sm:$0xff] }
 0x406   : > { %4920 = vmatprep.subr.bf16.mxu1 %v4919_v49  ;;  %v4543_v19 = vpack.c.bf16 %v9017_v63, %v9016_v34  ;;  %v9020_v49 = vld [vmem:[#allocation90_spill] sm:$0xff]  ;;  %v4931_v63 = vpack.c.bf16 %v9027_v37, %v9026_v12  ;;  %v9029_v34 = vld [vmem:[#allocation104_spill] sm:$0xff] }
 0x407   : > { %v4545_v42 = vpack.c.bf16 %v9021_v5, %v9020_v49  ;;  %v9031_v5 = vld [vmem:[#allocation106_spill] sm:$0xff]  ;;  %v9033_v49 = vld [vmem:[#allocation112_spill] sm:$0xff] }
 0x408   : > { %4538 = vmatpush1.bf16.msra.mxu0 %v4537_v2  ;;  %v9022_v2 = vld [vmem:[#allocation93_spill] sm:$0xff] }
 0x409   : > { %4922 = vmatpush1.bf16.msra.mxu1 %v4921_v26  ;;  %4540 = vmatprep.subr.bf16.mxu0 %v4539_v36  ;;  %v4929_v26 = vpack.c.bf16 %v9023_v25, %v9022_v2  ;;  %v9024_v36 = vld [vmem:[#allocation99_spill] sm:$0xff]  ;;  %v9034_v25 = vld [vmem:[#allocation113_spill] sm:$0xff]  ;;  %v9035_v2 = vld [vmem:[#allocation114_spill] sm:$0xff] }
 0x40a   : > { %4924 = vmatprep.subr.bf16.mxu1 %v4923_v28  ;;  %v4547_v15 = vpack.c.bf16 %v9025_v48, %v9024_v36  ;;  %v9028_v28 = vld [vmem:[#allocation103_spill] sm:$0xff]  ;;  %v4935_v48 = vpack.c.bf16 %v9035_v2, %v9034_v25  ;;  %v9037_v36 = vld [vmem:[#allocation116_spill] sm:$0xff] }
 0x40b   : > { %v4549_v21 = vpack.c.bf16 %v9029_v34, %v9028_v28  ;;  %v9039_v34 = vld [vmem:[#allocation119_spill] sm:$0xff]  ;;  %v9041_v28 = vld [vmem:[#allocation141_spill] sm:$0xff] }
 0x40c   : > { %4542 = vmatpush1.bf16.msra.mxu0 %v4541_v1  ;;  %v9030_v1 = vld [vmem:[#allocation105_spill] sm:$0xff] }
 0x40d   : > { %4926 = vmatpush1.bf16.msra.mxu1 %v4925_v9  ;;  %4544 = vmatprep.subr.bf16.mxu0 %v4543_v19  ;;  %v4933_v9 = vpack.c.bf16 %v9031_v5, %v9030_v1  ;;  %v9032_v19 = vld [vmem:[#allocation111_spill] sm:$0xff]  ;;  %v9042_v5 = vld [vmem:[#allocation142_spill] sm:$0xff] }
 0x40e   : > { %4928 = vmatprep.subr.bf16.mxu1 %v4927_v14  ;;  %v4551_v61 = vpack.c.bf16 %v9033_v49, %v9032_v19  ;;  %v9036_v14 = vld [vmem:[#allocation115_spill] sm:$0xff] }
 0x40f   : > { %v4553_v37 = vpack.c.bf16 %v9037_v36, %v9036_v14  ;;  %v9043_v1 = vld [vmem:[#allocation143_spill] sm:$0xff]  ;;  %v9047_v14 = vld [vmem:[#allocation149_spill] sm:$0xff] }
 0x410   : > { %4546 = vmatpush1.bf16.msra.mxu0 %v4545_v42  ;;  %v9038_v42 = vld [vmem:[#allocation118_spill] sm:$0xff]  ;;  %v4939_v49 = vpack.c.bf16 %v9043_v1, %v9042_v5  ;;  %v9045_v36 = vld [vmem:[#allocation147_spill] sm:$0xff] }
 0x411   : > { %4930 = vmatpush1.bf16.msra.mxu1 %v4929_v26  ;;  %4548 = vmatprep.subr.bf16.mxu0 %v4547_v15  ;;  %v4937_v26 = vpack.c.bf16 %v9039_v34, %v9038_v42  ;;  %v9040_v15 = vld [vmem:[#allocation140_spill] sm:$0xff] }
 0x412   : > { %4932 = vmatprep.subr.bf16.mxu1 %v4931_v63  ;;  %v4555_v12 = vpack.c.bf16 %v9041_v28, %v9040_v15  ;;  %v4557_v63 = vpack.c.bf16 %v8892_v38, %v8891_v55  ;;  %v4943_v28 = vpack.c.bf16 %v8903_v18, %v8902_v62 }
 0x414   : > { %4550 = vmatpush1.bf16.msra.mxu0 %v4549_v21  ;;  %v9044_v21 = vld [vmem:[#allocation146_spill] sm:$0xff] }
 0x415   : > { %4934 = vmatpush1.bf16.msra.mxu1 %v4933_v9  ;;  %4552 = vmatprep.subr.bf16.mxu0 %v4551_v61  ;;  %v4941_v9 = vpack.c.bf16 %v9045_v36, %v9044_v21  ;;  %v9046_v61 = vld [vmem:[#allocation148_spill] sm:$0xff] }
 0x416   : > { %4936 = vmatprep.subr.bf16.mxu1 %v4935_v48  ;;  %v4559_v2 = vpack.c.bf16 %v9047_v14, %v9046_v61  ;;  %v4561_v48 = vpack.c.bf16 %v8916_v31, %v8914_v27 }
 0x418   : > { %4554 = vmatpush1.bf16.msra.mxu0 %v4553_v37  ;;  %v4945_v37 = vpack.c.bf16 %v8918_v0, %v8917_v46 }
 0x419   : > { %4938 = vmatpush1.bf16.msra.mxu1 %v4937_v26  ;;  %4556 = vmatprep.subr.bf16.mxu0 %v4555_v12  ;;  %v4563_v12 = vpack.c.bf16 %v8921_v32, %v8920_v57  ;;  %v4947_v26 = vpack.c.bf16 %v8923_v30, %v8922_v8 }
 0x41a   : > { %4940 = vmatprep.subr.bf16.mxu1 %v4939_v49  ;;  %v4565_v49 = vpack.c.bf16 %v8941_v44, %v8940_v23 }
 0x41c   : > { %4558 = vmatpush1.bf16.msra.mxu0 %v4557_v63  ;;  %v9049_v63 = vpack.c.bf16 %v6362_v11, %v6357_v45 }
 0x41d   : > { %4942 = vmatpush1.bf16.msra.mxu1 %v4941_v9  ;;  %4560 = vmatprep.subr.bf16.mxu0 %v4559_v2  ;;  %v9048_v2 = vpack.c.bf16 %v6351_v50, %v6346_v4  ;;  %v9051_v9 = vpack.c.bf16 %v6383_v51, %v6378_v54  ;;  %v9063_v54 = vld [vmem:[#allocation173_spill] sm:$0xff] }
 0x41e   : > { %4944 = vmatprep.subr.bf16.mxu1 %v4943_v28  ;;  %v9050_v28 = vpack.c.bf16 %v6372_v52, %v6367_v59  ;;  %v9060_v52 = vld [vmem:[#allocation170_spill] sm:$0xff] }
 0x420   : > { %4562 = vmatpush1.bf16.msra.mxu0 %v4561_v48  ;;  %v9052_v48 = vpack.c.bf16 %v6393_v40, %v6388_v56 }
 0x421   : > { %4946 = vmatpush1.bf16.msra.mxu1 %v4945_v37  ;;  %4564 = vmatprep.subr.bf16.mxu0 %v4563_v12  ;;  %v9053_v37 = vpack.c.bf16 %v6403_v22, %v6398_v41  ;;  %v9054_v12 = vld [vmem:[#allocation167_spill] sm:$0xff] }
 0x422   : > { %4948 = vmatprep.subr.bf16.mxu1 %v4947_v26  ;;  %v9055_v26 = vld [vmem:[#allocation166_spill] sm:$0xff] }
 0x424   : > { %4566 = vmatpush1.bf16.msra.mxu0 %v4565_v49  ;;  %v9056_v49 = vpack.c.bf16 %v9054_v12, %v9055_v26  ;;  %v9069_v26 = vld [vmem:[#allocation182_spill] sm:$0xff] }
 0x425   : > { %4950 = vmatpush1.bf16.msra.mxu1 %v9048_v2  ;;  %4568 = vmatprep.subr.bf16.mxu0 %v9049_v63  ;;  %v9057_v2 = vld [vmem:[#allocation168_spill] sm:$0xff] }
 0x426   : > { %4952 = vmatprep.subr.bf16.mxu1 %v9050_v28  ;;  %v9058_v63 = vpack.c.bf16 %v8830_v6, %v9057_v2  ;;  %v9059_v28 = vld [vmem:[#allocation171_spill] sm:$0xff]  ;;  %v9072_v2 = vld [vmem:[#allocation185_spill] sm:$0xff] }
 0x427   : > { %v9061_v51 = vpack.c.bf16 %v9059_v28, %v9060_v52  ;;  %v9075_v52 = vld [vmem:[#allocation187_spill] sm:$0xff] }
 0x428   : > { %4570 = vmatpush1.bf16.msra.mxu0 %v9051_v9  ;;  %v9062_v9 = vld [vmem:[#allocation174_spill] sm:$0xff] }
 0x429   : > { %4954 = vmatpush1.bf16.msra.mxu1 %v9052_v48  ;;  %4572 = vmatprep.subr.bf16.mxu0 %v9053_v37  ;;  %v9064_v40 = vpack.c.bf16 %v9062_v9, %v9063_v54  ;;  %v9065_v48 = vpack.c.bf16 %v8850_v53, %v8848_v29  ;;  %v9066_v37 = vld [vmem:[#allocation179_spill] sm:$0xff]  ;;  %v9081_v29 = vld [vmem:[#allocation194_spill] sm:$0xff] }
 0x42a   : > { %4956 = vmatprep.subr.bf16.mxu1 %v9056_v49  ;;  %v9067_v12 = vpack.c.bf16 %v8926_v58, %v9066_v37  ;;  %v9068_v49 = vld [vmem:[#allocation183_spill] sm:$0xff] }
 0x42b   : > { %v9070_v6 = vpack.c.bf16 %v9068_v49, %v9069_v26  ;;  %v9078_v54 = vld [vmem:[#allocation191_spill] sm:$0xff] }
 0x42c   : > { %4574 = vmatpush1.bf16.msra.mxu0 %v9058_v63  ;;  %v9071_v63 = vld [vmem:[#allocation186_spill] sm:$0xff]  ;;  %v9084_v49 = vld [vmem:[#allocation15_spill] sm:$0xff] }
 0x42d   : > { %4958 = vmatpush1.bf16.msra.mxu1 %v9061_v51  ;;  %4576 = vmatprep.subr.bf16.mxu0 %v9064_v40  ;;  %v9073_v28 = vpack.c.bf16 %v9071_v63, %v9072_v2  ;;  %v9074_v51 = vld [vmem:[#allocation189_spill] sm:$0xff]  ;;  %v9077_v40 = vld [vmem:[#allocation192_spill] sm:$0xff]  ;;  %v9086_v63 = vld [vmem:[#allocation238_spill] sm:$0xff] }
 0x42e   : > { %4960 = vmatprep.subr.bf16.mxu1 %v9065_v48  ;;  %v9076_v9 = vpack.c.bf16 %v9074_v51, %v9075_v52  ;;  %v9079_v53 = vpack.c.bf16 %v9077_v40, %v9078_v54  ;;  %v9080_v48 = vld [vmem:[#allocation195_spill] sm:$0xff]  ;;  %v9089_v51 = vld [vmem:[#allocation20_spill] sm:$0xff]  ;;  %v9096_v40 = vld [vmem:[#allocation38_spill] sm:$0xff] }
 0x42f   : > { %v9082_v58 = vpack.c.bf16 %v9080_v48, %v9081_v29  ;;  %v9091_v48 = vld [vmem:[#allocation24_spill] sm:$0xff]  ;;  %v9095_v29 = vld [vmem:[#allocation35_spill] sm:$0xff] }
 0x430   : > { %4578 = vmatpush1.bf16.msra.mxu0 %v9067_v12  ;;  %v9083_v12 = vld [vmem:[#allocation11_spill] sm:$0xff] }
 0x431   : > { %4962 = vmatpush1.bf16.msra.mxu1 %v9070_v6  ;;  %4580 = vmatprep.subr.bf16.mxu0 %v9073_v28  ;;  %v9085_v6 = vld [vmem:[#allocation237_spill] sm:$0xff] }
 0x432   : > { %4964 = vmatprep.subr.bf16.mxu1 %v9076_v9  ;;  %v9087_v28 = vld [vmem:[#allocation17_spill] sm:$0xff]  ;;  %v9088_v9 = vand.u32 4294901760, %v8978_v10  ;;  %v9098_v10 = vld [vmem:[#allocation44_spill] sm:$0xff] }
 0x434   : > { %4582 = vmatpush1.bf16.msra.mxu0 %v9079_v53  ;;  %v9090_v53 = vand.u32 4294901760, %v8981_v33  ;;  %v9100_v33 = vld [vmem:[#allocation50_spill] sm:$0xff] }
 0x435   : > { %4966 = vmatpush1.bf16.msra.mxu1 %v9082_v58  ;;  %4584 = vmatprep.subr.bf16.mxu0 %v9083_v12  ;;  %v9092_v58 = vld [vmem:[#allocation26_spill] sm:$0xff] }
 0x436   : > { %4968 = vmatprep.subr.bf16.mxu1 %v9084_v49  ;;  %v9093_v12 = vld [vmem:[#allocation30_spill] sm:$0xff]  ;;  %v9094_v49 = vld [vmem:[#allocation33_spill] sm:$0xff] }
 0x437   : > { %2222 = vmatmul.mubr.f32.vlgmr.msra.gmra.mrb[2].mxu0 %v9085_v6 }
 0x438   : > { %3506 = vmatmul.mubr.f32.vlgmr.msra.gmra.mrb[4].mxu1 %v9086_v63  ;;  %4586 = vmatpush1.bf16.msra.mxu0 %v9087_v28  ;;  %v9097_v28 = vld [vmem:[#allocation41_spill] sm:$0xff] }
 0x439   : > { %2359 = vmatprep.mubr.f32.mxu0 %v9088_v9  ;;  %4970 = vmatpush1.bf16.msra.mxu1 %v9089_v51  ;;  %v9099_v9 = vld [vmem:[#allocation47_spill] sm:$0xff]  ;;  %v9153_v51 = vld [vmem:[#allocation190_spill] sm:$0xff] }
 0x43a   : > { %3643 = vmatprep.mubr.f32.mxu1 %v9090_v53  ;;  %4588 = vmatprep.subr.bf16.mxu0 %v9091_v48  ;;  %v9101_v53 = vld [vmem:[#allocation54_spill] sm:$0xff]  ;;  %v9102_v48 = vld [vmem:[#allocation56_spill] sm:$0xff] }
 0x43b   : > { %4972 = vmatprep.subr.bf16.mxu1 %v9092_v58  ;;  %v9103_v58 = vld [vmem:[#allocation59_spill] sm:$0xff] }
 0x43c   : > { %4590 = vmatpush1.bf16.msra.mxu0 %v9093_v12  ;;  %v9104_v12 = vld [vmem:[#allocation63_spill] sm:$0xff] }
 0x43d   : > { %4974 = vmatpush1.bf16.msra.mxu1 %v9094_v49  ;;  %4592 = vmatprep.subr.bf16.mxu0 %v9095_v29  ;;  %v9105_v49 = vld [vmem:[#allocation65_spill] sm:$0xff]  ;;  %v9106_v29 = vld [vmem:[#allocation68_spill] sm:$0xff] }
 0x43e   : > { %4976 = vmatprep.subr.bf16.mxu1 %v9096_v40  ;;  %v9107_v40 = vld [vmem:[#allocation71_spill] sm:$0xff] }
 0x440   : > { %4594 = vmatpush1.bf16.msra.mxu0 %v9097_v28  ;;  %v9108_v28 = vld [vmem:[#allocation75_spill] sm:$0xff] }
 0x441   : > { %4978 = vmatpush1.bf16.msra.mxu1 %v9098_v10  ;;  %4596 = vmatprep.subr.bf16.mxu0 %v9099_v9  ;;  %v9109_v10 = vld [vmem:[#allocation77_spill] sm:$0xff]  ;;  %v9110_v9 = vld [vmem:[#allocation80_spill] sm:$0xff] }
 0x442   : > { %4980 = vmatprep.subr.bf16.mxu1 %v9100_v33  ;;  %v9111_v33 = vld [vmem:[#allocation83_spill] sm:$0xff] }
 0x444   : > { %4598 = vmatpush1.bf16.msra.mxu0 %v9101_v53  ;;  %v9112_v53 = vld [vmem:[#allocation87_spill] sm:$0xff] }
 0x445   : > { %4982 = vmatpush1.bf16.msra.mxu1 %v9102_v48  ;;  %4600 = vmatprep.subr.bf16.mxu0 %v9103_v58  ;;  %v9113_v48 = vld [vmem:[#allocation89_spill] sm:$0xff]  ;;  %v9114_v58 = vld [vmem:[#allocation92_spill] sm:$0xff] }
 0x446   : > { %4984 = vmatprep.subr.bf16.mxu1 %v9104_v12  ;;  %v9115_v12 = vld [vmem:[#allocation95_spill] sm:$0xff] }
 0x448   : > { %4602 = vmatpush1.bf16.msra.mxu0 %v9105_v49  ;;  %v9116_v49 = vld [vmem:[#allocation96_spill] sm:$0xff] }
 0x449   : > { %4986 = vmatpush1.bf16.msra.mxu1 %v9106_v29  ;;  %4604 = vmatprep.subr.bf16.mxu0 %v9107_v40  ;;  %v9117_v29 = vld [vmem:[#allocation97_spill] sm:$0xff]  ;;  %v9118_v40 = vld [vmem:[#allocation98_spill] sm:$0xff] }
 0x44a   : > { %4988 = vmatprep.subr.bf16.mxu1 %v9108_v28  ;;  %v9119_v28 = vld [vmem:[#allocation108_spill] sm:$0xff] }
 0x44c   : > { %4606 = vmatpush1.bf16.msra.mxu0 %v9109_v10  ;;  %v9120_v10 = vld [vmem:[#allocation109_spill] sm:$0xff] }
 0x44d   : > { %4990 = vmatpush1.bf16.msra.mxu1 %v9110_v9  ;;  %4608 = vmatprep.subr.bf16.mxu0 %v9111_v33  ;;  %v9121_v9 = vld [vmem:[#allocation110_spill] sm:$0xff]  ;;  %v9122_v33 = vld [vmem:[#allocation117_spill] sm:$0xff] }
 0x44e   : > { %4992 = vmatprep.subr.bf16.mxu1 %v9112_v53  ;;  %v9123_v53 = vld [vmem:[#allocation120_spill] sm:$0xff] }
 0x450   : > { %4610 = vmatpush1.bf16.msra.mxu0 %v9113_v48  ;;  %v9124_v48 = vld [vmem:[#allocation121_spill] sm:$0xff] }
 0x451   : > { %4994 = vmatpush1.bf16.msra.mxu1 %v9114_v58  ;;  %4612 = vmatprep.subr.bf16.mxu0 %v9115_v12  ;;  %v9125_v58 = vld [vmem:[#allocation122_spill] sm:$0xff]  ;;  %v9126_v12 = vld [vmem:[#allocation123_spill] sm:$0xff] }
 0x452   : > { %4996 = vmatprep.subr.bf16.mxu1 %v9116_v49  ;;  %v9127_v49 = vld [vmem:[#allocation124_spill] sm:$0xff] }
 0x454   : > { %4614 = vmatpush1.bf16.msra.mxu0 %v9117_v29  ;;  %v9128_v29 = vld [vmem:[#allocation125_spill] sm:$0xff] }
 0x455   : > { %4998 = vmatpush1.bf16.msra.mxu1 %v9118_v40  ;;  %4616 = vmatprep.subr.bf16.mxu0 %v9119_v28  ;;  %v9129_v40 = vld [vmem:[#allocation126_spill] sm:$0xff]  ;;  %v9130_v28 = vld [vmem:[#allocation127_spill] sm:$0xff] }
 0x456   : > { %5000 = vmatprep.subr.bf16.mxu1 %v9120_v10  ;;  %v9131_v10 = vld [vmem:[#allocation128_spill] sm:$0xff] }
 0x458   : > { %4618 = vmatpush1.bf16.msra.mxu0 %v9121_v9  ;;  %v9132_v9 = vld [vmem:[#allocation129_spill] sm:$0xff] }
 0x459   : > { %5002 = vmatpush1.bf16.msra.mxu1 %v9122_v33  ;;  %4620 = vmatprep.subr.bf16.mxu0 %v9123_v53  ;;  %v9133_v33 = vld [vmem:[#allocation130_spill] sm:$0xff]  ;;  %v9134_v53 = vld [vmem:[#allocation131_spill] sm:$0xff] }
 0x45a   : > { %5004 = vmatprep.subr.bf16.mxu1 %v9124_v48  ;;  %v9135_v48 = vld [vmem:[#allocation132_spill] sm:$0xff] }
 0x45c   : > { %4622 = vmatpush1.bf16.msra.mxu0 %v9125_v58  ;;  %v9136_v58 = vld [vmem:[#allocation133_spill] sm:$0xff] }
 0x45d   : > { %5006 = vmatpush1.bf16.msra.mxu1 %v9126_v12  ;;  %4624 = vmatprep.subr.bf16.mxu0 %v9127_v49  ;;  %v9137_v12 = vld [vmem:[#allocation134_spill] sm:$0xff]  ;;  %v9138_v49 = vld [vmem:[#allocation135_spill] sm:$0xff] }
 0x45e   : > { %5008 = vmatprep.subr.bf16.mxu1 %v9128_v29  ;;  %v9139_v29 = vld [vmem:[#allocation136_spill] sm:$0xff] }
 0x460   : > { %4626 = vmatpush1.bf16.msra.mxu0 %v9129_v40  ;;  %v9140_v40 = vld [vmem:[#allocation137_spill] sm:$0xff] }
 0x461   : > { %5010 = vmatpush1.bf16.msra.mxu1 %v9130_v28  ;;  %4628 = vmatprep.subr.bf16.mxu0 %v9131_v10  ;;  %v9141_v28 = vld [vmem:[#allocation138_spill] sm:$0xff]  ;;  %v9142_v10 = vld [vmem:[#allocation139_spill] sm:$0xff] }
 0x462   : > { %5012 = vmatprep.subr.bf16.mxu1 %v9132_v9  ;;  %v9143_v9 = vld [vmem:[#allocation172_spill] sm:$0xff] }
 0x464   : > { %4630 = vmatpush1.bf16.msra.mxu0 %v9133_v33  ;;  %v9144_v33 = vld [vmem:[#allocation176_spill] sm:$0xff] }
 0x465   : > { %5014 = vmatpush1.bf16.msra.mxu1 %v9134_v53  ;;  %4632 = vmatprep.subr.bf16.mxu0 %v9135_v48  ;;  %v9145_v53 = vld [vmem:[#allocation178_spill] sm:$0xff]  ;;  %v9146_v48 = vld [vmem:[#allocation181_spill] sm:$0xff] }
 0x466   : > { %5016 = vmatprep.subr.bf16.mxu1 %v9136_v58  ;;  %v9147_v58 = vld [vmem:[#allocation184_spill] sm:$0xff] }
 0x468   : > { %4634 = vmatpush1.bf16.msra.mxu0 %v9137_v12 }
 0x469   : > { %5018 = vmatpush1.bf16.msra.mxu1 %v9138_v49  ;;  %4636 = vmatprep.subr.bf16.mxu0 %v9139_v29  ;;  %v9148_v49 = vand.u32 4294901760, %v8963_v24  ;;  %v9149_v29 = vand.u32 4294901760, %v8964_v43  ;;  %v9157_v24 = vand.u32 4294901760, %v8970_v39  ;;  %v9165_v39 = vld [vmem:[#allocation29_spill] sm:$0xff] }
 0x46a   : > { %5020 = vmatprep.subr.bf16.mxu1 %v9140_v40  ;;  %v9150_v40 = vld [vmem:[#allocation188_spill] sm:$0xff] }
 0x46b   : > { %v4647_v12 = vpack.c.bf16 %v9149_v29, %v9148_v49  ;;  %v9158_v29 = vand.u32 4294901760, %v8971_v3  ;;  %v9166_v3 = vand.u32 4294901760, %v9165_v39 }
 0x46c   : > { %4638 = vmatpush1.bf16.msra.mxu0 %v9141_v28  ;;  %v9151_v28 = vand.u32 4294901760, %v8965_v35  ;;  %v9159_v35 = vand.u32 4294901760, %v8972_v20 }
 0x46d   : > { %5022 = vmatpush1.bf16.msra.mxu1 %v9142_v10  ;;  %4640 = vmatprep.subr.bf16.mxu0 %v9143_v9  ;;  %v9152_v10 = vand.u32 4294901760, %v8966_v16  ;;  %v5033_v43 = vpack.c.bf16 %v9158_v29, %v9157_v24  ;;  %v9160_v16 = vand.u32 4294901760, %v8973_v13  ;;  %v9170_v13 = vld [vmem:[#allocation32_spill] sm:$0xff]  ;;  %v9172_v24 = vld [vmem:[#allocation34_spill] sm:$0xff] }
 0x46e   : > { %5024 = vmatprep.subr.bf16.mxu1 %v9144_v33  ;;  %v9173_v29 = vand.u32 4294901760, %v9172_v24  ;;  %v9187_v24 = vld [vmem:[#allocation45_spill] sm:$0xff] }
 0x46f   : > { %v5031_v9 = vpack.c.bf16 %v9152_v10, %v9151_v28  ;;  %v4651_v49 = vpack.c.bf16 %v9160_v16, %v9159_v35  ;;  %v9161_v28 = vand.u32 4294901760, %v9085_v6  ;;  %v9167_v10 = vld [vmem:[#allocation31_spill] sm:$0xff]  ;;  %v9171_v6 = vand.u32 4294901760, %v9170_v13  ;;  %v9174_v35 = vld [vmem:[#allocation36_spill] sm:$0xff]  ;;  %v9176_v16 = vld [vmem:[#allocation37_spill] sm:$0xff] }
 0x470   : > { %4642 = vmatpush1.bf16.msra.mxu0 %v9145_v53  ;;  %v9154_v53 = vand.u32 4294901760, %v8968_v7  ;;  %v9162_v7 = vand.u32 4294901760, %v8974_v60 }
 0x471   : > { %5026 = vmatpush1.bf16.msra.mxu1 %v9146_v48  ;;  %4644 = vmatprep.subr.bf16.mxu0 %v9147_v58  ;;  %v9155_v48 = vand.u32 4294901760, %v8969_v17  ;;  %v9156_v58 = vld [vmem:[#allocation193_spill] sm:$0xff]  ;;  %v9163_v17 = vand.u32 4294901760, %v8975_v47  ;;  %v5037_v60 = vpack.c.bf16 %v9173_v29, %v9171_v6  ;;  %v9175_v47 = vand.u32 4294901760, %v9174_v35  ;;  %v9189_v35 = vld [vmem:[#allocation46_spill] sm:$0xff] }
 0x472   : > { %5028 = vmatprep.subr.bf16.mxu1 %v9150_v40  ;;  %v9188_v29 = vand.u32 4294901760, %v9187_v24  ;;  %v9203_v24 = vld [vmem:[#allocation57_spill] sm:$0xff] }
 0x473   : > { %v4649_v33 = vpack.c.bf16 %v9155_v48, %v9154_v53  ;;  %v5035_v48 = vpack.c.bf16 %v9163_v17, %v9162_v7  ;;  %v9169_v53 = vld [vmem:[#allocation233_spill] sm:$0xff]  ;;  %v9178_v7 = vld [vmem:[#allocation234_spill] sm:$0xff] }
 0x474   : > { %4646 = vmatpush1.bf16.msra.mxu0 %v9153_v51 }
 0x475   : > { %5030 = vmatpush1.bf16.msra.mxu1 %v9156_v58  ;;  %4648 = vmatprep.subr.bf16.mxu0 %v4647_v12  ;;  %v9164_v12 = vand.u32 4294901760, %v9086_v63 }
 0x476   : > { %5032 = vmatprep.subr.bf16.mxu1 %v5031_v9  ;;  %v9168_v9 = vand.u32 4294901760, %v9167_v10 }
 0x477   : > { %2363 = vmatmul.mubr.f32.vlgmr.msra.gmra.mrb[2].mxu0 %v9161_v28  ;;  %v9177_v28 = vand.u32 4294901760, %v9176_v16 }
 0x478   : > { %3647 = vmatmul.mubr.f32.vlgmr.msra.gmra.mrb[4].mxu1 %v9164_v12  ;;  %4650 = vmatpush1.bf16.msra.mxu0 %v4649_v33  ;;  %v4653_v20 = vpack.c.bf16 %v9168_v9, %v9166_v3  ;;  %v9179_v33 = vld [vmem:[#allocation39_spill] sm:$0xff]  ;;  %v9181_v12 = vld [vmem:[#allocation40_spill] sm:$0xff] }
 0x479   : > { %2626 = vmatprep.mubr.f32.mxu0 %v9169_v53  ;;  %5034 = vmatpush1.bf16.msra.mxu1 %v5033_v43  ;;  %v4655_v63 = vpack.c.bf16 %v9177_v28, %v9175_v47  ;;  %v9180_v17 = vand.u32 4294901760, %v9179_v33  ;;  %v9182_v39 = vand.u32 4294901760, %v9181_v12  ;;  %v9183_v43 = vld [vmem:[#allocation42_spill] sm:$0xff]  ;;  %v9185_v9 = vld [vmem:[#allocation43_spill] sm:$0xff]  ;;  %v9190_v47 = vand.u32 4294901760, %v9189_v35  ;;  %v9193_v33 = vld [vmem:[#allocation49_spill] sm:$0xff] }
 0x47a   : > { %3910 = vmatprep.mubr.f32.mxu1 %v9178_v7  ;;  %4652 = vmatprep.subr.bf16.mxu0 %v4651_v49  ;;  %v9184_v10 = vand.u32 4294901760, %v9183_v43  ;;  %v9186_v13 = vand.u32 4294901760, %v9185_v9  ;;  %v9191_v49 = vld [vmem:[#allocation48_spill] sm:$0xff]  ;;  %v9194_v58 = vand.u32 4294901760, %v9193_v33  ;;  %v9205_v35 = vld [vmem:[#allocation58_spill] sm:$0xff] }
 0x47b   : > { %v5039_v3 = vpack.c.bf16 %v9182_v39, %v9180_v17  ;;  %5036 = vmatprep.subr.bf16.mxu1 %v5035_v48  ;;  %v5041_v16 = vpack.c.bf16 %v9190_v47, %v9188_v29  ;;  %v9192_v28 = vand.u32 4294901760, %v9191_v49  ;;  %v9195_v48 = vld [vmem:[#allocation51_spill] sm:$0xff]  ;;  %v9197_v17 = vld [vmem:[#allocation52_spill] sm:$0xff]  ;;  %v9204_v29 = vand.u32 4294901760, %v9203_v24  ;;  %v9219_v24 = vld [vmem:[#allocation69_spill] sm:$0xff] }
 0x47c   : > { %4654 = vmatpush1.bf16.msra.mxu0 %v4653_v20  ;;  %v4657_v6 = vpack.c.bf16 %v9186_v13, %v9184_v10  ;;  %v9196_v20 = vand.u32 4294901760, %v9195_v48  ;;  %v9198_v39 = vand.u32 4294901760, %v9197_v17  ;;  %v9199_v10 = vld [vmem:[#allocation53_spill] sm:$0xff]  ;;  %v9206_v47 = vand.u32 4294901760, %v9205_v35  ;;  %v9213_v17 = vld [vmem:[#allocation64_spill] sm:$0xff]  ;;  %v9221_v35 = vld [vmem:[#allocation70_spill] sm:$0xff] }
 0x47d   : > { %5038 = vmatpush1.bf16.msra.mxu1 %v5037_v60  ;;  %4656 = vmatprep.subr.bf16.mxu0 %v4655_v63  ;;  %v4659_v12 = vpack.c.bf16 %v9194_v58, %v9192_v28  ;;  %v9200_v60 = vand.u32 4294901760, %v9199_v10  ;;  %v9201_v63 = vld [vmem:[#allocation55_spill] sm:$0xff]  ;;  %v9207_v58 = vld [vmem:[#allocation60_spill] sm:$0xff]  ;;  %v9209_v28 = vld [vmem:[#allocation61_spill] sm:$0xff] }
 0x47e   : > { %5040 = vmatprep.subr.bf16.mxu1 %v5039_v3  ;;  %v5043_v43 = vpack.c.bf16 %v9198_v39, %v9196_v20  ;;  %v9202_v9 = vand.u32 4294901760, %v9201_v63  ;;  %v5045_v49 = vpack.c.bf16 %v9206_v47, %v9204_v29  ;;  %v9208_v3 = vand.u32 4294901760, %v9207_v58  ;;  %v9211_v20 = vld [vmem:[#allocation62_spill] sm:$0xff] }
 0x47f   : > { %v9210_v33 = vand.u32 4294901760, %v9209_v28  ;;  %v9214_v39 = vand.u32 4294901760, %v9213_v17  ;;  %v9220_v29 = vand.u32 4294901760, %v9219_v24  ;;  %v9222_v47 = vand.u32 4294901760, %v9221_v35  ;;  %v9225_v28 = vld [vmem:[#allocation73_spill] sm:$0xff]  ;;  %v9229_v17 = vld [vmem:[#allocation76_spill] sm:$0xff] }
 0x480   : > { %4658 = vmatpush1.bf16.msra.mxu0 %v4657_v6  ;;  %v4661_v13 = vpack.c.bf16 %v9202_v9, %v9200_v60  ;;  %v9212_v6 = vand.u32 4294901760, %v9211_v20  ;;  %v9215_v60 = vld [vmem:[#allocation66_spill] sm:$0xff]  ;;  %v9235_v24 = vld [vmem:[#allocation81_spill] sm:$0xff] }
 0x481   : > { %5042 = vmatpush1.bf16.msra.mxu1 %v5041_v16  ;;  %4660 = vmatprep.subr.bf16.mxu0 %v4659_v12  ;;  %v4663_v48 = vpack.c.bf16 %v9210_v33, %v9208_v3  ;;  %v9216_v16 = vand.u32 4294901760, %v9215_v60  ;;  %v9217_v12 = vld [vmem:[#allocation67_spill] sm:$0xff]  ;;  %v5049_v58 = vpack.c.bf16 %v9222_v47, %v9220_v29  ;;  %v9223_v3 = vld [vmem:[#allocation72_spill] sm:$0xff]  ;;  %v9226_v33 = vand.u32 4294901760, %v9225_v28  ;;  %v9237_v35 = vld [vmem:[#allocation82_spill] sm:$0xff] }
 0x482   : > { %5044 = vmatprep.subr.bf16.mxu1 %v5043_v43  ;;  %v5047_v10 = vpack.c.bf16 %v9214_v39, %v9212_v6  ;;  %v9218_v63 = vand.u32 4294901760, %v9217_v12  ;;  %v9224_v43 = vand.u32 4294901760, %v9223_v3  ;;  %v9227_v6 = vld [vmem:[#allocation74_spill] sm:$0xff]  ;;  %v9230_v39 = vand.u32 4294901760, %v9229_v17  ;;  %v9241_v28 = vld [vmem:[#allocation85_spill] sm:$0xff]  ;;  %v9245_v17 = vld [vmem:[#allocation88_spill] sm:$0xff] }
 0x483   : > { %v9236_v29 = vand.u32 4294901760, %v9235_v24  ;;  %v9238_v47 = vand.u32 4294901760, %v9237_v35  ;;  %v9251_v24 = vld [vmem:[#allocation93_spill] sm:$0xff]  ;;  %v9253_v35 = vld [vmem:[#allocation94_spill] sm:$0xff] }
 0x484   : > { %4662 = vmatpush1.bf16.msra.mxu0 %v4661_v13  ;;  %v4665_v9 = vpack.c.bf16 %v9218_v63, %v9216_v16  ;;  %v4667_v20 = vpack.c.bf16 %v9226_v33, %v9224_v43  ;;  %v9228_v13 = vand.u32 4294901760, %v9227_v6  ;;  %v9231_v16 = vld [vmem:[#allocation78_spill] sm:$0xff]  ;;  %v9239_v43 = vld [vmem:[#allocation84_spill] sm:$0xff]  ;;  %v9242_v33 = vand.u32 4294901760, %v9241_v28 }
 0x485   : > { %5046 = vmatpush1.bf16.msra.mxu1 %v5045_v49  ;;  %4664 = vmatprep.subr.bf16.mxu0 %v4663_v48  ;;  %v9232_v49 = vand.u32 4294901760, %v9231_v16  ;;  %v9233_v48 = vld [vmem:[#allocation79_spill] sm:$0xff]  ;;  %v5053_v3 = vpack.c.bf16 %v9238_v47, %v9236_v29  ;;  %v9252_v29 = vand.u32 4294901760, %v9251_v24  ;;  %v9254_v47 = vand.u32 4294901760, %v9253_v35  ;;  %v9257_v28 = vld [vmem:[#allocation100_spill] sm:$0xff]  ;;  %v9267_v24 = vld [vmem:[#allocation105_spill] sm:$0xff] }
 0x486   : > { %5048 = vmatprep.subr.bf16.mxu1 %v5047_v10  ;;  %v5051_v60 = vpack.c.bf16 %v9230_v39, %v9228_v13  ;;  %v9234_v12 = vand.u32 4294901760, %v9233_v48  ;;  %v9240_v10 = vand.u32 4294901760, %v9239_v43  ;;  %v9243_v13 = vld [vmem:[#allocation86_spill] sm:$0xff]  ;;  %v9246_v39 = vand.u32 4294901760, %v9245_v17 }
 0x487   : > { %v5057_v43 = vpack.c.bf16 %v9254_v47, %v9252_v29  ;;  %v9261_v17 = vld [vmem:[#allocation102_spill] sm:$0xff]  ;;  %v9268_v29 = vand.u32 4294901760, %v9267_v24  ;;  %v9284_v24 = vld [vmem:[#allocation141_spill] sm:$0xff] }
 0x488   : > { %4666 = vmatpush1.bf16.msra.mxu0 %v4665_v9  ;;  %v4669_v63 = vpack.c.bf16 %v9234_v12, %v9232_v49  ;;  %v4671_v6 = vpack.c.bf16 %v9242_v33, %v9240_v10  ;;  %v9244_v9 = vand.u32 4294901760, %v9243_v13  ;;  %v9247_v49 = vld [vmem:[#allocation90_spill] sm:$0xff]  ;;  %v9255_v10 = vld [vmem:[#allocation99_spill] sm:$0xff]  ;;  %v9258_v33 = vand.u32 4294901760, %v9257_v28 }
 0x489   : > { %5050 = vmatpush1.bf16.msra.mxu1 %v5049_v58  ;;  %4668 = vmatprep.subr.bf16.mxu0 %v4667_v20  ;;  %v9248_v58 = vand.u32 4294901760, %v9247_v49  ;;  %v9249_v20 = vld [vmem:[#allocation91_spill] sm:$0xff]  ;;  %v9269_v35 = vld [vmem:[#allocation106_spill] sm:$0xff] }
 0x48a   : > { %5052 = vmatprep.subr.bf16.mxu1 %v5051_v60  ;;  %v5055_v16 = vpack.c.bf16 %v9246_v39, %v9244_v9  ;;  %v9250_v48 = vand.u32 4294901760, %v9249_v20  ;;  %v9256_v60 = vand.u32 4294901760, %v9255_v10  ;;  %v9259_v9 = vld [vmem:[#allocation101_spill] sm:$0xff]  ;;  %v9262_v39 = vand.u32 4294901760, %v9261_v17 }
 0x48b   : > { %v9270_v47 = vand.u32 4294901760, %v9269_v35  ;;  %v9287_v35 = vand.u32 4294901760, %v9043_v1  ;;  %v9294_v1 = vand.u32 4294901760, %v8902_v62  ;;  %v9301_v62 = vand.u32 4294901760, %v8921_v32 }
 0x48c   : > { %4670 = vmatpush1.bf16.msra.mxu0 %v4669_v63  ;;  %v4673_v12 = vpack.c.bf16 %v9250_v48, %v9248_v58  ;;  %v4675_v13 = vpack.c.bf16 %v9258_v33, %v9256_v60  ;;  %v9260_v63 = vand.u32 4294901760, %v9259_v9  ;;  %v9263_v58 = vld [vmem:[#allocation103_spill] sm:$0xff]  ;;  %v9272_v60 = vld [vmem:[#allocation112_spill] sm:$0xff]  ;;  %v9275_v9 = vld [vmem:[#allocation114_spill] sm:$0xff] }
 0x48d   : > { %5054 = vmatpush1.bf16.msra.mxu1 %v5053_v3  ;;  %4672 = vmatprep.subr.bf16.mxu0 %v4671_v6  ;;  %v9264_v3 = vand.u32 4294901760, %v9263_v58  ;;  %v9265_v6 = vld [vmem:[#allocation104_spill] sm:$0xff]  ;;  %v5061_v10 = vpack.c.bf16 %v9270_v47, %v9268_v29  ;;  %v9273_v28 = vand.u32 4294901760, %v9272_v60 }
 0x48e   : > { %5056 = vmatprep.subr.bf16.mxu1 %v5055_v16  ;;  %v5059_v49 = vpack.c.bf16 %v9262_v39, %v9260_v63  ;;  %v9266_v20 = vand.u32 4294901760, %v9265_v6  ;;  %v9271_v16 = vand.u32 4294901760, %v9032_v19  ;;  %v9276_v63 = vand.u32 4294901760, %v9275_v9  ;;  %v9277_v39 = vld [vmem:[#allocation115_spill] sm:$0xff] }
 0x48f   : > { %v9281_v6 = vand.u32 4294901760, %v9038_v42  ;;  %v9282_v19 = vand.u32 4294901760, %v9039_v34  ;;  %v9290_v34 = vand.u32 4294901760, %v9044_v21  ;;  %v9297_v9 = vand.u32 4294901760, %v8916_v31 }
 0x490   : > { %4674 = vmatpush1.bf16.msra.mxu0 %v4673_v12  ;;  %v4677_v48 = vpack.c.bf16 %v9266_v20, %v9264_v3  ;;  %v4679_v33 = vpack.c.bf16 %v9273_v28, %v9271_v16  ;;  %v9274_v12 = vand.u32 4294901760, %v9034_v25  ;;  %v9285_v25 = vand.u32 4294901760, %v9284_v24 }
 0x491   : > { %5058 = vmatpush1.bf16.msra.mxu1 %v5057_v43  ;;  %4676 = vmatprep.subr.bf16.mxu0 %v4675_v13  ;;  %v9278_v43 = vand.u32 4294901760, %v9277_v39  ;;  %v9279_v13 = vld [vmem:[#allocation116_spill] sm:$0xff]  ;;  %v5065_v20 = vpack.c.bf16 %v9282_v19, %v9281_v6  ;;  %v9289_v16 = vand.u32 4294901760, %v8892_v38  ;;  %v9292_v28 = vand.u32 4294901760, %v9046_v61 }
 0x492   : > { %5060 = vmatprep.subr.bf16.mxu1 %v5059_v49  ;;  %v5063_v17 = vpack.c.bf16 %v9276_v63, %v9274_v12  ;;  %v9280_v58 = vand.u32 4294901760, %v9279_v13  ;;  %v9283_v49 = vand.u32 4294901760, %v9040_v15  ;;  %v9291_v15 = vand.u32 4294901760, %v9045_v36 }
 0x493   : > { %v9296_v38 = vand.u32 4294901760, %v8914_v27  ;;  %v9298_v36 = vand.u32 4294901760, %v8917_v46  ;;  %v9299_v61 = vand.u32 4294901760, %v8918_v0  ;;  %v9300_v63 = vand.u32 4294901760, %v8920_v57 }
 0x494   : > { %4678 = vmatpush1.bf16.msra.mxu0 %v4677_v48  ;;  %v4681_v3 = vpack.c.bf16 %v9280_v58, %v9278_v43  ;;  %v4683_v29 = vpack.c.bf16 %v9285_v25, %v9283_v49  ;;  %v9286_v48 = vand.u32 4294901760, %v9042_v5  ;;  %v5069_v60 = vpack.c.bf16 %v9291_v15, %v9290_v34  ;;  %v9328_v15 = vld [vmem:[#allocation169_spill] sm:$0xff] }
 0x495   : > { %5062 = vmatpush1.bf16.msra.mxu1 %v5061_v10  ;;  %4680 = vmatprep.subr.bf16.mxu0 %v4679_v33  ;;  %v9288_v10 = vand.u32 4294901760, %v8891_v55  ;;  %v9293_v5 = vand.u32 4294901760, %v9047_v14  ;;  %v9295_v55 = vand.u32 4294901760, %v8903_v18  ;;  %v4689_v21 = vpack.c.bf16 %v9297_v9, %v9296_v38 }
 0x496   : > { %5064 = vmatprep.subr.bf16.mxu1 %v5063_v17  ;;  %v5067_v47 = vpack.c.bf16 %v9287_v35, %v9286_v48  ;;  %v5073_v14 = vpack.c.bf16 %v9299_v61, %v9298_v36  ;;  %v4691_v17 = vpack.c.bf16 %v9301_v62, %v9300_v63  ;;  %v9302_v18 = vand.u32 4294901760, %v8922_v8  ;;  %v9322_v48 = vld [vmem:[#allocation166_spill] sm:$0xff]  ;;  %v9340_v61 = vld [vmem:[#allocation177_spill] sm:$0xff] }
 0x497   : > { %v4685_v42 = vpack.c.bf16 %v9289_v16, %v9288_v10  ;;  %v4687_v33 = vpack.c.bf16 %v9293_v5, %v9292_v28  ;;  %v5071_v12 = vpack.c.bf16 %v9295_v55, %v9294_v1  ;;  %v9303_v27 = vand.u32 4294901760, %v8923_v30  ;;  %v9330_v28 = vld [vmem:[#allocation170_spill] sm:$0xff]  ;;  %v9334_v1 = vld [vmem:[#allocation173_spill] sm:$0xff] }
 0x498   : > { %4682 = vmatpush1.bf16.msra.mxu0 %v4681_v3  ;;  %v9304_v31 = vand.u32 4294901760, %v8940_v23  ;;  %v9305_v43 = vand.u32 4294901760, %v8941_v44  ;;  %v9306_v0 = vand.u32 4294901760, %v6346_v4  ;;  %v9307_v57 = vand.u32 4294901760, %v6351_v50  ;;  %v9311_v3 = vld [vmem:[#allocation162_spill] sm:$0xff]  ;;  %v9313_v44 = vld [vmem:[#allocation163_spill] sm:$0xff] }
 0x499   : > { %5066 = vmatpush1.bf16.msra.mxu1 %v5065_v20  ;;  %4684 = vmatprep.subr.bf16.mxu0 %v4683_v29  ;;  %v5075_v39 = vpack.c.bf16 %v9303_v27, %v9302_v18  ;;  %v9308_v13 = vand.u32 4294901760, %v6357_v45  ;;  %v9309_v8 = vand.u32 4294901760, %v6362_v11  ;;  %v9310_v30 = vand.u32 4294901760, %v6367_v59  ;;  %v9315_v20 = vld [vmem:[#allocation164_spill] sm:$0xff]  ;;  %v9318_v45 = vld [vmem:[#allocation165_spill] sm:$0xff] }
 0x49a   : > { %5068 = vmatprep.subr.bf16.mxu1 %v5067_v47  ;;  %v4693_v46 = vpack.c.bf16 %v9305_v43, %v9304_v31  ;;  %v5077_v32 = vpack.c.bf16 %v9307_v57, %v9306_v0  ;;  %v9312_v23 = vand.u32 4294901760, %v9311_v3  ;;  %v9314_v19 = vand.u32 4294901760, %v9313_v44  ;;  %v9324_v47 = vld [vmem:[#allocation167_spill] sm:$0xff]  ;;  %v9349_v57 = vld [vmem:[#allocation186_spill] sm:$0xff] }
 0x49b   : > { %v4695_v58 = vpack.c.bf16 %v9309_v8, %v9308_v13  ;;  %v9316_v49 = vand.u32 4294901760, %v9315_v20  ;;  %v9317_v50 = vand.u32 4294901760, %v6388_v56  ;;  %v9319_v24 = vand.u32 4294901760, %v9318_v45  ;;  %v9346_v31 = vld [vmem:[#allocation183_spill] sm:$0xff]  ;;  %v9357_v44 = vld [vmem:[#allocation194_spill] sm:$0xff]  ;;  %v9365_v45 = vld [vmem:[#allocation17_spill] sm:$0xff] }
 0x49c   : > { %4686 = vmatpush1.bf16.msra.mxu0 %v4685_v42  ;;  %v5079_v6 = vpack.c.bf16 %v9312_v23, %v9310_v30  ;;  %v9320_v25 = vand.u32 4294901760, %v6398_v41  ;;  %v9321_v59 = vand.u32 4294901760, %v6403_v22  ;;  %v9323_v35 = vand.u32 4294901760, %v9322_v48  ;;  %v9326_v42 = vld [vmem:[#allocation168_spill] sm:$0xff]  ;;  %v9332_v41 = vld [vmem:[#allocation171_spill] sm:$0xff] }
 0x49d   : > { %5070 = vmatpush1.bf16.msra.mxu1 %v5069_v60  ;;  %4688 = vmatprep.subr.bf16.mxu0 %v4687_v33  ;;  %v4697_v4 = vpack.c.bf16 %v9316_v49, %v9314_v19  ;;  %v5081_v11 = vpack.c.bf16 %v9319_v24, %v9317_v50  ;;  %v9325_v10 = vand.u32 4294901760, %v9324_v47  ;;  %v9327_v34 = vand.u32 4294901760, %v9326_v42  ;;  %v9355_v23 = vld [vmem:[#allocation192_spill] sm:$0xff]  ;;  %v9363_v50 = vld [vmem:[#allocation231_spill] sm:$0xff]  ;;  %v9373_v47 = vld [vmem:[#allocation41_spill] sm:$0xff] }
 0x49e   : > { %5072 = vmatprep.subr.bf16.mxu1 %v5071_v12  ;;  %v4699_v29 = vpack.c.bf16 %v9321_v59, %v9320_v25  ;;  %v9329_v60 = vand.u32 4294901760, %v9328_v15  ;;  %v9331_v5 = vand.u32 4294901760, %v9330_v28  ;;  %v9333_v33 = vand.u32 4294901760, %v9332_v41  ;;  %v9336_v12 = vld [vmem:[#allocation174_spill] sm:$0xff]  ;;  %v9366_v24 = vld [vmem:[#allocation20_spill] sm:$0xff]  ;;  %v9371_v48 = vld [vmem:[#allocation35_spill] sm:$0xff] }
 0x49f   : > { %v5083_v16 = vpack.c.bf16 %v9325_v10, %v9323_v35  ;;  %v9335_v55 = vand.u32 4294901760, %v9334_v1  ;;  %v9337_v38 = vand.u32 4294901760, %v9336_v12  ;;  %v9342_v62 = vand.u32 4294901760, %v9066_v37  ;;  %v9368_v25 = vld [vmem:[#allocation26_spill] sm:$0xff]  ;;  %v9374_v10 = vld [vmem:[#allocation44_spill] sm:$0xff]  ;;  %v9380_v15 = vld [vmem:[#allocation63_spill] sm:$0xff] }
 0x4a0   : > { %4690 = vmatpush1.bf16.msra.mxu0 %v4689_v21  ;;  %v4701_v56 = vpack.c.bf16 %v9329_v60, %v9327_v34  ;;  %v5085_v22 = vpack.c.bf16 %v9333_v33, %v9331_v5  ;;  %v9338_v21 = vld [vmem:[#allocation175_spill] sm:$0xff]  ;;  %v9347_v43 = vand.u32 4294901760, %v9346_v31  ;;  %v9348_v0 = vand.u32 4294901760, %v9072_v2  ;;  %v9369_v59 = vld [vmem:[#allocation30_spill] sm:$0xff]  ;;  %v9378_v42 = vld [vmem:[#allocation56_spill] sm:$0xff] }
 0x4a1   : > { %5074 = vmatpush1.bf16.msra.mxu1 %v5073_v14  ;;  %4692 = vmatprep.subr.bf16.mxu0 %v4691_v17  ;;  %v4703_v9 = vpack.c.bf16 %v9337_v38, %v9335_v55  ;;  %v9339_v36 = vand.u32 4294901760, %v9338_v21  ;;  %v9341_v14 = vand.u32 4294901760, %v9340_v61  ;;  %v9343_v17 = vld [vmem:[#allocation180_spill] sm:$0xff]  ;;  %v9351_v8 = vand.u32 4294901760, %v9075_v52  ;;  %v9359_v2 = vld [vmem:[#allocation195_spill] sm:$0xff]  ;;  %v9372_v35 = vld [vmem:[#allocation38_spill] sm:$0xff] }
 0x4a2   : > { %5076 = vmatprep.subr.bf16.mxu1 %v5075_v39  ;;  %v9344_v18 = vand.u32 4294901760, %v9343_v17  ;;  %v9345_v39 = vand.u32 4294901760, %v9069_v26  ;;  %v9354_v3 = vand.u32 4294901760, %v9078_v54  ;;  %v9358_v19 = vand.u32 4294901760, %v9357_v44  ;;  %v9361_v52 = vld [vmem:[#allocation11_spill] sm:$0xff]  ;;  %v9364_v54 = vld [vmem:[#allocation232_spill] sm:$0xff] }
 0x4a3   : > { %v5087_v63 = vpack.c.bf16 %v9341_v14, %v9339_v36  ;;  %v9360_v20 = vand.u32 4294901760, %v9359_v2  ;;  %v9379_v34 = vld [vmem:[#allocation59_spill] sm:$0xff]  ;;  %v9381_v60 = vld [vmem:[#allocation65_spill] sm:$0xff]  ;;  %v9386_v33 = vld [vmem:[#allocation80_spill] sm:$0xff] }
 0x4a4   : > { %4694 = vmatpush1.bf16.msra.mxu0 %v4693_v46  ;;  %v4705_v27 = vpack.c.bf16 %v9344_v18, %v9342_v62  ;;  %v5089_v46 = vpack.c.bf16 %v9347_v43, %v9345_v39  ;;  %v9383_v28 = vld [vmem:[#allocation71_spill] sm:$0xff]  ;;  %v9385_v41 = vld [vmem:[#allocation77_spill] sm:$0xff]  ;;  %v9390_v12 = vld [vmem:[#allocation92_spill] sm:$0xff] }
 0x4a5   : > { %5078 = vmatpush1.bf16.msra.mxu1 %v5077_v32  ;;  %4696 = vmatprep.subr.bf16.mxu0 %v4695_v58  ;;  %v9350_v32 = vand.u32 4294901760, %v9349_v57  ;;  %v9352_v58 = vld [vmem:[#allocation189_spill] sm:$0xff]  ;;  %v5093_v49 = vpack.c.bf16 %v9360_v20, %v9358_v19  ;;  %v9384_v5 = vld [vmem:[#allocation75_spill] sm:$0xff]  ;;  %v9394_v36 = vld [vmem:[#allocation98_spill] sm:$0xff] }
 0x4a6   : > { %5080 = vmatprep.subr.bf16.mxu1 %v5079_v6  ;;  %v9353_v37 = vand.u32 4294901760, %v9352_v58  ;;  %v9356_v6 = vand.u32 4294901760, %v9355_v23  ;;  %v9388_v1 = vld [vmem:[#allocation87_spill] sm:$0xff]  ;;  %v9389_v55 = vld [vmem:[#allocation89_spill] sm:$0xff]  ;;  %v9395_v61 = vld [vmem:[#allocation108_spill] sm:$0xff] }
 0x4a7   : > { %v4707_v13 = vpack.c.bf16 %v9350_v32, %v9348_v0  ;;  %v9391_v38 = vld [vmem:[#allocation95_spill] sm:$0xff]  ;;  %v9393_v21 = vld [vmem:[#allocation97_spill] sm:$0xff]  ;;  %v9399_v17 = vld [vmem:[#allocation120_spill] sm:$0xff] }
 0x4a8   : > { %4698 = vmatpush1.bf16.msra.mxu0 %v4697_v4  ;;  %v5091_v30 = vpack.c.bf16 %v9353_v37, %v9351_v8  ;;  %v4709_v26 = vpack.c.bf16 %v9356_v6, %v9354_v3  ;;  %v9362_v4 = vld [vmem:[#allocation15_spill] sm:$0xff]  ;;  %v9396_v14 = vld [vmem:[#allocation109_spill] sm:$0xff]  ;;  %v9403_v31 = vld [vmem:[#allocation124_spill] sm:$0xff] }
 0x4a9   : > { %5082 = vmatpush1.bf16.msra.mxu1 %v5081_v11  ;;  %4700 = vmatprep.subr.bf16.mxu0 %v4699_v29  ;;  %v9367_v11 = vld [vmem:[#allocation24_spill] sm:$0xff]  ;;  %v9370_v29 = vld [vmem:[#allocation33_spill] sm:$0xff]  ;;  %v9402_v39 = vld [vmem:[#allocation123_spill] sm:$0xff] }
 0x4aa   : > { %5084 = vmatprep.subr.bf16.mxu1 %v5083_v16  ;;  %v9376_v16 = vld [vmem:[#allocation50_spill] sm:$0xff]  ;;  %v9398_v62 = vld [vmem:[#allocation117_spill] sm:$0xff]  ;;  %v9406_v0 = vld [vmem:[#allocation127_spill] sm:$0xff] }
 0x4ab   : > { %v9400_v18 = vld [vmem:[#allocation121_spill] sm:$0xff]  ;;  %v9407_v57 = vld [vmem:[#allocation128_spill] sm:$0xff]  ;;  %v9410_v8 = vld [vmem:[#allocation131_spill] sm:$0xff] }
 0x4ac   : > { %4702 = vmatpush1.bf16.msra.mxu0 %v4701_v56  ;;  %v9382_v56 = vld [vmem:[#allocation68_spill] sm:$0xff]  ;;  %v9404_v43 = vld [vmem:[#allocation125_spill] sm:$0xff]  ;;  %v9414_v3 = vld [vmem:[#allocation135_spill] sm:$0xff] }
 0x4ad   : > { %5086 = vmatpush1.bf16.msra.mxu1 %v5085_v22  ;;  %4704 = vmatprep.subr.bf16.mxu0 %v4703_v9  ;;  %v9387_v22 = vld [vmem:[#allocation83_spill] sm:$0xff]  ;;  %v9392_v9 = vld [vmem:[#allocation96_spill] sm:$0xff]  ;;  %v9408_v32 = vld [vmem:[#allocation129_spill] sm:$0xff] }
 0x4ae   : > { %5088 = vmatprep.subr.bf16.mxu1 %v5087_v63  ;;  %v9397_v63 = vld [vmem:[#allocation110_spill] sm:$0xff]  ;;  %v9411_v58 = vld [vmem:[#allocation132_spill] sm:$0xff]  ;;  %v9412_v37 = vld [vmem:[#allocation133_spill] sm:$0xff] }
 0x4af   : > { %v9415_v23 = vld [vmem:[#allocation136_spill] sm:$0xff]  ;;  %v9416_v6 = vld [vmem:[#allocation137_spill] sm:$0xff]  ;;  %v9418_v44 = vld [vmem:[#allocation139_spill] sm:$0xff] }
 0x4b0   : > { %4706 = vmatpush1.bf16.msra.mxu0 %v4705_v27  ;;  %v9401_v27 = vld [vmem:[#allocation122_spill] sm:$0xff]  ;;  %v9419_v19 = vld [vmem:[#allocation172_spill] sm:$0xff] }
 0x4b1   : > { %5090 = vmatpush1.bf16.msra.mxu1 %v5089_v46  ;;  %4708 = vmatprep.subr.bf16.mxu0 %v4707_v13  ;;  %v9405_v46 = vld [vmem:[#allocation126_spill] sm:$0xff]  ;;  %v9420_v2 = vld [vmem:[#allocation176_spill] sm:$0xff] }
 0x4b2   : > { %5092 = vmatprep.subr.bf16.mxu1 %v5091_v30  ;;  %v9409_v13 = vld [vmem:[#allocation130_spill] sm:$0xff] }
 0x4b3   : > { %v9413_v30 = vld [vmem:[#allocation134_spill] sm:$0xff] }
 0x4b4   : > { %4710 = vmatpush1.bf16.msra.mxu0 %v4709_v26  ;;  %v9417_v26 = vld [vmem:[#allocation138_spill] sm:$0xff] }
 0x4b5   : > { %5094 = vmatpush1.bf16.msra.mxu1 %v5093_v49  ;;  %4712 = vmatprep.subr.bf16.mxu0 %v9361_v52  ;;  %v9421_v20 = vld [vmem:[#allocation178_spill] sm:$0xff]  ;;  %v9422_v49 = vld [vmem:[#allocation181_spill] sm:$0xff]  ;;  %v9423_v52 = vld [vmem:[#allocation184_spill] sm:$0xff] }
 0x4b6   : > { %5096 = vmatprep.subr.bf16.mxu1 %v9362_v4  ;;  %v9424_v4 = vld [vmem:[#allocation193_spill] sm:$0xff] }
 0x4b7   : > { %2628 = vmatmul.mubr.f32.vlgmr.msra.gmra.mrb[2].mxu0 %v9363_v50 }
 0x4b8   : > { %3912 = vmatmul.mubr.f32.vlgmr.msra.gmra.mrb[4].mxu1 %v9364_v54  ;;  %4714 = vmatpush1.bf16.msra.mxu0 %v9365_v45 }
 0x4b9   : > { %2763 = vmatprep.mubr.f32.mxu0 %v9169_v53  ;;  %5098 = vmatpush1.bf16.msra.mxu1 %v9366_v24  ;;  %v9375_v53 = vld [vmem:[#allocation47_spill] sm:$0xff] }
 0x4ba   : > { %4047 = vmatprep.mubr.f32.mxu1 %v9178_v7  ;;  %4716 = vmatprep.subr.bf16.mxu0 %v9367_v11  ;;  %v9377_v7 = vld [vmem:[#allocation54_spill] sm:$0xff] }
 0x4bb   : > { %5100 = vmatprep.subr.bf16.mxu1 %v9368_v25 }
 0x4bc   : > { %4718 = vmatpush1.bf16.msra.mxu0 %v9369_v59 }
 0x4bd   : > { %5102 = vmatpush1.bf16.msra.mxu1 %v9370_v29  ;;  %4720 = vmatprep.subr.bf16.mxu0 %v9371_v48 }
 0x4be   : > { %5104 = vmatprep.subr.bf16.mxu1 %v9372_v35 }
 0x4c0   : > { %4722 = vmatpush1.bf16.msra.mxu0 %v9373_v47 }
 0x4c1   : > { %5106 = vmatpush1.bf16.msra.mxu1 %v9374_v10  ;;  %4724 = vmatprep.subr.bf16.mxu0 %v9375_v53 }
 0x4c2   : > { %5108 = vmatprep.subr.bf16.mxu1 %v9376_v16  ;;  %v9426_v16 = vld [vmem:[#allocation217_spill] sm:$0xff] }
 0x4c4   : > { %4726 = vmatpush1.bf16.msra.mxu0 %v9377_v7  ;;  %v4070_v7 = vmul.f32 %v9426_v16, %v9426_v16 }
 0x4c5   : > { %5110 = vmatpush1.bf16.msra.mxu1 %v9378_v42  ;;  %4728 = vmatprep.subr.bf16.mxu0 %v9379_v34  ;;  %v9427_v34 = vld [vmem:[#allocation218_spill] sm:$0xff] }
 0x4c6   : > { %5112 = vmatprep.subr.bf16.mxu1 %v9380_v15  ;;  %v4067_v15 = vmul.f32 %v9427_v34, %v9427_v34 }
 0x4c8   : > { %4730 = vmatpush1.bf16.msra.mxu0 %v9381_v60  ;;  %v9428_v60 = vld [vmem:[#allocation220_spill] sm:$0xff] }
 0x4c9   : > { %5114 = vmatpush1.bf16.msra.mxu1 %v9382_v56  ;;  %4732 = vmatprep.subr.bf16.mxu0 %v9383_v28  ;;  %v4071_v56 = vmul.f32 %v9428_v60, %v9428_v60  ;;  %v9429_v28 = vld [vmem:[#allocation224_spill] sm:$0xff] }
 0x4ca   : > { %5116 = vmatprep.subr.bf16.mxu1 %v9384_v5  ;;  %v4073_v5 = vmul.f32 %v9429_v28, %v9429_v28 }
 0x4cc   : > { %4734 = vmatpush1.bf16.msra.mxu0 %v9385_v41  ;;  %v9430_v41 = vld [vmem:[#allocation107_spill] sm:$0xff] }
 0x4cd   : > { %5118 = vmatpush1.bf16.msra.mxu1 %v9386_v33  ;;  %4736 = vmatprep.subr.bf16.mxu0 %v9387_v22  ;;  %v9431_v22 = vld [vmem:[#allocation219_spill] sm:$0xff] }
 0x4ce   : > { %5120 = vmatprep.subr.bf16.mxu1 %v9388_v1  ;;  %v4068_v1 = vmul.f32 %v9431_v22, %v9431_v22 }
 0x4d0   : > { %4738 = vmatpush1.bf16.msra.mxu0 %v9389_v55  ;;  %v9432_v55 = vld [vmem:[#allocation221_spill] sm:$0xff] }
 0x4d1   : > { %5122 = vmatpush1.bf16.msra.mxu1 %v9390_v12  ;;  %4740 = vmatprep.subr.bf16.mxu0 %v9391_v38  ;;  %v4072_v12 = vmul.f32 %v9432_v55, %v9432_v55  ;;  %v9433_v38 = vld [vmem:[#allocation225_spill] sm:$0xff] }
 0x4d2   : > { %5124 = vmatprep.subr.bf16.mxu1 %v9392_v9  ;;  %v4074_v9 = vmul.f32 %v9433_v38, %v9433_v38 }
 0x4d4   : > { %4742 = vmatpush1.bf16.msra.mxu0 %v9393_v21 }
 0x4d5   : > { %5126 = vmatpush1.bf16.msra.mxu1 %v9394_v36  ;;  %4744 = vmatprep.subr.bf16.mxu0 %v9395_v61 }
 0x4d6   : > { %5128 = vmatprep.subr.bf16.mxu1 %v9396_v14 }
 0x4d8   : > { %4746 = vmatpush1.bf16.msra.mxu0 %v9397_v63 }
 0x4d9   : > { %5130 = vmatpush1.bf16.msra.mxu1 %v9398_v62  ;;  %4748 = vmatprep.subr.bf16.mxu0 %v9399_v17 }
 0x4da   : > { %5132 = vmatprep.subr.bf16.mxu1 %v9400_v18 }
 0x4dc   : > { %4750 = vmatpush1.bf16.msra.mxu0 %v9401_v27 }
 0x4dd   : > { %5134 = vmatpush1.bf16.msra.mxu1 %v9402_v39  ;;  %4752 = vmatprep.subr.bf16.mxu0 %v9403_v31 }
 0x4de   : > { %5136 = vmatprep.subr.bf16.mxu1 %v9404_v43 }
 0x4e0   : > { %4754 = vmatpush1.bf16.msra.mxu0 %v9405_v46 }
 0x4e1   : > { %5138 = vmatpush1.bf16.msra.mxu1 %v9406_v0  ;;  %4756 = vmatprep.subr.bf16.mxu0 %v9407_v57 }
 0x4e2   : > { %5140 = vmatprep.subr.bf16.mxu1 %v9408_v32 }
 0x4e4   : > { %4758 = vmatpush1.bf16.msra.mxu0 %v9409_v13 }
 0x4e5   : > { %5142 = vmatpush1.bf16.msra.mxu1 %v9410_v8  ;;  %4760 = vmatprep.subr.bf16.mxu0 %v9411_v58 }
 0x4e6   : > { %5144 = vmatprep.subr.bf16.mxu1 %v9412_v37 }
 0x4e8   : > { %4762 = vmatpush1.bf16.msra.mxu0 %v9413_v30 }
 0x4e9   : > { %5146 = vmatpush1.bf16.msra.mxu1 %v9414_v3  ;;  %4764 = vmatprep.subr.bf16.mxu0 %v9415_v23 }
 0x4ea   : > { %5148 = vmatprep.subr.bf16.mxu1 %v9416_v6 }
 0x4ec   : > { %4766 = vmatpush1.bf16.msra.mxu0 %v9417_v26 }
 0x4ed   : > { %5150 = vmatpush1.bf16.msra.mxu1 %v9418_v44  ;;  %4768 = vmatprep.subr.bf16.mxu0 %v9419_v19 }
 0x4ee   : > { %5152 = vmatprep.subr.bf16.mxu1 %v9420_v2 }
 0x4f0   : > { %4770 = vmatpush1.bf16.msra.mxu0 %v9421_v20 }
 0x4f1   : > { %5154 = vmatpush1.bf16.msra.mxu1 %v9422_v49  ;;  %4772 = vmatprep.subr.bf16.mxu0 %v9423_v52 }
 0x4f2   : > { %5156 = vmatprep.subr.bf16.mxu1 %v9150_v40 }
 0x4f4   : > { %4774 = vmatpush1.bf16.msra.mxu0 %v9153_v51 }
 0x4f5   : > { %5158 = vmatpush1.bf16.msra.mxu1 %v9424_v4 }
 0x4f7   : > { %2765 = vmatmul.mubr.f32.vlgmr.msra.gmra.mrb[2].mxu0 %v9363_v50 }
 0x4f8   : > { %4049 = vmatmul.mubr.f32.vlgmr.msra.gmra.mrb[4].mxu1 %v9364_v54  ;;  %v9425_v54 = vld [vmem:[#allocation216_spill] sm:$0xff] }
 0x4f9   : > { %v4069_v53 = vmul.f32 %v9425_v54, %v9425_v54 }
 0x5ca   : > { %v2766_v45 = vpop.f32.mrb[2].mxu0 }
 0x5cb   : > { %v4050_v24 = vpop.f32.mrb[4].mxu1  ;;  %v2768_v11 = vpop.f32.mrb[3].mxu0 }
 0x5cc   : > { %v5160_v25 = vadd.f32 %v4050_v24, %v2766_v45  ;;  %v4052_v59 = vpop.f32.mrb[5].mxu1 }
 0x5cd   : > { %v5161_v29 = vadd.f32 %v4052_v59, %v2768_v11 }
 0x5ce   : > { %v4208_v48 = vmul.f32 -1.442695, %v5160_v25 }
 0x5cf   : > { %v4209_v35 = vmul.f32 -1.442695, %v5161_v29 }
 0x5d0   : > { %5268 = vpow2.f32 %v4208_v48 }
 0x5d1   : > { %5270 = vpow2.f32 %v4209_v35 }
 0x5da   : > { %v5269_v40 = vpop.eup %5268 }
 0x5db   : > { %v5271_v51 = vpop.eup %5270  ;;  %v4061_v47 = vadd.f32 1.0, %v5269_v40 }
 0x5dc   : > { %v4062_v10 = vadd.f32 1.0, %v5271_v51 }
 0x5dd   : > { %5272 = vrcp.f32 %v4061_v47 }
 0x5de   : > { %5274 = vrcp.f32 %v4062_v10 }
 0x5e7   : > { %v5273_v50 = vpop.eup %5272 }
 0x5e8   : > { %v5275_v42 = vpop.eup %5274  ;;  %v4078_v33 = vrot.slane %v5273_v50, %v9430_v41 }
 0x5e9   : > { %v4082_v21 = vrot.slane %v5275_v42, %v9430_v41 }
 0x5ea   : > { %v4083_v36 = vmul.f32 %v4078_v33, %v4067_v15  ;;  %v4085_v61 = vmul.f32 %v4078_v33, %v4069_v53  ;;  %v4087_v14 = vmul.f32 %v4078_v33, %v4071_v56  ;;  %v4089_v63 = vmul.f32 %v4078_v33, %v4073_v5 }
 0x5eb   : > { %v4084_v62 = vmul.f32 %v4082_v21, %v4068_v1  ;;  %v4086_v17 = vmul.f32 %v4082_v21, %v4070_v7  ;;  %v4088_v18 = vmul.f32 %v4082_v21, %v4072_v12  ;;  %v4090_v27 = vmul.f32 %v4082_v21, %v4074_v9 }
 0x5ec   : > { %4091 = vst [vmem:[%s230_s25] sm:$0xff] %v4083_v36  ;;  %4093 = vst [vmem:[%s230_s25 + $0x10] sm:$0xff] %v4085_v61 }
 0x5ed   : > { %4095 = vst [vmem:[%s230_s25 + $0x20] sm:$0xff] %v4087_v14  ;;  %4097 = vst [vmem:[%s230_s25 + $0x30] sm:$0xff] %v4089_v63 }
 0x5ee   : > { %4092 = vst [vmem:[%s230_s25 + $0x8] sm:$0xff] %v4084_v62  ;;  %4094 = vst [vmem:[%s230_s25 + $0x18] sm:$0xff] %v4086_v17 }
 0x5ef   : > { %4096 = vst [vmem:[%s230_s25 + $0x28] sm:$0xff] %v4088_v18  ;;  %4098 = vst [vmem:[%s230_s25 + $0x38] sm:$0xff] %v4090_v27 }
 0x5f0   : > { %5355 = shalt.err (!%p5352_p7)
}
 0x5f1   : > { %s5356_s9 = scalar_lea.hbm %s7916_s5, 1024  ;;  %s5360_s6 = scalar_lea.hbm %s7966_s4, 2048 }
 0x5f2   : > { %p5357_p9 = scmp.ne.s32.totalorder %s7916_s5, %s5356_s9  ;;  %p5361_p5 = scmp.lt.u32.totalorder %s7916_s5, %s7966_s4 }
 0x5f3   : > { %p5362_p11 = scmp.lt.u32.totalorder %s5360_s6, %s5356_s9  ;;  %p5364_p4 = scmp.lt.u32.totalorder %s5356_s9, %s7916_s5 }
 0x5f4   : > { %p5358_p1 = pnand %p5357_p9, %p5543_p12 }
 0x5f5   : > { %p5363_p2 = por %p5362_p11, %p5361_p5 }
 0x5f6   : > { %p5359_p0 = pneg %p5358_p1 }
 0x5f7   : > { %p5365_p6 = por %p5364_p4, %p5363_p2 }
 0x5f9   : > { %p5366_p8 = pnand %p5365_p6, %p5359_p0 }
 0x5fb   : > { %5369 = shalt.err (!%p5366_p8)
}
 0x5fc   : > { %s5422_s8 = smov 256   ;;  %s5423_s25 = smov 16  }
 0x5fd   : > { %5206 = dma.vmem_to_hbm [thread:$0]  (%p5543_p12), %s7918_s14, 1024, %s7916_s5, %s4100_s29, %s5422_s8, %s5422_s8, %s5423_s25  }
 0x5fe PF: > { %s4128_s19 = sand.u32 1, %s5400_s15   ;;  %p9434_p10 = scmp.ne.s32.totalorder %s8395_s22, 0 }
 0x5ff   : > { %p9435_p13 = scmp.ge.s32.totalorder %s5412_s18, 2  ;;  %s4129_s20 = scalar_lea.sflag [#allocation4], %s4128_s19 }
 0x601   : > { %p5217_p3 = pnand %p9435_p13, %p9434_p10 }
 0x603   : > { %5395 = dma.done.wait (!%p5217_p3), %s4129_s20, 1024  }
 0x604   : > { %5397 = vsyncadd (!%p5217_p3), %s4129_s20, 4294966272  ;;  %p18_p7 = scmp.ge.s32.totalorder %s5505_s27, 4   ;;  %s9436_s15 = smov %s5404_s16 }
 0x605   : > { %s9437_s16 = smov %s5408_s17  ;;  %s9438_s17 = smov %s5539_s24 }
 0x606   : > { %s9439_s18 = smov %s5505_s27  ;;  %20 = sbr.rel (!%p18_p7) target bundleno = 6 (0x6), region = 85 }
 0x60d   :  { %4134 = vsyncpa [#allocation3], 1 }
 0x60e   :  { %4136 = vsyncpa [#allocation3 + $0x1], 1 }
 0x60f   :  { %4137 = vsyncpa [#allocation6], 1 }
 0x610   :  { %4138 = vsyncpa [#allocation4], 1 }
 0x611   :  { %4140 = vsyncpa [#allocation4 + $0x1], 1 }

</bundles_post_ra>
